<compile_context>
chip_gen: v5e
topology: v5e:2x2
jax: 0.10.0
libtpu: 0.0.40
codegen_flags: <defaults>
</compile_context>

<pallas_src>
import jax
import jax.numpy as jnp
import numpy as np
from jax import lax
from jax.experimental import pallas as pl
from jax.experimental.pallas import tpu as pltpu


def _round_up(x, m):
    return ((x + m - 1) // m) * m


# ConvTranspose2d(k=4, s=2, p=1): output row 2*q+dy reads padded-input row q+r
# with kernel tap ky (identical mapping for columns / dx / kx):
#   dy=0: r=0 -> ky=3, r=1 -> ky=1 ;  dy=1: r=1 -> ky=2, r=2 -> ky=0
_KTAP = {(0, 0): 3, (0, 1): 1, (1, 1): 2, (1, 2): 0}
_TAPS = {0: (0, 1), 1: (1, 2)}       # padded-offset taps used by output parity bit


def se_deconv_block_forward(x_nchw, weight, bias, gamma, beta, eps=1e-5,
                            compute_dtype=jnp.float32, block_rows=None,
                            vmem_budget_bytes=40 * 1024 * 1024,
                            channels_last=False):
    """weight: (Cin, Cout, 4, 4) PyTorch ConvTranspose2d layout; bias/gamma/beta: (Cout,).

    `bias` is accepted for API parity but not applied: training-mode BatchNorm
    subtracts the per-channel batch mean, so it cancels exactly in the output.
    compute_dtype=jnp.bfloat16 enables the bf16 MXU path (f32 accumulate) on any
    generation; BN/ELU math stays f32.
    """
    del bias
    N, Cin, H, W = x_nchw.shape
    Cout = weight.shape[1]

    is_bf16 = np.dtype(compute_dtype) == np.dtype(jnp.bfloat16)
    conv_dtype = jnp.bfloat16 if is_bf16 else jnp.float32
    esz = np.dtype(compute_dtype).itemsize
    conv_esz = np.dtype(conv_dtype).itemsize
    mm_precision = None if is_bf16 else lax.Precision.HIGHEST

    cp = _round_up(Cout, 32)          # per-parity channel pad -> n_out multiple of 128
    n_out = 4 * cp
    k4 = 4 * Cin                      # per-parity contraction (4 taps x Cin)
    k4p = _round_up(k4, 128)          # lane-dense MXU operand

    # ---- VMEM-budgeted row-band size (tq divides H) ---------------------------
    def est_vmem(tq_):
        img = 2 * (H + 2) * _round_up(W + 2, 8) * max(Cin, 128) * esz   # resident image x2
        wgt = 2 * 4 * k4p * max(cp, 128) * esz                          # weights x2
        conv_blk = 2 * tq_ * W * n_out * conv_esz                       # pass-1 out x2
        out_blk = 2 * tq_ * W * n_out * 4                               # pass-2 out x2
        tmp = tq_ * W * (k4p * esz + 2 * n_out * 4)                     # operands + f32 acc
        return img + wgt + conv_blk + out_blk + tmp + (2 << 20)

    tq = 1
    for d in sorted((d for d in range(1, H + 1) if H % d == 0), reverse=True):
        if block_rows is not None and d > block_rows:
            continue
        if est_vmem(d) <= vmem_budget_bytes:
            tq = d
            break
    n_th = H // tq
    tm = tq * W
    vmem_limit = int(min(max(est_vmem(tq) * 3 // 2, 16 << 20),
                         vmem_budget_bytes + (16 << 20)))

    # ---- dense per-parity weight blocks: (4, k4p, cp) -------------------------
    w4 = jnp.zeros((4, k4p, cp), jnp.float32)
    for dy in (0, 1):
        for dx in (0, 1):
            p = 2 * dy + dx
            t = 0
            for r in _TAPS[dy]:
                for c in _TAPS[dx]:
                    ky, kx = _KTAP[(dy, r)], _KTAP[(dx, c)]
                    w4 = w4.at[p, t * Cin:(t + 1) * Cin, :Cout].set(
                        weight[:, :, ky, kx].astype(jnp.float32))
                    t += 1
    w4 = w4.astype(compute_dtype)

    # ---- zero-padded NHWC input: the only HBM activation copy pass 1 reads ----
    x = jnp.transpose(x_nchw, (0, 2, 3, 1)).astype(compute_dtype)
    xp = jnp.pad(x, ((0, 0), (1, 1), (1, 1), (0, 0)))

    # ---- pass 1: in-VMEM tap formation + 4 per-parity dots + partial BN stats -
    def deconv_kernel(x_ref, w_ref, conv_ref, st_ref):
        q0 = pl.multiple_of(pl.program_id(1) * tq, tq)
        # 3x3 halo taps of the resident padded image for this row band (VMEM slices).
        slab = {}
        for r in range(3):
            for c in range(3):
                slab[(r, c)] = x_ref[0, pl.ds(q0 + r, tq), c:c + W, :]
        parts = []
        for dy in (0, 1):
            for dx in (0, 1):
                p = 2 * dy + dx
                op = jnp.concatenate(
                    [slab[(r, c)] for r in _TAPS[dy] for c in _TAPS[dx]],
                    axis=-1).reshape(tm, k4)
                if k4p != k4:
                    op = jnp.concatenate(
                        [op, jnp.zeros((tm, k4p - k4), op.dtype)], axis=-1)
                parts.append(jnp.dot(op, w_ref[p],
                                     preferred_element_type=jnp.float32,
                                     precision=mm_precision))
        acc = jnp.concatenate(parts, axis=-1)                  # (tm, n_out) f32
        conv_ref[0, 0] = acc.astype(conv_ref.dtype)
        # per-tile partial BN statistics from the f32 accumulator (exact even
        # when the stored conv intermediate is bf16); reduced outside the kernel.
        s = jnp.sum(acc, axis=0, keepdims=True)
        ss = jnp.sum(acc * acc, axis=0, keepdims=True)
        st_ref[0, 0] = jnp.concatenate([s, ss], axis=0)        # (2, n_out)

    conv, stats = pl.pallas_call(
        deconv_kernel,
        out_shape=(jax.ShapeDtypeStruct((N, n_th, tm, n_out), conv_dtype),
                   jax.ShapeDtypeStruct((N, n_th, 2, n_out), jnp.float32)),
        grid=(N, n_th),
        in_specs=[pl.BlockSpec((1, H + 2, W + 2, Cin), lambda n, i: (n, 0, 0, 0)),
                  pl.BlockSpec((4, k4p, cp), lambda n, i: (0, 0, 0))],
        out_specs=(pl.BlockSpec((1, 1, tm, n_out), lambda n, i: (n, i, 0, 0)),
                   pl.BlockSpec((1, 1, 2, n_out), lambda n, i: (n, i, 0, 0))),
        compiler_params=pltpu.CompilerParams(
            dimension_semantics=("parallel", "parallel"),
            vmem_limit_bytes=vmem_limit),
    )(xp, w4)

    # ---- BN affine coefficients from the reduced batch statistics -------------
    mtot = float(N * 4 * H * W)                           # output pixels per channel
    tot = jnp.sum(stats, axis=(0, 1))                     # (2, n_out)
    ch_sum = jnp.sum(tot[0].reshape(4, cp), axis=0)
    ch_sq = jnp.sum(tot[1].reshape(4, cp), axis=0)
    mean = ch_sum / mtot
    var = jnp.maximum(ch_sq / mtot - mean * mean, 0.0)    # clamp guards cancellation
    gamma_p = jnp.pad(gamma.astype(jnp.float32), (0, cp - Cout))
    beta_p = jnp.pad(beta.astype(jnp.float32), (0, cp - Cout))
    scale_c = gamma_p * lax.rsqrt(var + eps)
    shift_c = beta_p - mean * scale_c
    scale = jnp.tile(scale_c, (4,)).reshape(1, n_out)     # parity-major column layout
    shift = jnp.tile(shift_c, (4,)).reshape(1, n_out)

    # ---- pass 2: fused normalize + ELU, lane-dense tiles ----------------------
    def bn_elu_kernel(y_ref, scale_ref, shift_ref, o_ref):
        z = y_ref[0, 0].astype(jnp.float32) * scale_ref[...] + shift_ref[...]
        o_ref[0, 0] = jnp.where(z > 0, z, jnp.exp(jnp.minimum(z, 0.0)) - 1.0)

    out4 = pl.pallas_call(
        bn_elu_kernel,
        out_shape=jax.ShapeDtypeStruct((N, n_th, tm, n_out), jnp.float32),
        grid=(N, n_th),
        in_specs=[pl.BlockSpec((1, 1, tm, n_out), lambda n, i: (n, i, 0, 0)),
                  pl.BlockSpec((1, n_out), lambda n, i: (0, 0)),
                  pl.BlockSpec((1, n_out), lambda n, i: (0, 0))],
        out_specs=pl.BlockSpec((1, 1, tm, n_out), lambda n, i: (n, i, 0, 0)),
        compiler_params=pltpu.CompilerParams(
            dimension_semantics=("parallel", "parallel"),
            vmem_limit_bytes=vmem_limit),
    )(conv, scale, shift)

    # ---- epilogue: reshapes are layout-free; the module's NCHW contract forces
    # exactly one lane-moving transpose (fused by XLA).  channels_last skips it.
    out6 = out4.reshape(N, H, W, 2, 2, cp)[..., :Cout]    # (n, q, p, dy, dx, c)
    if channels_last:
        return out6.transpose(0, 1, 3, 2, 4, 5).reshape(N, 2 * H, 2 * W, Cout)
    return out6.transpose(0, 5, 1, 3, 2, 4).reshape(N, Cout, 2 * H, 2 * W)


# ------------------------------ pure-JAX reference -------------------------- #

def reference_forward(x, weight, bias, gamma, beta, eps=1e-5):
    w_flip = jnp.transpose(weight, (1, 0, 2, 3))[:, :, ::-1, ::-1]   # (Cout, Cin, 4, 4)
    conv = lax.conv_general_dilated(
        x, w_flip, window_strides=(1, 1), padding=[(2, 2), (2, 2)],
        lhs_dilation=(2, 2), rhs_dilation=(1, 1),
        dimension_numbers=('NCHW', 'OIHW', 'NCHW'),
        precision=lax.Precision.HIGHEST)
    conv = conv + bias.reshape(1, -1, 1, 1)
    mean = conv.mean(axis=(0, 2, 3), keepdims=True)
    var = ((conv - mean) ** 2).mean(axis=(0, 2, 3), keepdims=True)
    z = (gamma.reshape(1, -1, 1, 1) * (conv - mean) / jnp.sqrt(var + eps)
         + beta.reshape(1, -1, 1, 1))
    return jnp.where(z > 0, z, jnp.exp(jnp.minimum(z, 0.0)) - 1.0)


# ----------------------------------- main ----------------------------------- #

if __name__ == "__main__":
    key = jax.random.PRNGKey(0)
    N, Cin, Cout, H, W = 2, 4, 8, 16, 16
    kx_, kw_, kb_, kg_, kbe_ = jax.random.split(key, 5)

    x = jax.random.normal(kx_, (N, Cin, H, W), dtype=jnp.float32)
    weight = 0.1 * jax.random.normal(kw_, (Cin, Cout, 4, 4), dtype=jnp.float32)
    bias = 0.1 * jax.random.normal(kb_, (Cout,), dtype=jnp.float32)
    gamma = 1.0 + 0.1 * jax.random.normal(kg_, (Cout,), dtype=jnp.float32)
    beta = 0.1 * jax.random.normal(kbe_, (Cout,), dtype=jnp.float32)

    ref = reference_forward(x, weight, bias, gamma, beta)

    # f32 path; block_rows=4 forces 4 row-band tiles per image to exercise the
    # tiled grid and the per-tile partial-statistics reduction.
    out = se_deconv_block_forward(x, weight, bias, gamma, beta,
                                  block_rows=4, compute_dtype=jnp.float32)
    out = jax.block_until_ready(out)
    assert out.shape == (N, Cout, 2 * H, 2 * W)
    np.testing.assert_allclose(np.asarray(out), np.asarray(ref), atol=5e-4, rtol=5e-4)

    # bf16 MXU path (bf16 operands / weights / conv intermediate, f32 accumulate
    # and f32 BN/ELU); compared against a reference fed bf16-rounded inputs.
    ref_bf16 = reference_forward(
        x.astype(jnp.bfloat16).astype(jnp.float32),
        weight.astype(jnp.bfloat16).astype(jnp.float32), bias, gamma, beta)
    out_bf16 = se_deconv_block_forward(x, weight, bias, gamma, beta,
                                       block_rows=8, compute_dtype=jnp.bfloat16)
    out_bf16 = jax.block_until_ready(out_bf16)
    np.testing.assert_allclose(np.asarray(out_bf16), np.asarray(ref_bf16),
                               atol=5e-2, rtol=5e-2)

    print("KERNEL_OK")
</pallas_src>

<mosaic_0001>
module attributes {stable_mosaic.version = 11 : i64} {
  func.func @deconv_kernel(%arg0: i32, %arg1: i32, %arg2: memref<1x18x18x4xf32, #tpu.memory_space<vmem>>, %arg3: memref<4x128x32xf32, #tpu.memory_space<vmem>>, %arg4: memref<1x1x64x128xf32, #tpu.memory_space<vmem>>, %arg5: memref<1x1x2x128xf32, #tpu.memory_space<vmem>>) attributes {dimension_semantics = [#tpu.dimension_semantics<parallel>, #tpu.dimension_semantics<parallel>], iteration_bounds = array<i64: 2, 4>, scalar_prefetch = 0 : i64, scratch_operands = 0 : i64, tpu.core_type = #tpu.core_type<tc>, window_params = [{transform_indices = @transform_0, window_bounds = array<i64: 1, 18, 18, 4>}, {pipeline_mode = #tpu.pipeline_mode<synchronous>, transform_indices = @transform_1, window_bounds = array<i64: 4, 128, 32>}, {transform_indices = @transform_2, window_bounds = array<i64: 1, 1, 64, 128>}, {transform_indices = @transform_3, window_bounds = array<i64: 1, 1, 2, 128>}]} {
    %c4_i32 = arith.constant 4 : i32
    %0 = arith.muli %arg1, %c4_i32 : i32
    %1 = tpu.assume_multiple %0, 4 : i32
    %c0_i32 = arith.constant 0 : i32
    %2 = arith.addi %1, %c0_i32 : i32
    %c0 = arith.constant 0 : index
    %3 = arith.index_cast %2 : i32 to index
    %c0_0 = arith.constant 0 : index
    %c0_1 = arith.constant 0 : index
    %4 = vector.load %arg2[%c0, %3, %c0_0, %c0_1] : memref<1x18x18x4xf32, #tpu.memory_space<vmem>>, vector<1x4x16x4xf32>
    %5 = vector.shape_cast %4 : vector<1x4x16x4xf32> to vector<4x16x4xf32>
    %c0_i32_2 = arith.constant 0 : i32
    %6 = arith.addi %1, %c0_i32_2 : i32
    %c0_3 = arith.constant 0 : index
    %7 = arith.index_cast %6 : i32 to index
    %c1 = arith.constant 1 : index
    %c0_4 = arith.constant 0 : index
    %8 = vector.load %arg2[%c0_3, %7, %c1, %c0_4] : memref<1x18x18x4xf32, #tpu.memory_space<vmem>>, vector<1x4x16x4xf32>
    %9 = vector.shape_cast %8 : vector<1x4x16x4xf32> to vector<4x16x4xf32>
    %c0_i32_5 = arith.constant 0 : i32
    %10 = arith.addi %1, %c0_i32_5 : i32
    %c0_6 = arith.constant 0 : index
    %11 = arith.index_cast %10 : i32 to index
    %c2 = arith.constant 2 : index
    %c0_7 = arith.constant 0 : index
    %12 = vector.load %arg2[%c0_6, %11, %c2, %c0_7] : memref<1x18x18x4xf32, #tpu.memory_space<vmem>>, vector<1x4x16x4xf32>
    %13 = vector.shape_cast %12 : vector<1x4x16x4xf32> to vector<4x16x4xf32>
    %c1_i32 = arith.constant 1 : i32
    %14 = arith.addi %1, %c1_i32 : i32
    %c0_8 = arith.constant 0 : index
    %15 = arith.index_cast %14 : i32 to index
    %c0_9 = arith.constant 0 : index
    %c0_10 = arith.constant 0 : index
    %16 = vector.load %arg2[%c0_8, %15, %c0_9, %c0_10] : memref<1x18x18x4xf32, #tpu.memory_space<vmem>>, vector<1x4x16x4xf32>
    %17 = vector.shape_cast %16 : vector<1x4x16x4xf32> to vector<4x16x4xf32>
    %c1_i32_11 = arith.constant 1 : i32
    %18 = arith.addi %1, %c1_i32_11 : i32
    %c0_12 = arith.constant 0 : index
    %19 = arith.index_cast %18 : i32 to index
    %c1_13 = arith.constant 1 : index
    %c0_14 = arith.constant 0 : index
    %20 = vector.load %arg2[%c0_12, %19, %c1_13, %c0_14] : memref<1x18x18x4xf32, #tpu.memory_space<vmem>>, vector<1x4x16x4xf32>
    %21 = vector.shape_cast %20 : vector<1x4x16x4xf32> to vector<4x16x4xf32>
    %c1_i32_15 = arith.constant 1 : i32
    %22 = arith.addi %1, %c1_i32_15 : i32
    %c0_16 = arith.constant 0 : index
    %23 = arith.index_cast %22 : i32 to index
    %c2_17 = arith.constant 2 : index
    %c0_18 = arith.constant 0 : index
    %24 = vector.load %arg2[%c0_16, %23, %c2_17, %c0_18] : memref<1x18x18x4xf32, #tpu.memory_space<vmem>>, vector<1x4x16x4xf32>
    %25 = vector.shape_cast %24 : vector<1x4x16x4xf32> to vector<4x16x4xf32>
    %c2_i32 = arith.constant 2 : i32
    %26 = arith.addi %1, %c2_i32 : i32
    %c0_19 = arith.constant 0 : index
    %27 = arith.index_cast %26 : i32 to index
    %c0_20 = arith.constant 0 : index
    %c0_21 = arith.constant 0 : index
    %28 = vector.load %arg2[%c0_19, %27, %c0_20, %c0_21] : memref<1x18x18x4xf32, #tpu.memory_space<vmem>>, vector<1x4x16x4xf32>
    %29 = vector.shape_cast %28 : vector<1x4x16x4xf32> to vector<4x16x4xf32>
    %c2_i32_22 = arith.constant 2 : i32
    %30 = arith.addi %1, %c2_i32_22 : i32
    %c0_23 = arith.constant 0 : index
    %31 = arith.index_cast %30 : i32 to index
    %c1_24 = arith.constant 1 : index
    %c0_25 = arith.constant 0 : index
    %32 = vector.load %arg2[%c0_23, %31, %c1_24, %c0_25] : memref<1x18x18x4xf32, #tpu.memory_space<vmem>>, vector<1x4x16x4xf32>
    %33 = vector.shape_cast %32 : vector<1x4x16x4xf32> to vector<4x16x4xf32>
    %c2_i32_26 = arith.constant 2 : i32
    %34 = arith.addi %1, %c2_i32_26 : i32
    %c0_27 = arith.constant 0 : index
    %35 = arith.index_cast %34 : i32 to index
    %c2_28 = arith.constant 2 : index
    %c0_29 = arith.constant 0 : index
    %36 = vector.load %arg2[%c0_27, %35, %c2_28, %c0_29] : memref<1x18x18x4xf32, #tpu.memory_space<vmem>>, vector<1x4x16x4xf32>
    %37 = vector.shape_cast %36 : vector<1x4x16x4xf32> to vector<4x16x4xf32>
    %38 = tpu.concatenate %5, %9, %17, %21 in 2 : vector<4x16x4xf32>, vector<4x16x4xf32>, vector<4x16x4xf32>, vector<4x16x4xf32> -> vector<4x16x16xf32>
    %39 = vector.shape_cast %38 : vector<4x16x16xf32> to vector<64x16xf32>
    %cst = arith.constant 0.000000e+00 : f32
    %40 = vector.broadcast %cst : f32 to vector<64x112xf32>
    %41 = tpu.concatenate %39, %40 in 1 : vector<64x16xf32>, vector<64x112xf32> -> vector<64x128xf32>
    %c0_30 = arith.constant 0 : index
    %c0_31 = arith.constant 0 : index
    %c0_32 = arith.constant 0 : index
    %42 = vector.load %arg3[%c0_30, %c0_31, %c0_32] : memref<4x128x32xf32, #tpu.memory_space<vmem>>, vector<1x128x32xf32>
    %43 = vector.shape_cast %42 : vector<1x128x32xf32> to vector<128x32xf32>
    %cst_33 = arith.constant dense<0.000000e+00> : vector<64x32xf32>
    %44 = tpu.matmul %41, %43, %cst_33 {dimension_numbers = #tpu.dot_dimension_numbers<[1], [0], [0], [1], [0, 0, 1, 1], [], []>, precision = #tpu.contract_precision<fp32>} : vector<64x128xf32>, vector<128x32xf32>, vector<64x32xf32> -> vector<64x32xf32>
    %45 = tpu.concatenate %9, %13, %21, %25 in 2 : vector<4x16x4xf32>, vector<4x16x4xf32>, vector<4x16x4xf32>, vector<4x16x4xf32> -> vector<4x16x16xf32>
    %46 = vector.shape_cast %45 : vector<4x16x16xf32> to vector<64x16xf32>
    %cst_34 = arith.constant 0.000000e+00 : f32
    %47 = vector.broadcast %cst_34 : f32 to vector<64x112xf32>
    %48 = tpu.concatenate %46, %47 in 1 : vector<64x16xf32>, vector<64x112xf32> -> vector<64x128xf32>
    %c1_35 = arith.constant 1 : index
    %c0_36 = arith.constant 0 : index
    %c0_37 = arith.constant 0 : index
    %49 = vector.load %arg3[%c1_35, %c0_36, %c0_37] : memref<4x128x32xf32, #tpu.memory_space<vmem>>, vector<1x128x32xf32>
    %50 = vector.shape_cast %49 : vector<1x128x32xf32> to vector<128x32xf32>
    %cst_38 = arith.constant dense<0.000000e+00> : vector<64x32xf32>
    %51 = tpu.matmul %48, %50, %cst_38 {dimension_numbers = #tpu.dot_dimension_numbers<[1], [0], [0], [1], [0, 0, 1, 1], [], []>, precision = #tpu.contract_precision<fp32>} : vector<64x128xf32>, vector<128x32xf32>, vector<64x32xf32> -> vector<64x32xf32>
    %52 = tpu.concatenate %17, %21, %29, %33 in 2 : vector<4x16x4xf32>, vector<4x16x4xf32>, vector<4x16x4xf32>, vector<4x16x4xf32> -> vector<4x16x16xf32>
    %53 = vector.shape_cast %52 : vector<4x16x16xf32> to vector<64x16xf32>
    %cst_39 = arith.constant 0.000000e+00 : f32
    %54 = vector.broadcast %cst_39 : f32 to vector<64x112xf32>
    %55 = tpu.concatenate %53, %54 in 1 : vector<64x16xf32>, vector<64x112xf32> -> vector<64x128xf32>
    %c2_40 = arith.constant 2 : index
    %c0_41 = arith.constant 0 : index
    %c0_42 = arith.constant 0 : index
    %56 = vector.load %arg3[%c2_40, %c0_41, %c0_42] : memref<4x128x32xf32, #tpu.memory_space<vmem>>, vector<1x128x32xf32>
    %57 = vector.shape_cast %56 : vector<1x128x32xf32> to vector<128x32xf32>
    %cst_43 = arith.constant dense<0.000000e+00> : vector<64x32xf32>
    %58 = tpu.matmul %55, %57, %cst_43 {dimension_numbers = #tpu.dot_dimension_numbers<[1], [0], [0], [1], [0, 0, 1, 1], [], []>, precision = #tpu.contract_precision<fp32>} : vector<64x128xf32>, vector<128x32xf32>, vector<64x32xf32> -> vector<64x32xf32>
    %59 = tpu.concatenate %21, %25, %33, %37 in 2 : vector<4x16x4xf32>, vector<4x16x4xf32>, vector<4x16x4xf32>, vector<4x16x4xf32> -> vector<4x16x16xf32>
    %60 = vector.shape_cast %59 : vector<4x16x16xf32> to vector<64x16xf32>
    %cst_44 = arith.constant 0.000000e+00 : f32
    %61 = vector.broadcast %cst_44 : f32 to vector<64x112xf32>
    %62 = tpu.concatenate %60, %61 in 1 : vector<64x16xf32>, vector<64x112xf32> -> vector<64x128xf32>
    %c3 = arith.constant 3 : index
    %c0_45 = arith.constant 0 : index
    %c0_46 = arith.constant 0 : index
    %63 = vector.load %arg3[%c3, %c0_45, %c0_46] : memref<4x128x32xf32, #tpu.memory_space<vmem>>, vector<1x128x32xf32>
    %64 = vector.shape_cast %63 : vector<1x128x32xf32> to vector<128x32xf32>
    %cst_47 = arith.constant dense<0.000000e+00> : vector<64x32xf32>
    %65 = tpu.matmul %62, %64, %cst_47 {dimension_numbers = #tpu.dot_dimension_numbers<[1], [0], [0], [1], [0, 0, 1, 1], [], []>, precision = #tpu.contract_precision<fp32>} : vector<64x128xf32>, vector<128x32xf32>, vector<64x32xf32> -> vector<64x32xf32>
    %66 = tpu.concatenate %44, %51, %58, %65 in 1 : vector<64x32xf32>, vector<64x32xf32>, vector<64x32xf32>, vector<64x32xf32> -> vector<64x128xf32>
    %c0_48 = arith.constant 0 : index
    %c0_49 = arith.constant 0 : index
    %c0_50 = arith.constant 0 : index
    %c0_51 = arith.constant 0 : index
    %67 = vector.load %arg4[%c0_48, %c0_49, %c0_50, %c0_51] : memref<1x1x64x128xf32, #tpu.memory_space<vmem>>, vector<1x1x64x128xf32>
    %68 = vector.shape_cast %67 : vector<1x1x64x128xf32> to vector<64x128xf32>
    %69 = vector.shape_cast %66 : vector<64x128xf32> to vector<1x1x64x128xf32>
    tpu.vector_store %arg4[%c0_48, %c0_49, %c0_50, %c0_51], %69 {strides = array<i32>} : memref<1x1x64x128xf32, #tpu.memory_space<vmem>>, vector<1x1x64x128xf32>,
    %cst_52 = arith.constant dense<0.000000e+00> : vector<128xf32>
    %70 = vector.multi_reduction <add>, %66, %cst_52 [0] : vector<64x128xf32> to vector<128xf32>
    %71 = vector.shape_cast %70 : vector<128xf32> to vector<1x128xf32>
    %72 = arith.mulf %66, %66 : vector<64x128xf32>
    %cst_53 = arith.constant dense<0.000000e+00> : vector<128xf32>
    %73 = vector.multi_reduction <add>, %72, %cst_53 [0] : vector<64x128xf32> to vector<128xf32>
    %74 = vector.shape_cast %73 : vector<128xf32> to vector<1x128xf32>
    %75 = tpu.concatenate %71, %74 in 0 : vector<1x128xf32>, vector<1x128xf32> -> vector<2x128xf32>
    %c0_54 = arith.constant 0 : index
    %c0_55 = arith.constant 0 : index
    %c0_56 = arith.constant 0 : index
    %c0_57 = arith.constant 0 : index
    %76 = vector.load %arg5[%c0_54, %c0_55, %c0_56, %c0_57] : memref<1x1x2x128xf32, #tpu.memory_space<vmem>>, vector<1x1x2x128xf32>
    %77 = vector.shape_cast %76 : vector<1x1x2x128xf32> to vector<2x128xf32>
    %78 = vector.shape_cast %75 : vector<2x128xf32> to vector<1x1x2x128xf32>
    tpu.vector_store %arg5[%c0_54, %c0_55, %c0_56, %c0_57], %78 {strides = array<i32>} : memref<1x1x2x128xf32, #tpu.memory_space<vmem>>, vector<1x1x2x128xf32>,
    return
  }
  func.func @transform_0(%arg0: i32, %arg1: i32) -> (i32, i32, i32, i32) {
    %c0_i32 = arith.constant 0 : i32
    %c0_i32_0 = arith.constant 0 : i32
    %c0_i32_1 = arith.constant 0 : i32
    %c0_i32_2 = arith.constant 0 : i32
    return %arg0, %c0_i32, %c0_i32_0, %c0_i32_1 : i32, i32, i32, i32
  }
  func.func @transform_1(%arg0: i32, %arg1: i32) -> (i32, i32, i32) {
    %c0_i32 = arith.constant 0 : i32
    %c0_i32_0 = arith.constant 0 : i32
    %c0_i32_1 = arith.constant 0 : i32
    %c0_i32_2 = arith.constant 0 : i32
    return %c0_i32, %c0_i32_0, %c0_i32_1 : i32, i32, i32
  }
  func.func @transform_2(%arg0: i32, %arg1: i32) -> (i32, i32, i32, i32) {
    %c0_i32 = arith.constant 0 : i32
    %c0_i32_0 = arith.constant 0 : i32
    %c0_i32_1 = arith.constant 0 : i32
    return %arg0, %arg1, %c0_i32, %c0_i32_0 : i32, i32, i32, i32
  }
  func.func @transform_3(%arg0: i32, %arg1: i32) -> (i32, i32, i32, i32) {
    %c0_i32 = arith.constant 0 : i32
    %c0_i32_0 = arith.constant 0 : i32
    %c0_i32_1 = arith.constant 0 : i32
    return %arg0, %arg1, %c0_i32, %c0_i32_0 : i32, i32, i32, i32
  }
}

</mosaic_0001>

<bundles_post_ra>
// kernel: tpu_custom_call.1
= control target key start
LH: loop header
LB: loop body
LE: loop exit
PB: predicated region body
PF: predicated region fallthrough
CT: control target
= control target key end

     0   :  { %9 = vsyncpa [#allocation3], 0  ;;  %s6286_s0 = inlined_call_operand.vmem [shape: f32[2,18,18,4], index: 0, kind: input, shape index: {}]   ;;  %s6287_s1 = inlined_call_operand.vmem [shape: f32[4,128,32], index: 1, kind: input, shape index: {}]   ;;  %s6288_s2 = inlined_call_operand.hbm [shape: f32[2,4,64,128], index: 2, kind: output, shape index: {0}]   ;;  %s6289_s3 = inlined_call_operand.hbm [shape: f32[2,4,2,128], index: 3, kind: output, shape index: {1}]  }
   0x1   :  { %11 = vsyncpa [#allocation3 + $0x1], 0 }
   0x2   :  { %12 = vsyncpa [#allocation5], 0 }
   0x3   :  { %14 = vsyncpa [#allocation5 + $0x1], 0  ;;  %s3780_s12 = smov 0   ;;  %s3782_s13 = smov 0  }
   0x4   :  { %s3784_s14 = smov 0   ;;  %s3786_s15 = smov 0  }
   0x5   :  { %s3788_s16 = smov 0   ;;  %s3790_s17 = smov 0  }
   0x6   :  { %s3792_s18 = smov 0   ;;  %s3794_s19 = smov 0  }
   0x7 LB: > { %s3388_s20 = sadd.s32 4294967295, %s3751_s19   ;;  %s3389_s21 = sadd.s32 4294967294, %s3751_s19   ;;  %s3751_s19 = sphi %s3794_s19, %s20_s19   ;;  %s3747_s18 = sphi %s3792_s18, %s6440_s18   ;;  %s3743_s17 = sphi %s3790_s17, %s6439_s17   ;;  %s3739_s16 = sphi %s3788_s16, %s6438_s16   ;;  %s3735_s15 = sphi %s3786_s15, %s6437_s15   ;;  %s3731_s14 = sphi %s3784_s14, %s6436_s14   ;;  %s3727_s13 = sphi %s3782_s13, %s6435_s13   ;;  %s3723_s12 = sphi %s3780_s12, %s6434_s12  }
   0x8   : > { %s29_s22 = sadd.s32 1, %s3743_s17  ;;  %s32_s23 = sadd.s32 1, %s3747_s18 }
   0x9   : > { %p30_p0 = scmp.ge.s32.totalorder %s29_s22, 4  ;;  %p98_p1 = scmp.ne.s32.totalorder %s3731_s14, %s3727_s13 }
   0xa   : > { %p99_p2 = scmp.eq.s32.totalorder %s3388_s20, 7  ;;  %p104_p5 = scmp.ne.s32.totalorder %s3727_s13, %s3723_s12 }
   0xb   : > { %s6442_s22 = smov (%p30_p0, %s29_s22), 0  ;;  %s6444_s23 = smov (!%p30_p0, %s32_s23), %s3747_s18 }
   0xc   : > { %s84_s24 = ssub.s32 %s3743_s17, %s6442_s22  ;;  %p3831_p3 = por %p99_p2, %p98_p1 }
   0xd   : > { %p34_p4 = scmp.ge.s32.totalorder %s6444_s23, 2  ;;  %p105_p6 = scmp.eq.s32.totalorder %s3389_s21, 7 }
   0xe   : > { %p3392_p7 = scmp.ge.s32.totalorder %s3751_s19, 1  ;;  %p162_p9 = scmp.lt.s32.totalorder %s3751_s19, 9 }
   0xf   : > { %s6446_s23 = smov (%p34_p4, %s6444_s23), 0  ;;  %p3840_p8 = por %p105_p6, %p104_p5 }
  0x10   : > { %s83_s27 = ssub.s32 %s3747_s18, %s6446_s23  ;;  %s88_s28 = sadd.s32 1, %s3731_s14 }
  0x11   : > { %s85_s29 = sor.u32 %s84_s24, %s83_s27  ;;  %p163_p10 = pnand %p3392_p7, %p162_p9 }
  0x12   : > { %p86_p11 = scmp.eq.s32.totalorder %s85_s29, 0 }
  0x13   : > { %166 = sbr.rel (%p163_p10) target bundleno = 810 (0x32a), region = 28 }
  0x14   : > { %s3849_s30 = scalar_select %p86_p11, %s3731_s14, %s88_s28  }
  0x18   : > { %p191_p12 = scmp.lt.s32.totalorder %s3739_s16, 1  ;;  %s3397_s5 = smul.u32 96, %s3735_s15  ;;  %v424_v17 = vld [vmem:[%s6287_s1 + $0x78] sm:$0xff]  ;;  %v423_v20 = vld [vmem:[%s6287_s1 + $0x70] sm:$0xff]  ;;  %v422_v23 = vld [vmem:[%s6287_s1 + $0x68] sm:$0xff]  ;;  %vm373_vm0 = vcmask 31744  }
  0x19   : > { %s3753_s11 = smov 12   ;;  %s3754_s20 = smov 4   ;;  %v3944_v19 = vand.u32 4294901760, %v424_v17  ;;  %v3955_v22 = vand.u32 4294901760, %v423_v20  ;;  %v3969_v26 = vand.u32 4294901760, %v422_v23  ;;  %v421_v27 = vld [vmem:[%s6287_s1 + $0x60] sm:$0xff] }
  0x1a   : > { %s192_s4 = scalar_select %p191_p12, %s3739_s16, 1  ;;  %v3985_v32 = vand.u32 4294901760, %v421_v27  ;;  %v420_v33 = vld [vmem:[%s6287_s1 + $0x58] sm:$0xff]  ;;  %v419_v39 = vld [vmem:[%s6287_s1 + $0x50] sm:$0xff]  ;;  %v418_v46 = vld [vmem:[%s6287_s1 + $0x48] sm:$0xff]  ;;  %vm382_vm1 = vcmask 64512  }
  0x1b   : > { %s3755_s21 = smov 8   ;;  %v3953_v21 = vsub.f32 %v424_v17, %v3944_v19  ;;  %741 = vmatpush.msra.mxu3 %v3944_v19  ;;  %426 = vmatpush.msra.mxu0 %v3944_v19  ;;  %v3966_v25 = vsub.f32 %v423_v20, %v3955_v22  ;;  %v3982_v31 = vsub.f32 %v422_v23, %v3969_v26  ;;  %v4004_v38 = vand.u32 4294901760, %v420_v33  ;;  %v417_v52 = vld [vmem:[%s6287_s1 + $0x40] sm:$0xff]  ;;  %v416_v59 = vld [vmem:[%s6287_s1 + $0x38] sm:$0xff]  ;;  %s3758_s27 = smov 96  }
  0x1c   : > { %s3507_s6 = smul.u32 432, %s192_s4  ;;  %v3997_v37 = vsub.f32 %v421_v27, %v3985_v32  ;;  %v4017_v44 = vand.u32 4294901760, %v419_v39  ;;  %v4034_v50 = vand.u32 4294901760, %v418_v46  ;;  %v4048_v57 = vand.u32 4294901760, %v417_v52  ;;  %v414_v27 = vld [vmem:[%s6287_s1 + $0x28] sm:$0xff]  ;;  %s6180_s28 = sand.u32 1, %s3727_s13  }
  0x1d   : > { %v524_v24 = vand.u32 4294901760, %v3953_v21  ;;  %653 = vmatpush.msra.mxu2 %v3953_v21  ;;  %743 = vmatpush.msra.mxu3 %v3955_v22  ;;  %v530_v30 = vand.u32 4294901760, %v3966_v25  ;;  %v536_v36 = vand.u32 4294901760, %v3982_v31  ;;  %v4022_v45 = vsub.f32 %v420_v33, %v4004_v38  ;;  %s3393_s29 = sshll.u32 %s6180_s28, 6 }
  0x1e   : > { %s195_s9 = scalar_lea.vmem %s6286_s0, %s3507_s6  ;;  %428 = vmatpush.msra.mxu0 %v3955_v22  ;;  %v542_v43 = vand.u32 4294901760, %v3997_v37  ;;  %v4032_v49 = vsub.f32 %v419_v39, %v4017_v44  ;;  %v4046_v56 = vsub.f32 %v418_v46, %v4034_v50  ;;  %v4064_v62 = vsub.f32 %v417_v52, %v4048_v57  ;;  %v413_v39 = vld [vmem:[%s6287_s1 + $0x20] sm:$0xff]  ;;  %v412_v52 = vld [vmem:[%s6287_s1 + $0x18] sm:$0xff]  ;;  %s6187_s4 = scalar_lea.vmem [#allocation2], %s3393_s29 }
  0x1f   : > { %s3857_s10 = scalar_lea.vmem %s195_s9, %s3397_s5  ;;  %v525_v29 = vsub.f32 %v3953_v21, %v524_v24  ;;  %656 = vmatpush.msra.mxu2 %v3966_v25  ;;  %745 = vmatpush.msra.mxu3 %v3969_v26  ;;  %v531_v35 = vsub.f32 %v3966_v25, %v530_v30  ;;  %v537_v42 = vsub.f32 %v3982_v31, %v536_v36  ;;  %v548_v51 = vand.u32 4294901760, %v4022_v45  ;;  %s3500_s5 = sshll.u32 %s3735_s15, 3 }
  0x20   : > { %v3860_v0 = vld [vmem:[%s3857_s10 + $0x19] sm:$0xff]  ;;  %v207_v1 = vld [vmem:[%s3857_s10 + $0x1] sm:$0xff]  ;;  %v208_v3 = vld [vmem:[%s3857_s10 + $0x9] sm:$0xff]  ;;  %430 = vmatpush.msra.mxu0 %v3969_v26  ;;  %v543_v48 = vsub.f32 %v3997_v37, %v542_v43  ;;  %v554_v55 = vand.u32 4294901760, %v4032_v49  ;;  %v560_v61 = vand.u32 4294901760, %v4046_v56  ;;  %v4066_v63 = vand.u32 4294901760, %v416_v59 }
  0x21   : > { %349 = vrot.lane.b32.xlu1 %v3860_v0, %s3753_s11  ;;  %285 = vrot.lane.b32.xlu0 %v207_v1, %s3754_s20  ;;  %v3867_v2 = vld [vmem:[%s3857_s10 + $0x20] sm:$0xff]  ;;  %v3873_v4 = vld [vmem:[%s3857_s10 + $0x18] sm:$0xff]  ;;  %v526_v34 = vand.u32 4294901760, %v525_v29  ;;  %v532_v41 = vand.u32 4294901760, %v531_v35  ;;  %v538_v47 = vand.u32 4294901760, %v537_v42  ;;  %v549_v58 = vsub.f32 %v4022_v45, %v548_v51  ;;  %s3501_s6 = sshll.u32 %s3739_s16, 5 }
  0x22   : > { %319 = vrot.lane.b32.xlu2 %v3867_v2, %s3755_s21  ;;  %v3879_v5 = vld [vmem:[%s3857_s10 + $0x21] sm:$0xff]  ;;  %v3884_v6 = vld [vmem:[%s3857_s10 + $0x30] sm:$0xff]  ;;  %v3896_v8 = vld [vmem:[%s3857_s10 + $0x38] sm:$0xff]  ;;  %659 = vmatpush.msra.mxu2 %v3982_v31  ;;  %v544_v54 = vand.u32 4294901760, %v543_v48  ;;  %v555_v60 = vsub.f32 %v4032_v49, %v554_v55  ;;  %v566_v17 = vand.u32 4294901760, %v4064_v62  ;;  %v4084_v20 = vsub.f32 %v416_v59, %v4066_v63  ;;  %s3245_s7 = sadd.s32 %s3501_s6, %s3500_s5 }
  0x23   : > { %v3891_v7 = vld [vmem:[%s3857_s10 + $0x31] sm:$0xff]  ;;  %v3903_v9 = vld [vmem:[%s3857_s10 + $0x39] sm:$0xff]  ;;  %v3908_v10 = vld [vmem:[%s3857_s10 + $0x48] sm:$0xff]  ;;  %747 = vmatpush.msra.mxu3 %v3985_v32  ;;  %527 = vmatpush.msra.mxu1 %v526_v34  ;;  %v550_v1 = vand.u32 4294901760, %v549_v58  ;;  %v4100_v34 = vand.u32 4294901760, %v414_v27  ;;  %v4130_v59 = vand.u32 4294901760, %v412_v52 }
  0x24   : > { %v3915_v11 = vld [vmem:[%s3857_s10 + $0x49] sm:$0xff]  ;;  %v3924_v13 = vld [vmem:[%s3857_s10 + $0x51] sm:$0xff]  ;;  %v3406_v14 = vld [vmem:[%s3857_s10 + $0x60] sm:$0xff]  ;;  %662 = vmatpush.msra.mxu2 %v3997_v37  ;;  %432 = vmatpush.msra.mxu0 %v3985_v32  ;;  %v567_v29 = vsub.f32 %v4064_v62, %v566_v17  ;;  %v6294_v33 = vand.u32 4294901760, %v4084_v20  ;;  %vm391_vm2 = vcmask 97280   ;;  %vm400_vm3 = vcmask 130048  }
  0x25   : > { %v3405_v12 = vld [vmem:[%s3857_s10 + $0x50] sm:$0xff]  ;;  %v3930_v15 = vld [vmem:[%s3857_s10 + $0x61] sm:$0xff]  ;;  %749 = vmatpush.msra.mxu3 %v4004_v38  ;;  %533 = vmatpush.msra.mxu1 %v532_v41  ;;  %v4114_v46 = vsub.f32 %v414_v27, %v4100_v34  ;;  %vm3156_vm4 = vcmask 261120   ;;  %vm3165_vm5 = vcmask 523264   ;;  %vm3174_vm6 = vcmask 785408   ;;  %s3502_s8 = sshll.u32 %s3245_s7, 3 }
  0x26   : > { %v3407_v16 = vld [vmem:[%s3857_s10 + $0x68] sm:$0xff]  ;;  %v4010_v40 = vld [vmem:[%s3857_s10 + $0x1a] sm:$0xff]  ;;  %665 = vmatpush.msra.mxu2 %v4022_v45  ;;  %434 = vmatpush.msra.mxu0 %v4004_v38  ;;  %v568_v41 = vand.u32 4294901760, %v567_v29  ;;  %v573_v42 = vsub.f32 %v4084_v20, %v6294_v33  ;;  %s3247_s24 = scalar_lea.hbm %s6288_s2, %s3502_s8  ;;  %s3645_s8 = scalar_lea.hbm %s6288_s2, 512 }
  0x27   : > { %v3942_v18 = vld [vmem:[%s3857_s10 + $0x69] sm:$0xff]  ;;  %751 = vmatpush.msra.mxu3 %v4017_v44  ;;  %539 = vmatpush.msra.mxu1 %v538_v47  ;;  %v4117_v47 = vand.u32 4294901760, %v413_v39  ;;  %v220_v33 = vld [vmem:[%s3857_s10 + $0x3a] sm:$0xff] }
  0x28   : > { %v215_v28 = vld [vmem:[%s3857_s10 + $0x2] sm:$0xff]  ;;  %v216_v53 = vld [vmem:[%s3857_s10 + $0xa] sm:$0xff]  ;;  %668 = vmatpush.msra.mxu2 %v4032_v49  ;;  %436 = vmatpush.msra.mxu0 %v4017_v44 }
  0x29   : > { %287 = vrot.lane.b32.xlu1 %v208_v3, %s3754_s20  ;;  %317 = vrot.lane.b32.xlu0 %v3873_v4, %s3755_s21  ;;  %v415_v3 = vld [vmem:[%s6287_s1 + $0x30] sm:$0xff]  ;;  %v4127_v58 = vsub.f32 %v413_v39, %v4117_v47  ;;  %v410_v29 = vld [vmem:[%s6287_s1 + $0x8] sm:$0xff] }
  0x2a   : > { %351 = vrot.lane.b32.xlu2 %v3879_v5, %s3753_s11  ;;  %753 = vmatpush.msra.mxu3 %v4034_v50  ;;  %v4089_v23 = vand.u32 4294901760, %v415_v3  ;;  %v3422_v31 = vld [vmem:[%s3857_s10 + $0x62] sm:$0xff] }
  0x2b   : > { %545 = vmatpush.msra.mxu1 %v544_v54  ;;  %671 = vmatpush.msra.mxu2 %v4046_v56  ;;  %v6291_v54 = vand.u32 4294901760, %v4114_v46  ;;  %v3462_v49 = vld [vmem:[%s6287_s1 + $0xe0] sm:$0xff] }
  0x2c   : > { %755 = vmatpush.msra.mxu3 %v4048_v57  ;;  %438 = vmatpush.msra.mxu0 %v4034_v50  ;;  %v4103_v35 = vsub.f32 %v415_v3, %v4089_v23  ;;  %v219_v3 = vld [vmem:[%s3857_s10 + $0x32] sm:$0xff] }
  0x2d   : > { %551 = vmatpush.msra.mxu1 %v550_v1  ;;  %674 = vmatpush.msra.mxu2 %v4064_v62  ;;  %v411_v1 = vld [vmem:[%s6287_s1 + $0x10] sm:$0xff] }
  0x2e   : > { %757 = vmatpush.msra.mxu3 %v4066_v63  ;;  %440 = vmatpush.msra.mxu0 %v4048_v57  ;;  %v6292_v48 = vand.u32 4294901760, %v4103_v35  ;;  %v4151_v27 = vand.u32 4294901760, %v411_v1 }
  0x2f   : > { %677 = vmatpush.msra.mxu2 %v4084_v20 }
  0x30   : > { %759 = vmatpush.msra.mxu3 %v4089_v23  ;;  %442 = vmatpush.msra.mxu0 %v4066_v63 }
  0x31   : > { %289 = vrot.lane.b32.xlu0 %v3860_v0, %s3754_s20  ;;  %321 = vrot.lane.b32.xlu1 %v3884_v6, %s3755_s21 }
  0x32   : > { %353 = vrot.lane.b32.xlu2 %v3891_v7, %s3753_s11  ;;  %680 = vmatpush.msra.mxu2 %v4103_v35 }
  0x33   : > { %761 = vmatpush.msra.mxu3 %v4100_v34  ;;  %444 = vmatpush.msra.mxu0 %v4089_v23 }
  0x34   : > { %683 = vmatpush.msra.mxu2 %v4114_v46 }
  0x35   : > { %763 = vmatpush.msra.mxu3 %v4117_v47  ;;  %446 = vmatpush.msra.mxu0 %v4100_v34 }
  0x36   : > { %686 = vmatpush.msra.mxu2 %v4127_v58 }
  0x37   : > { %765 = vmatpush.msra.mxu3 %v4130_v59  ;;  %448 = vmatpush.msra.mxu0 %v4117_v47 }
  0x39   : > { %291 = vrot.lane.b32.xlu0 %v3879_v5, %s3754_s20  ;;  %323 = vrot.lane.b32.xlu1 %v3896_v8, %s3755_s21 }
  0x3a   : > { %355 = vrot.lane.b32.xlu2 %v3903_v9, %s3753_s11  ;;  %767 = vmatpush.msra.mxu3 %v4151_v27 }
  0x3b   : > { %450 = vmatpush.msra.mxu0 %v4130_v59 }
  0x3d   : > { %452 = vmatpush.msra.mxu0 %v4151_v27 }
  0x41   : > { %293 = vrot.lane.b32.xlu0 %v3891_v7, %s3754_s20  ;;  %325 = vrot.lane.b32.xlu1 %v3908_v10, %s3755_s21 }
  0x42   : > { %357 = vrot.lane.b32.xlu2 %v3915_v11, %s3753_s11 }
  0x49   : > { %295 = vrot.lane.b32.xlu0 %v3903_v9, %s3754_s20  ;;  %327 = vrot.lane.b32.xlu1 %v3405_v12, %s3755_s21  ;;  %v4076_v12 = vld [vmem:[%s3857_s10 + $0x22] sm:$0xff] }
  0x4a   : > { %359 = vrot.lane.b32.xlu2 %v3924_v13, %s3753_s11 }
  0x51   : > { %297 = vrot.lane.b32.xlu0 %v3915_v11, %s3754_s20  ;;  %329 = vrot.lane.b32.xlu1 %v3406_v14, %s3755_s21  ;;  %v556_v14 = vand.u32 4294901760, %v555_v60  ;;  %v579_v60 = vsub.f32 %v4103_v35, %v6292_v48 }
  0x52   : > { %361 = vrot.lane.b32.xlu2 %v3930_v15, %s3753_s11 }
  0x53   : > { %557 = vmatpush.msra.mxu1 %v556_v14  ;;  %v585_v14 = vsub.f32 %v4114_v46, %v6291_v54 }
  0x55   : > { %v586_v39 = vand.u32 4294901760, %v585_v14 }
  0x59   : > { %299 = vrot.lane.b32.xlu0 %v3924_v13, %s3754_s20  ;;  %331 = vrot.lane.b32.xlu1 %v3407_v16, %s3755_s21  ;;  %v561_v16 = vsub.f32 %v4046_v56, %v560_v61 }
  0x5a   : > { %363 = vrot.lane.b32.xlu2 %v3942_v18, %s3753_s11 }
  0x61   : > { %991 = vrot.lane.b32.xlu0 %v215_v28, %s3754_s20  ;;  %1015 = vrot.lane.b32.xlu1 %v3860_v0, %s3755_s21  ;;  %v562_v28 = vand.u32 4294901760, %v561_v16  ;;  %v6290_v16 = vand.u32 4294901760, %v4127_v58 }
  0x62   : > { %1047 = vrot.lane.b32.xlu2 %v4010_v40, %s3753_s11 }
  0x63   : > { %563 = vmatpush.msra.mxu1 %v562_v28  ;;  %v580_v28 = vand.u32 4294901760, %v579_v60  ;;  %v4168_v60 = vand.u32 4294901760, %v410_v29 }
  0x65   : > { %569 = vmatpush.msra.mxu1 %v568_v41  ;;  %v591_v41 = vsub.f32 %v4127_v58, %v6290_v16  ;;  %v4182_v48 = vsub.f32 %v410_v29, %v4168_v60  ;;  %769 = vmatpush.msra.mxu3 %v4168_v60 }
  0x66   : > { %454 = vmatpush.msra.mxu0 %v4168_v60 }
  0x67   : > { %v592_v14 = vand.u32 4294901760, %v591_v41  ;;  %v608_v29 = vand.u32 4294901760, %v4182_v48 }
  0x69   : > { %993 = vrot.lane.b32.xlu0 %v216_v53, %s3754_s20  ;;  %1017 = vrot.lane.b32.xlu1 %v3879_v5, %s3755_s21  ;;  %v574_v53 = vand.u32 4294901760, %v573_v42 }
  0x6a   : > { %1049 = vrot.lane.b32.xlu2 %v4076_v12, %s3753_s11 }
  0x6b   : > { %575 = vmatpush.msra.mxu1 %v574_v53  ;;  %v409_v53 = vld [vmem:[%s6287_s1] sm:$0xff] }
  0x6c   : > { %v4178_v54 = vand.u32 4294901760, %v409_v53 }
  0x6d   : > { %581 = vmatpush.msra.mxu1 %v580_v28 }
  0x6e   : > { %771 = vmatpush.msra.mxu3 %v4178_v54  ;;  %456 = vmatpush.msra.mxu0 %v4178_v54 }
  0x6f   : > { %587 = vmatpush.msra.mxu1 %v586_v39 }
  0x70   : > { %824 = vmatpush.msrb.mxu0 %v524_v24 }
  0x71   : > { %995 = vrot.lane.b32.xlu0 %v4010_v40, %s3754_s20  ;;  %1019 = vrot.lane.b32.xlu1 %v3891_v7, %s3755_s21  ;;  %v4149_v40 = vsub.f32 %v412_v52, %v4130_v59  ;;  %v4164_v52 = vsub.f32 %v411_v1, %v4151_v27 }
  0x72   : > { %1051 = vrot.lane.b32.xlu2 %v219_v3, %s3753_s11  ;;  %593 = vmatpush.msra.mxu1 %v592_v14 }
  0x73   : > { %v6293_v42 = vand.u32 4294901760, %v4149_v40  ;;  %v6295_v1 = vand.u32 4294901760, %v4164_v52  ;;  %689 = vmatpush.msra.mxu2 %v4149_v40  ;;  %828 = vmatpush.msrb.mxu0 %v530_v30 }
  0x75   : > { %v597_v16 = vsub.f32 %v4149_v40, %v6293_v42  ;;  %v603_v41 = vsub.f32 %v4164_v52, %v6295_v1  ;;  %692 = vmatpush.msra.mxu2 %v4164_v52  ;;  %v4190_v42 = vsub.f32 %v409_v53, %v4178_v54  ;;  %v609_v53 = vsub.f32 %v4182_v48, %v608_v29 }
  0x76   : > { %832 = vmatpush.msrb.mxu0 %v536_v36 }
  0x77   : > { %v598_v28 = vand.u32 4294901760, %v597_v16  ;;  %v604_v16 = vand.u32 4294901760, %v603_v41  ;;  %v614_v39 = vand.u32 4294901760, %v4190_v42  ;;  %695 = vmatpush.msra.mxu2 %v4182_v48  ;;  %v610_v41 = vand.u32 4294901760, %v609_v53 }
  0x78   : > { %836 = vmatpush.msrb.mxu0 %v542_v43 }
  0x79   : > { %997 = vrot.lane.b32.xlu0 %v4076_v12, %s3754_s20  ;;  %1021 = vrot.lane.b32.xlu1 %v3903_v9, %s3755_s21  ;;  %v615_v12 = vsub.f32 %v4190_v42, %v614_v39 }
  0x7a   : > { %1053 = vrot.lane.b32.xlu2 %v220_v33, %s3753_s11  ;;  %599 = vmatpush.msra.mxu1 %v598_v28  ;;  %v4220_v28 = vld [vmem:[%s3857_s10 + $0x4a] sm:$0xff] }
  0x7b   : > { %698 = vmatpush.msra.mxu2 %v4190_v42  ;;  %v616_v1 = vand.u32 4294901760, %v615_v12  ;;  %840 = vmatpush.msrb.mxu0 %v548_v51  ;;  %v4297_v51 = vand.u32 4294901760, %v3462_v49 }
  0x7c   : > { %v4209_v14 = vpop.permute.xlu2 %319  ;;  %605 = vmatpush.msra.mxu1 %v604_v16 }
  0x7d   : > { %844 = vmatpush.msrb.mxu0 %v554_v55 }
  0x7e   : > { %611 = vmatpush.msra.mxu1 %v610_v41 }
  0x7f   : > { %848 = vmatpush.msrb.mxu0 %v560_v61  ;;  %v6350_v61 = vand.u32 4294901760, %v4084_v20  ;;  %v200_v20 = vld [vmem:[%s3857_s10 + $0x8] sm:$0xff] }
  0x80   : > { %617 = vmatpush.msra.mxu1 %v616_v1  ;;  %v6351_v1 = vand.u32 4294901760, %v4103_v35  ;;  %v6352_v35 = vand.u32 4294901760, %v4114_v46 }
  0x81   : > { %999 = vrot.lane.b32.xlu0 %v219_v3, %s3754_s20  ;;  %1023 = vrot.lane.b32.xlu1 %v3915_v11, %s3755_s21  ;;  %v3465_v3 = vld [vmem:[%s6287_s1 + $0xf8] sm:$0xff] }
  0x82   : > { %1055 = vrot.lane.b32.xlu2 %v4220_v28, %s3753_s11  ;;  %919 = vmatpush.msrb.mxu1 %v3944_v19  ;;  %v222_v19 = vld [vmem:[%s3857_s10 + $0x52] sm:$0xff]  ;;  %v4246_v21 = vand.u32 4294901760, %v3465_v3 }
  0x83   : > { %852 = vmatpush.msrb.mxu0 %v566_v17  ;;  %v3423_v17 = vld [vmem:[%s3857_s10 + $0x6a] sm:$0xff] }
  0x84   : > { %v4227_v16 = vpop.permute.xlu2 %351  ;;  %921 = vmatpush.msrb.mxu1 %v3955_v22  ;;  %v3464_v22 = vld [vmem:[%s6287_s1 + $0xf0] sm:$0xff]  ;;  %1121 = vmatpush.msrb.mxu2 %v4246_v21  ;;  %v4260_v25 = vsub.f32 %v3465_v3, %v4246_v21 }
  0x85   : > { %856 = vmatpush.msrb.mxu0 %v6350_v61 }
  0x86   : > { %923 = vmatpush.msrb.mxu1 %v3969_v26  ;;  %v1219_v30 = vand.u32 4294901760, %v4260_v25 }
  0x87   : > { %860 = vmatpush.msrb.mxu0 %v6351_v1  ;;  %v6355_v1 = vand.u32 4294901760, %v4164_v52  ;;  %v3459_v52 = vld [vmem:[%s6287_s1 + $0xc8] sm:$0xff] }
  0x88   : > { %925 = vmatpush.msrb.mxu1 %v3985_v32  ;;  %v1220_v36 = vsub.f32 %v4260_v25, %v1219_v30 }
  0x89   : > { %1001 = vrot.lane.b32.xlu0 %v220_v33, %s3754_s20  ;;  %1025 = vrot.lane.b32.xlu1 %v3924_v13, %s3755_s21  ;;  %v4251_v13 = vand.u32 4294901760, %v3464_v22 }
  0x8a   : > { %1057 = vrot.lane.b32.xlu2 %v222_v19, %s3753_s11  ;;  %927 = vmatpush.msrb.mxu1 %v4004_v38  ;;  %v3463_v38 = vld [vmem:[%s6287_s1 + $0xe8] sm:$0xff] }
  0x8b   : > { %v4263_v26 = vsub.f32 %v3464_v22, %v4251_v13  ;;  %1123 = vmatpush.msrb.mxu2 %v4251_v13  ;;  %v4292_v45 = vand.u32 4294901760, %v3463_v38  ;;  %864 = vmatpush.msrb.mxu0 %v6352_v35  ;;  %v3460_v22 = vld [vmem:[%s6287_s1 + $0xd0] sm:$0xff]  ;;  %v4398_v35 = vand.u32 4294901760, %v3459_v52 }
  0x8c   : > { %v4256_v24 = vpop.permute.xlu2 %353  ;;  %929 = vmatpush.msrb.mxu1 %v4017_v44 }
  0x8d   : > { %v1225_v32 = vand.u32 4294901760, %v4263_v26  ;;  %1125 = vmatpush.msrb.mxu2 %v4292_v45  ;;  %v4306_v56 = vsub.f32 %v3463_v38, %v4292_v45 }
  0x8e   : > { %931 = vmatpush.msrb.mxu1 %v4034_v50 }
  0x8f   : > { %v1226_v37 = vsub.f32 %v4263_v26, %v1225_v32  ;;  %v1231_v62 = vand.u32 4294901760, %v4306_v56  ;;  %1127 = vmatpush.msrb.mxu2 %v4297_v51 }
  0x90   : > { %933 = vmatpush.msrb.mxu1 %v4048_v57  ;;  %v4309_v57 = vsub.f32 %v3462_v49, %v4297_v51 }
  0x91   : > { %1003 = vrot.lane.b32.xlu0 %v4220_v28, %s3754_s20  ;;  %1027 = vrot.lane.b32.xlu1 %v3930_v15, %s3755_s21  ;;  %v1221_v15 = vand.u32 4294901760, %v1220_v36  ;;  %v1227_v50 = vand.u32 4294901760, %v1226_v37  ;;  %v6353_v37 = vand.u32 4294901760, %v4127_v58 }
  0x92   : > { %1059 = vrot.lane.b32.xlu2 %v3422_v31, %s3753_s11  ;;  %935 = vmatpush.msrb.mxu1 %v4066_v63  ;;  %v199_v63 = vld [vmem:[%s3857_s10] sm:$0xff]  ;;  %v1237_v33 = vand.u32 4294901760, %v4309_v57 }
  0x93   : > { %v350_v43 = vpop.permute.xlu1 %349  ;;  %v286_v44 = vpop.permute.xlu0 %285  ;;  %1222 = vmatpush.msrb.mxu3 %v1221_v15  ;;  %868 = vmatpush.msrb.mxu0 %v6353_v37 }
  0x94   : > { %v4302_v55 = vpop.permute.xlu2 %355  ;;  %937 = vmatpush.msrb.mxu1 %v4089_v23  ;;  %v1232_v23 = vsub.f32 %v4306_v56, %v1231_v62  ;;  %v1238_v53 = vsub.f32 %v4309_v57, %v1237_v33 }
  0x95   : > { %1228 = vmatpush.msrb.mxu3 %v1227_v50 }
  0x96   : > { %939 = vmatpush.msrb.mxu1 %v4100_v34  ;;  %v3461_v34 = vld [vmem:[%s6287_s1 + $0xd8] sm:$0xff]  ;;  %v1239_v36 = vand.u32 4294901760, %v1238_v53 }
  0x97   : > { %v4340_v3 = vand.u32 4294901760, %v3461_v34 }
  0x98   : > { %941 = vmatpush.msrb.mxu1 %v4117_v47  ;;  %v4347_v47 = vand.u32 4294901760, %v3460_v22 }
  0x99   : > { %1005 = vrot.lane.b32.xlu0 %v222_v19, %s3754_s20  ;;  %1029 = vrot.lane.b32.xlu1 %v3942_v18, %s3755_s21  ;;  %v374_v18 = vsel %vm373_vm0, %v199_v63, %v286_v44  ;;  %v1233_v19 = vand.u32 4294901760, %v1232_v23  ;;  %v4359_v49 = vsub.f32 %v3461_v34, %v4340_v3 }
  0x9a   : > { %1061 = vrot.lane.b32.xlu2 %v3423_v17, %s3753_s11  ;;  %943 = vmatpush.msrb.mxu1 %v4130_v59  ;;  %v4365_v59 = vsub.f32 %v3460_v22, %v4347_v47 }
  0x9b   : > { %v288_v12 = vpop.permute.xlu1 %287  ;;  %v318_v41 = vpop.permute.xlu0 %317  ;;  %1234 = vmatpush.msrb.mxu3 %v1233_v19  ;;  %1129 = vmatpush.msrb.mxu2 %v4340_v3  ;;  %v1243_v63 = vand.u32 4294901760, %v4359_v49  ;;  %v4413_v19 = vsub.f32 %v3459_v52, %v4398_v35 }
  0x9c   : > { %v375_v31 = vsel %vm373_vm0, %v200_v20, %v288_v12  ;;  %v383_v46 = vsel %vm382_vm1, %v374_v18, %v318_v41  ;;  %v4355_v15 = vpop.permute.xlu2 %357  ;;  %945 = vmatpush.msrb.mxu1 %v4151_v27  ;;  %v3458_v18 = vld [vmem:[%s6287_s1 + $0xc0] sm:$0xff] }
  0x9d   : > { %v392_v38 = vsel %vm391_vm2, %v383_v46, %v350_v43  ;;  %v384_v44 = vsel %vm382_vm1, %v375_v31, %v4209_v14  ;;  %v6354_v43 = vand.u32 4294901760, %v4149_v40  ;;  %1240 = vmatpush.msrb.mxu3 %v1239_v36  ;;  %1131 = vmatpush.msrb.mxu2 %v4347_v47  ;;  %v1244_v27 = vsub.f32 %v4359_v49, %v1243_v63 }
  0x9e   : > { %v401_v50 = vsel %vm400_vm3, %v392_v38, 0.0  ;;  %v393_v58 = vsel %vm391_vm2, %v384_v44, %v4227_v16  ;;  %v6302_v16 = vand.u32 4294901760, %v4365_v59  ;;  %947 = vmatpush.msrb.mxu1 %v4168_v60  ;;  %v6301_v36 = vand.u32 4294901760, %v4413_v19 }
  0x9f   : > { %872 = vmatpush.msrb.mxu0 %v6354_v43  ;;  %v4370_v14 = vand.u32 4294901760, %v401_v50  ;;  %v402_v61 = vsel %vm400_vm3, %v393_v58, 0.0  ;;  %1133 = vmatpush.msrb.mxu2 %v4398_v35 }
  0xa0   : > { %v4375_v17 = vand.u32 4294901760, %v402_v61  ;;  %v1250_v20 = vsub.f32 %v4365_v59, %v6302_v16  ;;  %949 = vmatpush.msrb.mxu1 %v4178_v54  ;;  %v1256_v38 = vsub.f32 %v4413_v19, %v6301_v36 }
  0xa1   : > { %876 = vmatpush.msrb.mxu0 %v6355_v1  ;;  %619 = vmatmul.f32.vlgmr.msra.gmra.mxu1 %v4370_v14  ;;  %v458_v40 = vsub.f32 %v401_v50, %v4370_v14  ;;  %v3457_v50 = vld [vmem:[%s6287_s1 + $0xb8] sm:$0xff] }
  0xa2   : > { %1678 = vrot.lane.b32.xlu0 %v3860_v0, %s3754_s20  ;;  %v466_v60 = vsub.f32 %v402_v61, %v4375_v17  ;;  %v1245_v0 = vand.u32 4294901760, %v1244_v27  ;;  %1436 = vmatpush.msra.mxu1 %v4246_v21  ;;  %v1251_v48 = vand.u32 4294901760, %v1250_v20  ;;  %v4444_v27 = vand.u32 4294901760, %v3457_v50  ;;  %v3456_v20 = vld [vmem:[%s6287_s1 + $0xb0] sm:$0xff] }
  0xa3   : > { %880 = vmatpush.msrb.mxu0 %v608_v29  ;;  %701 = vmatmul.f32.vlgmr.msra.gmra.mxu2 %v458_v40  ;;  %v290_v23 = vpop.permute.xlu0 %289  ;;  %v322_v53 = vpop.permute.xlu1 %321  ;;  %v459_v34 = vand.u32 4294901760, %v458_v40  ;;  %v4406_v29 = vand.u32 4294901760, %v3458_v18 }
  0xa4   : > { %v376_v54 = vsel %vm373_vm0, %v3873_v4, %v290_v23  ;;  %1246 = vmatpush.msrb.mxu3 %v1245_v0  ;;  %v4417_v4 = vpop.permute.xlu2 %359  ;;  %1438 = vmatpush.msra.mxu1 %v4251_v13  ;;  %v467_v46 = vand.u32 4294901760, %v466_v60 }
  0xa5   : > { %884 = vmatpush.msrb.mxu0 %v614_v39  ;;  %v385_v12 = vsel %vm382_vm1, %v376_v54, %v322_v53  ;;  %775 = vmatmul.f32.vlgmr.msra.gmra.mxu3 %v459_v34  ;;  %v460_v41 = vsub.f32 %v458_v40, %v459_v34  ;;  %v4420_v31 = vsub.f32 %v3458_v18, %v4406_v29  ;;  %v1257_v40 = vand.u32 4294901760, %v1256_v38 }
  0xa6   : > { %v394_v22 = vsel %vm391_vm2, %v385_v12, %v4256_v24  ;;  %1135 = vmatpush.msrb.mxu2 %v4406_v29  ;;  %1252 = vmatpush.msrb.mxu3 %v1251_v48  ;;  %v468_v1 = vsub.f32 %v466_v60, %v467_v46  ;;  %v3455_v12 = vld [vmem:[%s6287_s1 + $0xa8] sm:$0xff] }
  0xa7   : > { %v403_v42 = vsel %vm400_vm3, %v394_v22, 0.0  ;;  %v461_v39 = vand.u32 4294901760, %v460_v41  ;;  %v6300_v24 = vand.u32 4294901760, %v4420_v31  ;;  %1440 = vmatpush.msra.mxu1 %v4292_v45 }
  0xa8   : > { %v4426_v37 = vand.u32 4294901760, %v403_v42  ;;  %1137 = vmatpush.msrb.mxu2 %v4444_v27  ;;  %1258 = vmatpush.msrb.mxu3 %v1257_v40  ;;  %v469_v18 = vand.u32 4294901760, %v468_v1 }
  0xa9   : > { %462 = vmatmul.f32.vlgmr.msra.gmra.mxu0 %v461_v39  ;;  %623 = vmatmul.f32.gmra.mxu1 %v4375_v17  ;;  %v1262_v44 = vsub.f32 %v4420_v31, %v6300_v24 }
  0xaa   : > { %1348 = vmatpush.msra.mxu0 %v4260_v25  ;;  %1680 = vrot.lane.b32.xlu0 %v3879_v5, %s3754_s20  ;;  %v474_v58 = vsub.f32 %v403_v42, %v4426_v37  ;;  %v4452_v5 = vand.u32 4294901760, %v3456_v20  ;;  %v4478_v42 = vand.u32 4294901760, %v3455_v12 }
  0xab   : > { %706 = vmatmul.f32.gmra.mxu2 %v466_v60  ;;  %v292_v43 = vpop.permute.xlu0 %291  ;;  %v324_v61 = vpop.permute.xlu1 %323  ;;  %1442 = vmatpush.msra.mxu1 %v4297_v51  ;;  %v1263_v23 = vand.u32 4294901760, %v1262_v44  ;;  %v4458_v60 = vsub.f32 %v3457_v50, %v4444_v27 }
  0xac   : > { %v377_v52 = vsel %vm373_vm0, %v3867_v2, %v292_v43  ;;  %1351 = vmatpush.msra.mxu0 %v4263_v26  ;;  %v4463_v0 = vsub.f32 %v3456_v20, %v4452_v5  ;;  %v475_v54 = vand.u32 4294901760, %v474_v58  ;;  %1139 = vmatpush.msrb.mxu2 %v4452_v5  ;;  %v4475_v41 = vpop.permute.xlu2 %361  ;;  %v4496_v50 = vsub.f32 %v3455_v12, %v4478_v42 }
  0xad   : > { %v386_v53 = vsel %vm382_vm1, %v377_v52, %v324_v61  ;;  %781 = vmatmul.f32.gmra.mxu3 %v467_v46  ;;  %v6299_v48 = vand.u32 4294901760, %v4458_v60  ;;  %1444 = vmatpush.msra.mxu1 %v4340_v3  ;;  %v3454_v46 = vld [vmem:[%s6287_s1 + $0xa0] sm:$0xff]  ;;  %v3453_v52 = vld [vmem:[%s6287_s1 + $0x98] sm:$0xff] }
  0xae   : > { %v395_v34 = vsel %vm391_vm2, %v386_v53, %v4302_v55  ;;  %1354 = vmatpush.msra.mxu0 %v4306_v56  ;;  %1264 = vmatpush.msrb.mxu3 %v1263_v23  ;;  %v6298_v22 = vand.u32 4294901760, %v4463_v0  ;;  %v4498_v43 = vand.u32 4294901760, %v3454_v46  ;;  %v476_v40 = vsub.f32 %v474_v58, %v475_v54 }
  0xaf   : > { %v404_v2 = vsel %vm400_vm3, %v395_v34, 0.0  ;;  %v1268_v39 = vsub.f32 %v4458_v60, %v6299_v48  ;;  %1141 = vmatpush.msrb.mxu2 %v4478_v42  ;;  %v6296_v34 = vand.u32 4294901760, %v4496_v50  ;;  %1446 = vmatpush.msra.mxu1 %v4347_v47 }
  0xb0   : > { %v4473_v55 = vand.u32 4294901760, %v404_v2  ;;  %1357 = vmatpush.msra.mxu0 %v4309_v57  ;;  %v1274_v44 = vsub.f32 %v4463_v0, %v6298_v22  ;;  %v6356_v57 = vand.u32 4294901760, %v4365_v59 }
  0xb1   : > { %470 = vmatmul.f32.gmra.mxu0 %v469_v18  ;;  %627 = vmatmul.f32.gmra.mxu1 %v4426_v37  ;;  %v1269_v20 = vand.u32 4294901760, %v1268_v39  ;;  %v3452_v18 = vld [vmem:[%s6287_s1 + $0x90] sm:$0xff] }
  0xb2   : > { %v4489_v38 = vsub.f32 %v404_v2, %v4473_v55  ;;  %1682 = vrot.lane.b32.xlu0 %v3891_v7, %s3754_s20  ;;  %1360 = vmatpush.msra.mxu0 %v4359_v49  ;;  %v1275_v53 = vand.u32 4294901760, %v1274_v44  ;;  %v4515_v2 = vand.u32 4294901760, %v3453_v52  ;;  %v4527_v39 = vand.u32 4294901760, %v3452_v18  ;;  %v3591_v49 = vld [vmem:[%s3857_s10 + $0x50] sm:$0xff] }
  0xb3   : > { %711 = vmatmul.f32.gmra.mxu2 %v474_v58  ;;  %v294_v61 = vpop.permute.xlu0 %293  ;;  %v326_v1 = vpop.permute.xlu1 %325  ;;  %v4513_v58 = vsub.f32 %v3454_v46, %v4498_v43  ;;  %1270 = vmatpush.msrb.mxu3 %v1269_v20  ;;  %v477_v44 = vand.u32 4294901760, %v476_v40 }
  0xb4   : > { %v378_v23 = vsel %vm373_vm0, %v3884_v6, %v294_v61  ;;  %1143 = vmatpush.msrb.mxu2 %v4498_v43  ;;  %1363 = vmatpush.msra.mxu0 %v4365_v59  ;;  %v483_v12 = vand.u32 4294901760, %v4489_v38  ;;  %v4644_v59 = vld [vmem:[%s3857_s10 + $0x51] sm:$0xff] }
  0xb5   : > { %v387_v7 = vsel %vm382_vm1, %v378_v23, %v326_v1  ;;  %787 = vmatmul.f32.gmra.mxu3 %v475_v54  ;;  %v1280_v54 = vsub.f32 %v4496_v50, %v6296_v34  ;;  %1448 = vmatpush.msra.mxu1 %v4398_v35  ;;  %v6297_v61 = vand.u32 4294901760, %v4513_v58  ;;  %v3451_v1 = vld [vmem:[%s6287_s1 + $0x88] sm:$0xff] }
  0xb6   : > { %v396_v6 = vsel %vm391_vm2, %v387_v7, %v4355_v15  ;;  %1145 = vmatpush.msrb.mxu2 %v4515_v2  ;;  %v4534_v15 = vsub.f32 %v3453_v52, %v4515_v2  ;;  %1366 = vmatpush.msra.mxu0 %v4413_v19  ;;  %v4543_v7 = vsub.f32 %v3452_v18, %v4527_v39 }
  0xb7   : > { %v405_v46 = vsel %vm400_vm3, %v396_v6, 0.0  ;;  %1276 = vmatpush.msrb.mxu3 %v1275_v53  ;;  %v1281_v23 = vand.u32 4294901760, %v1280_v54  ;;  %1450 = vmatpush.msra.mxu1 %v4406_v29  ;;  %v1286_v40 = vsub.f32 %v4513_v58, %v6297_v61  ;;  %v4551_v6 = vand.u32 4294901760, %v3451_v1  ;;  %v3450_v53 = vld [vmem:[%s6287_s1 + $0x80] sm:$0xff]  ;;  %v4557_v54 = vpop.permute.xlu2 %363 }
  0xb8   : > { %v4540_v20 = vand.u32 4294901760, %v405_v46  ;;  %v6304_v52 = vand.u32 4294901760, %v4534_v15  ;;  %v484_v18 = vsub.f32 %v4489_v38, %v483_v12  ;;  %1147 = vmatpush.msrb.mxu2 %v4527_v39  ;;  %v4561_v34 = vand.u32 4294901760, %v3450_v53  ;;  %1369 = vmatpush.msra.mxu0 %v4420_v31 }
  0xb9   : > { %478 = vmatmul.f32.gmra.mxu0 %v477_v44  ;;  %631 = vmatmul.f32.gmra.mxu1 %v4473_v55  ;;  %v6303_v44 = vand.u32 4294901760, %v4543_v7  ;;  %v1287_v24 = vand.u32 4294901760, %v1286_v40  ;;  %v4569_v16 = vsub.f32 %v3451_v1, %v4551_v6 }
  0xba   : > { %1282 = vmatpush.msrb.mxu3 %v1281_v23  ;;  %v490_v61 = vsub.f32 %v405_v46, %v4540_v20  ;;  %v1292_v36 = vsub.f32 %v4534_v15, %v6304_v52  ;;  %1684 = vrot.lane.b32.xlu0 %v3903_v9, %s3754_s20  ;;  %v4580_v46 = vsub.f32 %v3450_v53, %v4561_v34  ;;  %v485_v52 = vand.u32 4294901760, %v484_v18  ;;  %v3426_v18 = vld [vmem:[%s3857_s10 + $0x30] sm:$0xff] }
  0xbb   : > { %716 = vmatmul.f32.gmra.mxu2 %v4489_v38  ;;  %v296_v22 = vpop.permute.xlu0 %295  ;;  %v328_v48 = vpop.permute.xlu1 %327  ;;  %v1298_v38 = vsub.f32 %v4543_v7, %v6303_v44  ;;  %v1303_v9 = vand.u32 4294901760, %v4569_v16  ;;  %1452 = vmatpush.msra.mxu1 %v4444_v27 }
  0xbc   : > { %v379_v23 = vsel %vm373_vm0, %v3896_v8, %v296_v22  ;;  %1149 = vmatpush.msrb.mxu2 %v4551_v6  ;;  %v1293_v40 = vand.u32 4294901760, %v1292_v36  ;;  %1288 = vmatpush.msrb.mxu3 %v1287_v24  ;;  %v1309_v53 = vand.u32 4294901760, %v4580_v46 }
  0xbd   : > { %v388_v1 = vsel %vm382_vm1, %v379_v23, %v328_v48  ;;  %793 = vmatmul.f32.gmra.mxu3 %v483_v12  ;;  %v1299_v22 = vand.u32 4294901760, %v1298_v38  ;;  %v491_v48 = vand.u32 4294901760, %v490_v61  ;;  %v1304_v36 = vsub.f32 %v4569_v16, %v1303_v9  ;;  %1372 = vmatpush.msra.mxu0 %v4458_v60 }
  0xbe   : > { %v397_v8 = vsel %vm391_vm2, %v388_v1, %v4417_v4  ;;  %1151 = vmatpush.msrb.mxu2 %v4561_v34  ;;  %1294 = vmatpush.msrb.mxu3 %v1293_v40  ;;  %v1310_v24 = vsub.f32 %v4580_v46, %v1309_v53 }
  0xbf   : > { %v406_v44 = vsel %vm400_vm3, %v397_v8, 0.0  ;;  %1454 = vmatpush.msra.mxu1 %v4452_v5  ;;  %v1305_v12 = vand.u32 4294901760, %v1304_v36  ;;  %v492_v1 = vsub.f32 %v490_v61, %v491_v48  ;;  %1710 = vrot.lane.b32.xlu1 %v3426_v18, %s3755_s21  ;;  %v4611_v40 = vpop.permute.xlu2 %1047  ;;  %v6357_v8 = vand.u32 4294901760, %v4413_v19 }
  0xc0   : > { %1519 = vmatpush.msra.mxu2 %v1219_v30  ;;  %v4597_v4 = vand.u32 4294901760, %v406_v44  ;;  %1300 = vmatpush.msrb.mxu3 %v1299_v22  ;;  %v1311_v23 = vand.u32 4294901760, %v1310_v24 }
  0xc1   : > { %486 = vmatmul.f32.gmra.mxu0 %v485_v52  ;;  %635 = vmatmul.f32.gmra.mxu1 %v4540_v20 }
  0xc2   : > { %1523 = vmatpush.msra.mxu2 %v1225_v32  ;;  %v498_v25 = vsub.f32 %v406_v44, %v4597_v4  ;;  %1306 = vmatpush.msrb.mxu3 %v1305_v12 }
  0xc3   : > { %721 = vmatmul.f32.gmra.mxu2 %v490_v61  ;;  %v298_v30 = vpop.permute.xlu0 %297  ;;  %v330_v38 = vpop.permute.xlu1 %329  ;;  %1686 = vrot.lane.b32.xlu0 %v3915_v11, %s3754_s20  ;;  %v493_v61 = vand.u32 4294901760, %v492_v1  ;;  %v3427_v11 = vld [vmem:[%s3857_s10 + $0x38] sm:$0xff] }
  0xc4   : > { %v380_v52 = vsel %vm373_vm0, %v3908_v10, %v298_v30  ;;  %1527 = vmatpush.msra.mxu2 %v1231_v62  ;;  %1312 = vmatpush.msrb.mxu3 %v1311_v23  ;;  %v499_v44 = vand.u32 4294901760, %v498_v25 }
  0xc5   : > { %v389_v26 = vsel %vm382_vm1, %v380_v52, %v330_v38  ;;  %799 = vmatmul.f32.gmra.mxu3 %v491_v48  ;;  %1375 = vmatpush.msra.mxu0 %v4463_v0  ;;  %v6361_v38 = vand.u32 4294901760, %v4496_v50  ;;  %v6362_v52 = vand.u32 4294901760, %v4513_v58 }
  0xc6   : > { %v398_v32 = vsel %vm391_vm2, %v389_v26, %v4475_v41  ;;  %1531 = vmatpush.msra.mxu2 %v1237_v33  ;;  %1614 = vmatpush.msra.mxu3 %v4246_v21  ;;  %v500_v41 = vsub.f32 %v498_v25, %v499_v44 }
  0xc7   : > { %v407_v10 = vsel %vm400_vm3, %v398_v32, 0.0  ;;  %1456 = vmatpush.msra.mxu1 %v4478_v42  ;;  %1712 = vrot.lane.b32.xlu1 %v3427_v11, %s3755_s21  ;;  %v4650_v48 = vpop.permute.xlu2 %1049 }
  0xc8   : > { %v4625_v56 = vand.u32 4294901760, %v407_v10  ;;  %1535 = vmatpush.msra.mxu2 %v1243_v63  ;;  %1616 = vmatpush.msra.mxu3 %v4251_v13  ;;  %v501_v36 = vand.u32 4294901760, %v500_v41 }
  0xc9   : > { %494 = vmatmul.f32.gmra.mxu0 %v493_v61  ;;  %639 = vmatmul.f32.gmra.mxu1 %v4597_v4  ;;  %v3429_v61 = vld [vmem:[%s3857_s10 + $0x50] sm:$0xff] }
  0xca   : > { %1539 = vmatpush.msra.mxu2 %v6356_v57  ;;  %v506_v21 = vsub.f32 %v407_v10, %v4625_v56  ;;  %1618 = vmatpush.msra.mxu3 %v4292_v45  ;;  %v6358_v45 = vand.u32 4294901760, %v4420_v31  ;;  %v6360_v31 = vand.u32 4294901760, %v4463_v0  ;;  %v3594_v0 = vld [vmem:[%s3857_s10 + $0x61] sm:$0xff]  ;;  %v3595_v57 = vld [vmem:[%s3857_s10 + $0x9] sm:$0xff] }
  0xcb   : > { %726 = vmatmul.f32.gmra.mxu2 %v498_v25  ;;  %v300_v62 = vpop.permute.xlu0 %299  ;;  %v332_v33 = vpop.permute.xlu1 %331  ;;  %1688 = vrot.lane.b32.xlu0 %v4644_v59, %s3754_s20 }
  0xcc   : > { %v381_v63 = vsel %vm373_vm0, %v3591_v49, %v300_v62  ;;  %1543 = vmatpush.msra.mxu2 %v6357_v8  ;;  %1620 = vmatpush.msra.mxu3 %v4297_v51  ;;  %v507_v24 = vand.u32 4294901760, %v506_v21  ;;  %v3428_v51 = vld [vmem:[%s3857_s10 + $0x48] sm:$0xff]  ;;  %v6364_v49 = vand.u32 4294901760, %v4543_v7 }
  0xcd   : > { %v390_v13 = vsel %vm382_vm1, %v381_v63, %v332_v33  ;;  %805 = vmatmul.f32.gmra.mxu3 %v499_v44  ;;  %1378 = vmatpush.msra.mxu0 %v4496_v50 }
  0xce   : > { %v399_v22 = vsel %vm391_vm2, %v390_v13, %v4557_v54  ;;  %1547 = vmatpush.msra.mxu2 %v6358_v45  ;;  %1458 = vmatpush.msra.mxu1 %v4498_v43  ;;  %v6359_v54 = vand.u32 4294901760, %v4458_v60  ;;  %v508_v30 = vsub.f32 %v506_v21, %v507_v24 }
  0xcf   : > { %v408_v19 = vsel %vm400_vm3, %v399_v22, 0.0  ;;  %1622 = vmatpush.msra.mxu3 %v4340_v3  ;;  %1714 = vrot.lane.b32.xlu1 %v3428_v51, %s3755_s21  ;;  %v3593_v3 = vld [vmem:[%s3857_s10 + $0x1] sm:$0xff]  ;;  %v1052_v10 = vpop.permute.xlu2 %1051 }
  0xd0   : > { %v4658_v12 = vand.u32 4294901760, %v408_v19  ;;  %1551 = vmatpush.msra.mxu2 %v6359_v54  ;;  %v509_v26 = vand.u32 4294901760, %v508_v30  ;;  %1381 = vmatpush.msra.mxu0 %v4513_v58  ;;  %v3598_v51 = vld [vmem:[%s3857_s10 + $0x1a] sm:$0xff] }
  0xd1   : > { %502 = vmatmul.f32.gmra.mxu0 %v501_v36  ;;  %643 = vmatmul.f32.gmra.mxu1 %v4625_v56 }
  0xd2   : > { %1624 = vmatpush.msra.mxu3 %v4347_v47  ;;  %1555 = vmatpush.msra.mxu2 %v6360_v31  ;;  %v514_v18 = vsub.f32 %v408_v19, %v4658_v12 }
  0xd3   : > { %731 = vmatmul.f32.gmra.mxu2 %v506_v21  ;;  %v992_v23 = vpop.permute.xlu0 %991  ;;  %v1016_v25 = vpop.permute.xlu1 %1015  ;;  %1690 = vrot.lane.b32.xlu0 %v3594_v0, %s3754_s20  ;;  %v3600_v0 = vld [vmem:[%s3857_s10 + $0x22] sm:$0xff] }
  0xd4   : > { %v1071_v60 = vsel %vm373_vm0, %v3593_v3, %v992_v23  ;;  %1626 = vmatpush.msra.mxu3 %v4398_v35  ;;  %1559 = vmatpush.msra.mxu2 %v6361_v38  ;;  %v515_v50 = vand.u32 4294901760, %v514_v18  ;;  %v3431_v23 = vld [vmem:[%s3857_s10 + $0x68] sm:$0xff] }
  0xd5   : > { %v1079_v47 = vsel %vm382_vm1, %v1071_v60, %v1016_v25  ;;  %811 = vmatmul.f32.gmra.mxu3 %v507_v24  ;;  %1460 = vmatpush.msra.mxu1 %v4515_v2 }
  0xd6   : > { %v1087_v1 = vsel %vm391_vm2, %v1079_v47, %v4611_v40  ;;  %1628 = vmatpush.msra.mxu3 %v4406_v29  ;;  %1563 = vmatpush.msra.mxu2 %v6362_v52  ;;  %v6363_v29 = vand.u32 4294901760, %v4534_v15  ;;  %v516_v11 = vsub.f32 %v514_v18, %v515_v50 }
  0xd7   : > { %v1095_v35 = vsel %vm400_vm3, %v1087_v1, 0.0  ;;  %1384 = vmatpush.msra.mxu0 %v4534_v15  ;;  %1716 = vrot.lane.b32.xlu1 %v3429_v61, %s3755_s21  ;;  %v3596_v15 = vld [vmem:[%s3857_s10 + $0x69] sm:$0xff]  ;;  %v1054_v22 = vpop.permute.xlu2 %1053  ;;  %v4795_v61 = vld [vmem:[%s3857_s10 + $0x51] sm:$0xff] }
  0xd8   : > { %v4686_v32 = vand.u32 4294901760, %v1095_v35  ;;  %1630 = vmatpush.msra.mxu3 %v4444_v27  ;;  %1567 = vmatpush.msra.mxu2 %v6363_v29  ;;  %v4700_v27 = vld [vmem:[%s3857_s10 + $0x31] sm:$0xff]  ;;  %v517_v63 = vand.u32 4294901760, %v516_v11 }
  0xd9   : > { %510 = vmatmul.f32.gmra.mxu0 %v509_v26  ;;  %647 = vmatmul.f32.gmra.mxu1 %v4658_v12 }
  0xda   : > { %v4693_v40 = vsub.f32 %v1095_v35, %v4686_v32  ;;  %1632 = vmatpush.msra.mxu3 %v4452_v5  ;;  %1742 = vrot.lane.b32.xlu2 %v4700_v27, %s3753_s11 }
  0xdb   : > { %736 = vmatmul.f32.gmra.mxu2 %v514_v18  ;;  %v994_v58 = vpop.permute.xlu0 %993  ;;  %v1018_v44 = vpop.permute.xlu1 %1017  ;;  %1692 = vrot.lane.b32.xlu0 %v3596_v15, %s3754_s20  ;;  %v3602_v15 = vld [vmem:[%s3857_s10 + $0x32] sm:$0xff] }
  0xdc   : > { %v1072_v21 = vsel %vm373_vm0, %v3595_v57, %v994_v58  ;;  %v1154_v62 = vand.u32 4294901760, %v4693_v40  ;;  %1634 = vmatpush.msra.mxu3 %v4478_v42  ;;  %1571 = vmatpush.msra.mxu2 %v6364_v49  ;;  %v3601_v58 = vld [vmem:[%s3857_s10 + $0x31] sm:$0xff] }
  0xdd   : > { %v1080_v5 = vsel %vm382_vm1, %v1072_v21, %v1018_v44  ;;  %817 = vmatmul.f32.gmra.mxu3 %v515_v50  ;;  %1462 = vmatpush.msra.mxu1 %v4527_v39  ;;  %v3432_v50 = vld [vmem:[%s3857_s10 + $0x78] sm:$0xff] }
  0xde   : > { %v1088_v33 = vsel %vm391_vm2, %v1080_v5, %v4650_v48  ;;  %v1155_v41 = vsub.f32 %v4693_v40, %v1154_v62  ;;  %1636 = vmatpush.msra.mxu3 %v4498_v43  ;;  %1387 = vmatpush.msra.mxu0 %v4543_v7  ;;  %v3430_v48 = vld [vmem:[%s3857_s10 + $0x60] sm:$0xff] }
  0xdf   : > { %v1096_v42 = vsel %vm400_vm3, %v1088_v33, 0.0  ;;  %1575 = vmatpush.msra.mxu2 %v1303_v9  ;;  %1464 = vmatpush.msra.mxu1 %v4551_v6  ;;  %v3597_v9 = vld [vmem:[%s3857_s10 + $0x19] sm:$0xff] }
  0xe0   : > { %v4722_v8 = vand.u32 4294901760, %v1096_v42  ;;  %v1156_v13 = vand.u32 4294901760, %v1155_v41  ;;  %1638 = vmatpush.msra.mxu3 %v4515_v2  ;;  %1718 = vrot.lane.b32.xlu1 %v3430_v48, %s3755_s21  ;;  %v4736_v2 = vld [vmem:[%s3857_s10 + $0x39] sm:$0xff]  ;;  %v4821_v48 = vld [vmem:[%s3857_s10 + $0x61] sm:$0xff] }
  0xe1   : > { %518 = vmatmul.f32.gmra.mxu0 %v517_v63  ;;  %951 = vmatmul.f32.vlgmr.msrb.gmra.mxu1 %v4370_v14 }
  0xe2   : > { %v4729_v43 = vsub.f32 %v1096_v42, %v4722_v8  ;;  %1640 = vmatpush.msra.mxu3 %v4527_v39  ;;  %1744 = vrot.lane.b32.xlu2 %v4736_v2, %s3753_s11  ;;  %v3433_v42 = vld [vmem:[%s3857_s10 + $0x80] sm:$0xff] }
  0xe3   : > { %1157 = vmatmul.f32.vlgmr.msrb.gmra.mxu2 %v1156_v13  ;;  %v996_v7 = vpop.permute.xlu0 %995  ;;  %v1020_v45 = vpop.permute.xlu1 %1019  ;;  %1466 = vmatpush.msra.mxu1 %v4561_v34 }
  0xe4   : > { %v1073_v19 = vsel %vm373_vm0, %v3597_v9, %v996_v7  ;;  %v1162_v36 = vand.u32 4294901760, %v4729_v43  ;;  %1390 = vmatpush.msra.mxu0 %v4569_v16  ;;  %1642 = vmatpush.msra.mxu3 %v4551_v6  ;;  %v3603_v7 = vld [vmem:[%s3857_s10 + $0x39] sm:$0xff] }
  0xe5   : > { %v1081_v39 = vsel %vm382_vm1, %v1073_v19, %v1020_v45  ;;  %1314 = vmatmul.f32.vlgmr.msrb.gmra.mxu3 %v4686_v32  ;;  %2373 = vrot.lane.b32.xlu0 %v3598_v51, %s3754_s20 }
  0xe6   : > { %v1089_v24 = vsel %vm391_vm2, %v1081_v39, %v1052_v10  ;;  %v1163_v54 = vsub.f32 %v4729_v43, %v1162_v36  ;;  %1579 = vmatpush.msra.mxu2 %v1309_v53  ;;  %1393 = vmatpush.msra.mxu0 %v4580_v46  ;;  %v4769_v46 = vld [vmem:[%s3857_s10 + $0x49] sm:$0xff]  ;;  %v3599_v53 = vld [vmem:[%s3857_s10 + $0x21] sm:$0xff] }
  0xe7   : > { %v1097_v31 = vsel %vm400_vm3, %v1089_v24, 0.0  ;;  %1644 = vmatpush.msra.mxu3 %v4561_v34  ;;  %v1056_v34 = vpop.permute.xlu2 %1055  ;;  %v3604_v24 = vld [vmem:[%s3857_s10 + $0x3a] sm:$0xff] }
  0xe8   : > { %v4758_v16 = vand.u32 4294901760, %v1097_v31  ;;  %v1164_v18 = vand.u32 4294901760, %v1163_v54  ;;  %1720 = vrot.lane.b32.xlu1 %v3431_v23, %s3755_s21 }
  0xe9   : > { %886 = vmatmul.f32.vlgmr.msrb.gmra.mxu0 %v4370_v14  ;;  %955 = vmatmul.f32.gmra.mxu1 %v4375_v17 }
  0xea   : > { %v4764_v6 = vsub.f32 %v1097_v31, %v4758_v16  ;;  %1746 = vrot.lane.b32.xlu2 %v4769_v46, %s3753_s11 }
  0xeb   : > { %1165 = vmatmul.f32.gmra.mxu2 %v1164_v18  ;;  %v998_v25 = vpop.permute.xlu0 %997  ;;  %v1022_v30 = vpop.permute.xlu1 %1021 }
  0xec   : > { %v1074_v3 = vsel %vm373_vm0, %v3599_v53, %v998_v25  ;;  %v1170_v14 = vand.u32 4294901760, %v4764_v6  ;;  %v4847_v53 = vld [vmem:[%s3857_s10 + $0x69] sm:$0xff] }
  0xed   : > { %v1082_v60 = vsel %vm382_vm1, %v1074_v3, %v1022_v30  ;;  %1318 = vmatmul.f32.gmra.mxu3 %v4722_v8  ;;  %2375 = vrot.lane.b32.xlu0 %v3600_v0, %s3754_s20  ;;  %v3605_v3 = vld [vmem:[%s3857_s10 + $0x49] sm:$0xff] }
  0xee   : > { %v1090_v38 = vsel %vm391_vm2, %v1082_v60, %v1054_v22  ;;  %v1171_v47 = vsub.f32 %v4764_v6, %v1170_v14 }
  0xef   : > { %v1098_v1 = vsel %vm400_vm3, %v1090_v38, 0.0  ;;  %v1058_v5 = vpop.permute.xlu2 %1057 }
  0xf0   : > { %v4785_v52 = vand.u32 4294901760, %v1098_v1  ;;  %v1172_v35 = vand.u32 4294901760, %v1171_v47  ;;  %1722 = vrot.lane.b32.xlu1 %v3432_v50, %s3755_s21 }
  0xf1   : > { %890 = vmatmul.f32.gmra.mxu0 %v4375_v17  ;;  %959 = vmatmul.f32.gmra.mxu1 %v4426_v37 }
  0xf2   : > { %v4790_v26 = vsub.f32 %v1098_v1, %v4785_v52  ;;  %1748 = vrot.lane.b32.xlu2 %v4795_v61, %s3753_s11 }
  0xf3   : > { %1173 = vmatmul.f32.gmra.mxu2 %v1172_v35  ;;  %v1000_v10 = vpop.permute.xlu0 %999  ;;  %v1024_v29 = vpop.permute.xlu1 %1023  ;;  %v3481_v35 = vld [vmem:[%s6287_s1 + $0x178] sm:$0xff] }
  0xf4   : > { %v1075_v44 = vsel %vm373_vm0, %v3601_v58, %v1000_v10  ;;  %v1178_v17 = vand.u32 4294901760, %v4790_v26 }
  0xf5   : > { %v1083_v11 = vsel %vm382_vm1, %v1075_v44, %v1024_v29  ;;  %1322 = vmatmul.f32.gmra.mxu3 %v4758_v16  ;;  %2377 = vrot.lane.b32.xlu0 %v3602_v15, %s3754_s20  ;;  %v4873_v29 = vand.u32 4294901760, %v3481_v35  ;;  %v4881_v44 = vld [vmem:[%s3857_s10 + $0x79] sm:$0xff] }
  0xf6   : > { %v1091_v57 = vsel %vm391_vm2, %v1083_v11, %v1056_v34  ;;  %v1179_v21 = vsub.f32 %v4790_v26, %v1178_v17 }
  0xf7   : > { %v1099_v33 = vsel %vm400_vm3, %v1091_v57, 0.0  ;;  %v1060_v18 = vpop.permute.xlu2 %1059  ;;  %1816 = vmatpush.msrb.mxu0 %v4873_v29  ;;  %2131 = vmatpush.msrb.mxu3 %v4873_v29 }
  0xf8   : > { %v4811_v41 = vand.u32 4294901760, %v1099_v33  ;;  %v1180_v49 = vand.u32 4294901760, %v1179_v21  ;;  %1724 = vrot.lane.b32.xlu1 %v3433_v42, %s3755_s21  ;;  %v4887_v21 = vsub.f32 %v3481_v35, %v4873_v29  ;;  %v3477_v35 = vld [vmem:[%s6287_s1 + $0x158] sm:$0xff] }
  0xf9   : > { %894 = vmatmul.f32.gmra.mxu0 %v4426_v37  ;;  %963 = vmatmul.f32.gmra.mxu1 %v4473_v55 }
  0xfa   : > { %v4817_v63 = vsub.f32 %v1099_v33, %v4811_v41  ;;  %1750 = vrot.lane.b32.xlu2 %v4821_v48, %s3753_s11  ;;  %2043 = vmatpush.msrb.mxu2 %v4887_v21  ;;  %v6319_v33 = vand.u32 4294901760, %v4887_v21 }
  0xfb   : > { %1181 = vmatmul.f32.gmra.mxu2 %v1180_v49  ;;  %v1002_v13 = vpop.permute.xlu0 %1001  ;;  %v1026_v22 = vpop.permute.xlu1 %1025 }
  0xfc   : > { %v1076_v45 = vsel %vm373_vm0, %v3603_v7, %v1002_v13  ;;  %v6323_v9 = vand.u32 4294901760, %v4817_v63  ;;  %v3606_v13 = vld [vmem:[%s3857_s10 + $0x52] sm:$0xff] }
  0xfd   : > { %v1084_v37 = vsel %vm382_vm1, %v1076_v45, %v1026_v22  ;;  %1326 = vmatmul.f32.gmra.mxu3 %v4785_v52  ;;  %2379 = vrot.lane.b32.xlu0 %v3604_v24, %s3754_s20  ;;  %v1915_v45 = vsub.f32 %v4887_v21, %v6319_v33 }
  0xfe   : > { %v1092_v19 = vsel %vm391_vm2, %v1084_v37, %v1058_v5  ;;  %v1187_v39 = vsub.f32 %v4817_v63, %v6323_v9 }
  0xff   : > { %v1100_v54 = vsel %vm400_vm3, %v1092_v19, 0.0  ;;  %v1062_v10 = vpop.permute.xlu2 %1061  ;;  %v3479_v19 = vld [vmem:[%s6287_s1 + $0x168] sm:$0xff]  ;;  %v1916_v24 = vand.u32 4294901760, %v1915_v45 }
 0x100   : > { %v4837_v51 = vand.u32 4294901760, %v1100_v54  ;;  %v1188_v31 = vand.u32 4294901760, %v1187_v39  ;;  %2397 = vrot.lane.b32.xlu1 %v4700_v27, %s3755_s21 }
 0x101   : > { %898 = vmatmul.f32.gmra.mxu0 %v4473_v55  ;;  %967 = vmatmul.f32.gmra.mxu1 %v4540_v20 }
 0x102   : > { %v4842_v23 = vsub.f32 %v1100_v54, %v4837_v51  ;;  %1752 = vrot.lane.b32.xlu2 %v4847_v53, %s3753_s11  ;;  %v4926_v54 = vand.u32 4294901760, %v3479_v19  ;;  %1917 = vmatpush.msrb.mxu1 %v1916_v24 }
 0x103   : > { %1189 = vmatmul.f32.gmra.mxu2 %v1188_v31  ;;  %v1004_v25 = vpop.permute.xlu0 %1003  ;;  %v1028_v30 = vpop.permute.xlu1 %1027 }
 0x104   : > { %v1077_v34 = vsel %vm373_vm0, %v3605_v3, %v1004_v25  ;;  %v6316_v60 = vand.u32 4294901760, %v4842_v23 }
 0x105   : > { %v1085_v55 = vsel %vm382_vm1, %v1077_v34, %v1028_v30  ;;  %1330 = vmatmul.f32.gmra.mxu3 %v4811_v41  ;;  %2381 = vrot.lane.b32.xlu0 %v4220_v28, %s3754_s20  ;;  %v4941_v30 = vsub.f32 %v3479_v19, %v4926_v54  ;;  %v3475_v19 = vld [vmem:[%s6287_s1 + $0x148] sm:$0xff] }
 0x106   : > { %v1093_v38 = vsel %vm391_vm2, %v1085_v55, %v1060_v18  ;;  %v1195_v27 = vsub.f32 %v4842_v23, %v6316_v60  ;;  %v4937_v18 = vld [vmem:[%s3857_s10 + $0x81] sm:$0xff] }
 0x107   : > { %v1101_v47 = vsel %vm400_vm3, %v1093_v38, 0.0  ;;  %v6315_v55 = vand.u32 4294901760, %v4941_v30 }
 0x108   : > { %v4863_v0 = vand.u32 4294901760, %v1101_v47  ;;  %v1196_v1 = vand.u32 4294901760, %v1195_v27  ;;  %2399 = vrot.lane.b32.xlu1 %v4736_v2, %s3755_s21 }
 0x109   : > { %902 = vmatmul.f32.gmra.mxu0 %v4540_v20  ;;  %971 = vmatmul.f32.gmra.mxu1 %v4597_v4  ;;  %v3480_v20 = vld [vmem:[%s6287_s1 + $0x170] sm:$0xff] }
 0x10a   : > { %v4871_v50 = vsub.f32 %v1101_v47, %v4863_v0  ;;  %v4891_v2 = vand.u32 4294901760, %v3480_v20  ;;  %1754 = vrot.lane.b32.xlu2 %v4881_v44, %s3753_s11  ;;  %v1927_v47 = vsub.f32 %v4941_v30, %v6315_v55 }
 0x10b   : > { %1197 = vmatmul.f32.gmra.mxu2 %v1196_v1  ;;  %v1006_v28 = vpop.permute.xlu0 %1005  ;;  %v1030_v58 = vpop.permute.xlu1 %1029 }
 0x10c   : > { %v1078_v11 = vsel %vm373_vm0, %v4644_v59, %v1006_v28  ;;  %v6312_v57 = vand.u32 4294901760, %v4871_v50  ;;  %v4904_v49 = vsub.f32 %v3480_v20, %v4891_v2  ;;  %1818 = vmatpush.msrb.mxu0 %v4891_v2  ;;  %2133 = vmatpush.msrb.mxu3 %v4891_v2  ;;  %v4970_v28 = vand.u32 4294901760, %v3477_v35 }
 0x10d   : > { %v1086_v5 = vsel %vm382_vm1, %v1078_v11, %v1030_v58  ;;  %1334 = vmatmul.f32.gmra.mxu3 %v4837_v51  ;;  %2383 = vrot.lane.b32.xlu0 %v3606_v13, %s3754_s20  ;;  %v3607_v58 = vld [vmem:[%s3857_s10 + $0x62] sm:$0xff]  ;;  %v3442_v11 = vld [vmem:[%s3857_s10 + $0x32] sm:$0xff] }
 0x10e   : > { %v1094_v59 = vsel %vm391_vm2, %v1086_v5, %v1062_v10  ;;  %v1203_v15 = vsub.f32 %v4871_v50, %v6312_v57  ;;  %2046 = vmatpush.msrb.mxu2 %v4904_v49  ;;  %v6318_v37 = vand.u32 4294901760, %v4904_v49  ;;  %1820 = vmatpush.msrb.mxu0 %v4926_v54  ;;  %v1928_v10 = vand.u32 4294901760, %v1927_v47 }
 0x10f   : > { %v1102_v42 = vsel %vm400_vm3, %v1094_v59, 0.0  ;;  %2135 = vmatpush.msrb.mxu3 %v4926_v54  ;;  %v4984_v5 = vsub.f32 %v3477_v35, %v4970_v28 }
 0x110   : > { %v4911_v22 = vand.u32 4294901760, %v1102_v42  ;;  %v1204_v7 = vand.u32 4294901760, %v1203_v15  ;;  %v1921_v31 = vsub.f32 %v4904_v49, %v6318_v37  ;;  %2401 = vrot.lane.b32.xlu1 %v4769_v46, %s3755_s21  ;;  %2049 = vmatpush.msrb.mxu2 %v4941_v30 }
 0x111   : > { %906 = vmatmul.f32.gmra.mxu0 %v4597_v4  ;;  %975 = vmatmul.f32.gmra.mxu1 %v4625_v56  ;;  %v3478_v4 = vld [vmem:[%s6287_s1 + $0x160] sm:$0xff] }
 0x112   : > { %v4924_v39 = vsub.f32 %v1102_v42, %v4911_v22  ;;  %v4944_v3 = vand.u32 4294901760, %v3478_v4  ;;  %v1922_v34 = vand.u32 4294901760, %v1921_v31  ;;  %1756 = vrot.lane.b32.xlu2 %v4937_v18, %s3753_s11  ;;  %v5010_v31 = vand.u32 4294901760, %v3475_v19 }
 0x113   : > { %1205 = vmatmul.f32.gmra.mxu2 %v1204_v7 }
 0x114   : > { %v6307_v25 = vand.u32 4294901760, %v4924_v39  ;;  %v4956_v38 = vsub.f32 %v3478_v4, %v4944_v3  ;;  %1923 = vmatpush.msrb.mxu1 %v1922_v34  ;;  %1822 = vmatpush.msrb.mxu0 %v4944_v3  ;;  %v3608_v4 = vld [vmem:[%s3857_s10 + $0x6a] sm:$0xff]  ;;  %v3443_v34 = vld [vmem:[%s3857_s10 + $0x3a] sm:$0xff] }
 0x115   : > { %1338 = vmatmul.f32.gmra.mxu3 %v4863_v0  ;;  %2385 = vrot.lane.b32.xlu0 %v3607_v58, %s3754_s20 }
 0x116   : > { %v1211_v46 = vsub.f32 %v4924_v39, %v6307_v25  ;;  %2052 = vmatpush.msrb.mxu2 %v4956_v38  ;;  %2137 = vmatpush.msrb.mxu3 %v4944_v3  ;;  %v6314_v1 = vand.u32 4294901760, %v4956_v38 }
 0x117   : > { %1929 = vmatpush.msrb.mxu1 %v1928_v10  ;;  %1824 = vmatpush.msrb.mxu0 %v4970_v28 }
 0x118   : > { %v1212_v27 = vand.u32 4294901760, %v1211_v46  ;;  %v1933_v20 = vsub.f32 %v4956_v38, %v6314_v1  ;;  %2403 = vrot.lane.b32.xlu1 %v4795_v61, %s3755_s21  ;;  %2055 = vmatpush.msrb.mxu2 %v4984_v5  ;;  %v6313_v61 = vand.u32 4294901760, %v4984_v5  ;;  %v5025_v46 = vsub.f32 %v3475_v19, %v5010_v31 }
 0x119   : > { %910 = vmatmul.f32.gmra.mxu0 %v4625_v56  ;;  %979 = vmatmul.f32.gmra.mxu1 %v4658_v12  ;;  %v3476_v56 = vld [vmem:[%s6287_s1 + $0x150] sm:$0xff] }
 0x11a   : > { %v4987_v59 = vand.u32 4294901760, %v3476_v56  ;;  %v1934_v15 = vand.u32 4294901760, %v1933_v20  ;;  %2429 = vrot.lane.b32.xlu2 %v3442_v11, %s3753_s11  ;;  %2139 = vmatpush.msrb.mxu3 %v4970_v28  ;;  %v1939_v7 = vsub.f32 %v4984_v5, %v6313_v61  ;;  %v6309_v10 = vand.u32 4294901760, %v5025_v46 }
 0x11b   : > { %1213 = vmatmul.f32.gmra.mxu2 %v1212_v27 }
 0x11c   : > { %v4995_v13 = vsub.f32 %v3476_v56, %v4987_v59  ;;  %1935 = vmatpush.msrb.mxu1 %v1934_v15  ;;  %1826 = vmatpush.msrb.mxu0 %v4987_v59  ;;  %v1940_v24 = vand.u32 4294901760, %v1939_v7  ;;  %v1951_v11 = vsub.f32 %v5025_v46, %v6309_v10  ;;  %v3473_v15 = vld [vmem:[%s6287_s1 + $0x138] sm:$0xff]  ;;  %v5126_v10 = vpop.permute.xlu0 %1678 }
 0x11d   : > { %1342 = vmatmul.f32.gmra.mxu3 %v4911_v22  ;;  %2387 = vrot.lane.b32.xlu0 %v3608_v4, %s3754_s20  ;;  %v5051_v19 = vand.u32 4294901760, %v3473_v15  ;;  %v3472_v4 = vld [vmem:[%s6287_s1 + $0x130] sm:$0xff] }
 0x11e   : > { %v620_v42 = vpop.f32.mrf.mxu1  ;;  %2058 = vmatpush.msrb.mxu2 %v4995_v13  ;;  %2141 = vmatpush.msrb.mxu3 %v4987_v59  ;;  %v6311_v45 = vand.u32 4294901760, %v4995_v13 }
 0x11f   : > { %1941 = vmatpush.msrb.mxu1 %v1940_v24  ;;  %1828 = vmatpush.msrb.mxu0 %v5010_v31  ;;  %v1952_v24 = vand.u32 4294901760, %v1951_v11 }
 0x120   : > { %2405 = vrot.lane.b32.xlu1 %v4821_v48, %s3755_s21  ;;  %2061 = vmatpush.msrb.mxu2 %v5025_v46 }
 0x121   : > { %914 = vmatmul.f32.gmra.mxu0 %v4658_v12  ;;  %1470 = vmatmul.f32.vlgmr.msra.gmra.mxu1 %v1154_v62  ;;  %v1945_v12 = vsub.f32 %v4995_v13, %v6311_v45  ;;  %v3474_v62 = vld [vmem:[%s6287_s1 + $0x140] sm:$0xff] }
 0x122   : > { %v5028_v27 = vand.u32 4294901760, %v3474_v62  ;;  %2431 = vrot.lane.b32.xlu2 %v3443_v34, %s3753_s11  ;;  %2143 = vmatpush.msrb.mxu3 %v5010_v31  ;;  %v3444_v34 = vld [vmem:[%s3857_s10 + $0x4a] sm:$0xff] }
 0x123   : > { %1581 = vmatmul.f32.vlgmr.msra.gmra.mxu2 %v4686_v32  ;;  %v1946_v47 = vand.u32 4294901760, %v1945_v12 }
 0x124   : > { %v5036_v58 = vsub.f32 %v3474_v62, %v5028_v27  ;;  %1830 = vmatpush.msrb.mxu0 %v5028_v27  ;;  %2145 = vmatpush.msrb.mxu3 %v5028_v27  ;;  %v5063_v62 = vsub.f32 %v3473_v15, %v5051_v19 }
 0x125   : > { %1646 = vmatmul.f32.vlgmr.msra.gmra.mxu3 %v4686_v32  ;;  %1947 = vmatpush.msrb.mxu1 %v1946_v47  ;;  %v3471_v47 = vld [vmem:[%s6287_s1 + $0x128] sm:$0xff] }
 0x126   : > { %v463_v35 = vpop.f32.mrf.mxu0  ;;  %v624_v48 = vpop.f32.mrf.mxu1  ;;  %2064 = vmatpush.msrb.mxu2 %v5036_v58  ;;  %1832 = vmatpush.msrb.mxu0 %v5051_v19 }
 0x127   : > { %v621_v20 = vadd.f32 %v620_v42, %v463_v35  ;;  %v702_v56 = vpop.f32.mrf.mxu2  ;;  %v6305_v42 = vand.u32 4294901760, %v5036_v58  ;;  %1953 = vmatpush.msrb.mxu1 %v1952_v24  ;;  %2147 = vmatpush.msrb.mxu3 %v5051_v19 }
 0x128   : > { %v776_v32 = vpop.f32.mrf.mxu3  ;;  %2067 = vmatpush.msrb.mxu2 %v5063_v62  ;;  %2407 = vrot.lane.b32.xlu1 %v4847_v53, %s3755_s21 }
 0x129   : > { %v703_v7 = vadd.f32 %v702_v56, %v621_v20  ;;  %1396 = vmatmul.f32.vlgmr.msra.gmra.mxu0 %v4693_v40  ;;  %1476 = vmatmul.f32.gmra.mxu1 %v1162_v36  ;;  %v1957_v40 = vsub.f32 %v5036_v58, %v6305_v42  ;;  %v5066_v36 = vand.u32 4294901760, %v3472_v4  ;;  %v6306_v20 = vand.u32 4294901760, %v5063_v62 }
 0x12a   : > { %2433 = vrot.lane.b32.xlu2 %v3444_v34, %s3753_s11 }
 0x12b   : > { %v5056_v12 = vadd.f32 %v776_v32, %v703_v7  ;;  %1585 = vmatmul.f32.gmra.mxu2 %v4722_v8  ;;  %v1958_v35 = vand.u32 4294901760, %v1957_v40  ;;  %v5077_v56 = vsub.f32 %v3472_v4, %v5066_v36  ;;  %v5079_v32 = vand.u32 4294901760, %v3471_v47  ;;  %1834 = vmatpush.msrb.mxu0 %v5066_v36 }
 0x12c   : > { %v1963_v4 = vsub.f32 %v5063_v62, %v6306_v20  ;;  %2149 = vmatpush.msrb.mxu3 %v5066_v36 }
 0x12d   : > { %1650 = vmatmul.f32.gmra.mxu3 %v4722_v8  ;;  %v3470_v8 = vld [vmem:[%s6287_s1 + $0x120] sm:$0xff]  ;;  %1959 = vmatpush.msrb.mxu1 %v1958_v35  ;;  %v6308_v40 = vand.u32 4294901760, %v5077_v56  ;;  %v5093_v42 = vsub.f32 %v3471_v47, %v5079_v32 }
 0x12e   : > { %v471_v11 = vpop.f32.mrf.mxu0  ;;  %v628_v15 = vpop.f32.mrf.mxu1  ;;  %2070 = vmatpush.msrb.mxu2 %v5077_v56  ;;  %v5097_v34 = vand.u32 4294901760, %v3470_v8  ;;  %v1964_v47 = vand.u32 4294901760, %v1963_v4  ;;  %1836 = vmatpush.msrb.mxu0 %v5079_v32 }
 0x12f   : > { %v625_v7 = vadd.f32 %v624_v48, %v471_v11  ;;  %v707_v24 = vpop.f32.mrf.mxu2  ;;  %v3469_v48 = vld [vmem:[%s6287_s1 + $0x118] sm:$0xff]  ;;  %v1969_v11 = vsub.f32 %v5077_v56, %v6308_v40  ;;  %v6310_v20 = vand.u32 4294901760, %v5093_v42  ;;  %2151 = vmatpush.msrb.mxu3 %v5079_v32 }
 0x130   : > { %v782_v53 = vpop.f32.mrf.mxu3  ;;  %2073 = vmatpush.msrb.mxu2 %v5093_v42  ;;  %v5112_v25 = vsub.f32 %v3470_v8, %v5097_v34  ;;  %1965 = vmatpush.msrb.mxu1 %v1964_v47  ;;  %v3445_v40 = vld [vmem:[%s3857_s10 + $0x52] sm:$0xff]  ;;  %v3467_v47 = vld [vmem:[%s6287_s1 + $0x108] sm:$0xff] }
 0x131   : > { %v708_v35 = vadd.f32 %v707_v24, %v625_v7  ;;  %1401 = vmatmul.f32.gmra.mxu0 %v4729_v43  ;;  %1482 = vmatmul.f32.gmra.mxu1 %v1170_v14  ;;  %v5114_v7 = vand.u32 4294901760, %v3469_v48  ;;  %v3468_v43 = vld [vmem:[%s6287_s1 + $0x110] sm:$0xff]  ;;  %v1970_v24 = vand.u32 4294901760, %v1969_v11  ;;  %v1975_v4 = vsub.f32 %v5093_v42, %v6310_v20  ;;  %v5140_v20 = vpop.permute.xlu1 %1710 }
 0x132   : > { %v5128_v8 = vand.u32 4294901760, %v3468_v43  ;;  %2076 = vmatpush.msrb.mxu2 %v5112_v25  ;;  %v5145_v57 = vand.u32 4294901760, %v3467_v47  ;;  %2409 = vrot.lane.b32.xlu1 %v4881_v44, %s3755_s21 }
 0x133   : > { %v5119_v14 = vadd.f32 %v782_v53, %v708_v35  ;;  %1589 = vmatmul.f32.gmra.mxu2 %v4758_v16  ;;  %v6317_v53 = vand.u32 4294901760, %v5112_v25  ;;  %v5134_v35 = vsub.f32 %v3469_v48, %v5114_v7  ;;  %1971 = vmatpush.msrb.mxu1 %v1970_v24  ;;  %v1976_v11 = vand.u32 4294901760, %v1975_v4 }
 0x134   : > { %v5143_v45 = vsub.f32 %v3468_v43, %v5128_v8  ;;  %2435 = vrot.lane.b32.xlu2 %v3445_v40, %s3753_s11  ;;  %v3466_v43 = vld [vmem:[%s6287_s1 + $0x100] sm:$0xff]  ;;  %1838 = vmatpush.msrb.mxu0 %v5097_v34  ;;  %v5158_v55 = vpop.permute.xlu2 %1742  ;;  %v5162_v40 = vsub.f32 %v3467_v47, %v5145_v57 }
 0x135   : > { %1654 = vmatmul.f32.gmra.mxu3 %v4758_v16  ;;  %v1981_v16 = vsub.f32 %v5112_v25, %v6317_v53  ;;  %v6320_v48 = vand.u32 4294901760, %v5134_v35  ;;  %1977 = vmatpush.msrb.mxu1 %v1976_v11  ;;  %v5164_v60 = vand.u32 4294901760, %v3466_v43 }
 0x136   : > { %v479_v61 = vpop.f32.mrf.mxu0  ;;  %v632_v1 = vpop.f32.mrf.mxu1  ;;  %v6322_v44 = vand.u32 4294901760, %v5143_v45  ;;  %2153 = vmatpush.msrb.mxu3 %v5097_v34  ;;  %2079 = vmatpush.msrb.mxu2 %v5134_v35  ;;  %v6321_v11 = vand.u32 4294901760, %v5162_v40 }
 0x137   : > { %v629_v24 = vadd.f32 %v628_v15, %v479_v61  ;;  %v712_v4 = vpop.f32.mrf.mxu2  ;;  %v1982_v37 = vand.u32 4294901760, %v1981_v16  ;;  %v1987_v61 = vsub.f32 %v5134_v35, %v6320_v48  ;;  %1840 = vmatpush.msrb.mxu0 %v5114_v7  ;;  %v5180_v33 = vsub.f32 %v3466_v43, %v5164_v60 }
 0x138   : > { %v788_v53 = vpop.f32.mrf.mxu3  ;;  %v1993_v47 = vsub.f32 %v5143_v45, %v6322_v44  ;;  %2155 = vmatpush.msrb.mxu3 %v5114_v7  ;;  %2082 = vmatpush.msrb.mxu2 %v5143_v45 }
 0x139   : > { %v713_v15 = vadd.f32 %v712_v4, %v629_v24  ;;  %1406 = vmatmul.f32.gmra.mxu0 %v4764_v6  ;;  %1488 = vmatmul.f32.gmra.mxu1 %v1178_v17  ;;  %v1988_v16 = vand.u32 4294901760, %v1987_v61  ;;  %v3446_v6 = vld [vmem:[%s3857_s10 + $0x62] sm:$0xff]  ;;  %v5187_v17 = vpop.permute.xlu0 %1680  ;;  %v6332_v43 = vand.u32 4294901760, %v5180_v33 }
 0x13a   : > { %1983 = vmatpush.msrb.mxu1 %v1982_v37  ;;  %v1994_v24 = vand.u32 4294901760, %v1993_v47  ;;  %v1999_v37 = vsub.f32 %v5162_v40, %v6321_v11  ;;  %1842 = vmatpush.msrb.mxu0 %v5128_v8 }
 0x13b   : > { %v5182_v48 = vadd.f32 %v788_v53, %v713_v15  ;;  %1593 = vmatmul.f32.gmra.mxu2 %v4785_v52  ;;  %v5195_v53 = vpop.permute.xlu1 %1712  ;;  %2411 = vrot.lane.b32.xlu1 %v4937_v18, %s3755_s21  ;;  %v2005_v47 = vsub.f32 %v5180_v33, %v6332_v43 }
 0x13c   : > { %1989 = vmatpush.msrb.mxu1 %v1988_v16  ;;  %2437 = vrot.lane.b32.xlu2 %v3446_v6, %s3753_s11  ;;  %v2000_v15 = vand.u32 4294901760, %v1999_v37  ;;  %v6365_v6 = vand.u32 4294901760, %v4817_v63 }
 0x13d   : > { %1658 = vmatmul.f32.gmra.mxu3 %v4785_v52  ;;  %v5205_v52 = vpop.permute.xlu2 %1744  ;;  %2085 = vmatpush.msrb.mxu2 %v5162_v40  ;;  %v2006_v9 = vand.u32 4294901760, %v2005_v47 }
 0x13e   : > { %v487_v4 = vpop.f32.mrf.mxu0  ;;  %v636_v61 = vpop.f32.mrf.mxu1  ;;  %1995 = vmatpush.msrb.mxu1 %v1994_v24  ;;  %2157 = vmatpush.msrb.mxu3 %v5128_v8  ;;  %v3447_v24 = vld [vmem:[%s3857_s10 + $0x6a] sm:$0xff] }
 0x13f   : > { %v633_v16 = vadd.f32 %v632_v1, %v487_v4  ;;  %v717_v11 = vpop.f32.mrf.mxu2  ;;  %1844 = vmatpush.msrb.mxu0 %v5145_v57  ;;  %2088 = vmatpush.msrb.mxu2 %v5180_v33 }
 0x140   : > { %v794_v44 = vpop.f32.mrf.mxu3  ;;  %2001 = vmatpush.msrb.mxu1 %v2000_v15  ;;  %2159 = vmatpush.msrb.mxu3 %v5145_v57 }
 0x141   : > { %v718_v18 = vadd.f32 %v717_v11, %v633_v16  ;;  %1411 = vmatmul.f32.gmra.mxu0 %v4790_v26  ;;  %1494 = vmatmul.f32.gmra.mxu1 %v6365_v6  ;;  %v5217_v37 = vpop.permute.xlu0 %1682  ;;  %v6366_v11 = vand.u32 4294901760, %v4887_v21 }
 0x142   : > { %1846 = vmatpush.msrb.mxu0 %v5164_v60  ;;  %2007 = vmatpush.msrb.mxu1 %v2006_v9 }
 0x143   : > { %v5213_v1 = vadd.f32 %v794_v44, %v718_v18  ;;  %1597 = vmatmul.f32.gmra.mxu2 %v4811_v41  ;;  %v5222_v26 = vpop.permute.xlu1 %1714  ;;  %2161 = vmatpush.msrb.mxu3 %v5164_v60  ;;  %v6368_v18 = vand.u32 4294901760, %v4842_v23 }
 0x144   : > { %2214 = vmatpush.msra.mxu0 %v6366_v11  ;;  %2439 = vrot.lane.b32.xlu2 %v3447_v24, %s3753_s11  ;;  %v3609_v24 = vld [vmem:[%s3857_s10 + $0x18] sm:$0xff]  ;;  %v3496_v11 = vld [vmem:[%s6287_s1 + $0x1f0] sm:$0xff] }
 0x145   : > { %1662 = vmatmul.f32.gmra.mxu3 %v4811_v41  ;;  %v5228_v16 = vpop.permute.xlu2 %1746  ;;  %2309 = vmatpush.msra.mxu1 %v4873_v29  ;;  %v6367_v41 = vand.u32 4294901760, %v4904_v49  ;;  %v6369_v29 = vand.u32 4294901760, %v4941_v30  ;;  %v5260_v30 = vand.u32 4294901760, %v3496_v11 }
 0x146   : > { %v495_v4 = vpop.f32.mrf.mxu0  ;;  %v640_v44 = vpop.f32.mrf.mxu1 }
 0x147   : > { %v637_v15 = vadd.f32 %v636_v61, %v495_v4  ;;  %v722_v47 = vpop.f32.mrf.mxu2  ;;  %2218 = vmatpush.msra.mxu0 %v6367_v41  ;;  %v3497_v61 = vld [vmem:[%s6287_s1 + $0x1f8] sm:$0xff]  ;;  %2311 = vmatpush.msra.mxu1 %v4891_v2 }
 0x148   : > { %v800_v9 = vpop.f32.mrf.mxu3  ;;  %v5239_v6 = vand.u32 4294901760, %v3497_v61  ;;  %v3448_v4 = vld [vmem:[%s3857_s10 + $0x7a] sm:$0xff] }
 0x149   : > { %v723_v21 = vadd.f32 %v722_v47, %v637_v15  ;;  %1416 = vmatmul.f32.gmra.mxu0 %v4817_v63  ;;  %1500 = vmatmul.f32.gmra.mxu1 %v6368_v18  ;;  %v1766_v63 = vsel %vm373_vm0, %v3609_v24, %v5126_v10  ;;  %v5254_v15 = vpop.permute.xlu0 %1684  ;;  %v6370_v10 = vand.u32 4294901760, %v4956_v38  ;;  %v6371_v38 = vand.u32 4294901760, %v4984_v5  ;;  %v3610_v5 = vld [vmem:[%s3857_s10 + $0x20] sm:$0xff] }
 0x14a   : > { %2222 = vmatpush.msra.mxu0 %v6369_v29  ;;  %2503 = vmatpush.msra.mxu2 %v5239_v6  ;;  %v5258_v2 = vsub.f32 %v3497_v61, %v5239_v6 }
 0x14b   : > { %v5244_v49 = vadd.f32 %v800_v9, %v723_v21  ;;  %1601 = vmatmul.f32.gmra.mxu2 %v4837_v51  ;;  %2313 = vmatpush.msra.mxu1 %v4926_v54  ;;  %v5264_v47 = vpop.permute.xlu1 %1716  ;;  %v1774_v21 = vsel %vm382_vm1, %v1766_v63, %v5140_v20  ;;  %v5274_v54 = vsub.f32 %v3496_v11, %v5260_v30 }
 0x14c   : > { %2226 = vmatpush.msra.mxu0 %v6370_v10  ;;  %v6327_v18 = vand.u32 4294901760, %v5258_v2  ;;  %2505 = vmatpush.msra.mxu2 %v5260_v30  ;;  %v1782_v11 = vsel %vm391_vm2, %v1774_v21, %v5158_v55  ;;  %v1767_v10 = vsel %vm373_vm0, %v3610_v5, %v5187_v17  ;;  %v6373_v55 = vand.u32 4294901760, %v4995_v13  ;;  %v3494_v17 = vld [vmem:[%s6287_s1 + $0x1e0] sm:$0xff] }
 0x14d   : > { %1666 = vmatmul.f32.gmra.mxu3 %v4837_v51  ;;  %2441 = vrot.lane.b32.xlu2 %v3448_v4, %s3753_s11  ;;  %v5276_v29 = vpop.permute.xlu2 %1748  ;;  %v6324_v63 = vand.u32 4294901760, %v5274_v54  ;;  %v5317_v13 = vand.u32 4294901760, %v3494_v17 }
 0x14e   : > { %v503_v41 = vpop.f32.mrf.mxu0  ;;  %v644_v9 = vpop.f32.mrf.mxu1  ;;  %2315 = vmatpush.msra.mxu1 %v4944_v3  ;;  %2230 = vmatpush.msra.mxu0 %v6371_v38  ;;  %v2602_v24 = vsub.f32 %v5258_v2, %v6327_v18  ;;  %v3495_v3 = vld [vmem:[%s6287_s1 + $0x1e8] sm:$0xff]  ;;  %v1790_v38 = vsel %vm400_vm3, %v1782_v11, 0.0 }
 0x14f   : > { %v641_v51 = vadd.f32 %v640_v44, %v503_v41  ;;  %v727_v61 = vpop.f32.mrf.mxu2  ;;  %v6372_v44 = vand.u32 4294901760, %v4871_v50 }
 0x150   : > { %v806_v20 = vpop.f32.mrf.mxu3  ;;  %v2603_v41 = vand.u32 4294901760, %v2602_v24  ;;  %2317 = vmatpush.msra.mxu1 %v4970_v28  ;;  %2234 = vmatpush.msra.mxu0 %v6373_v55 }
 0x151   : > { %v728_v4 = vadd.f32 %v727_v61, %v641_v51  ;;  %1421 = vmatmul.f32.gmra.mxu0 %v4842_v23  ;;  %1506 = vmatmul.f32.gmra.mxu1 %v6372_v44  ;;  %v2608_v23 = vsub.f32 %v5274_v54, %v6324_v63  ;;  %v5299_v51 = vand.u32 4294901760, %v3495_v3  ;;  %v5310_v61 = vpop.permute.xlu0 %1686 }
 0x152   : > { %2604 = vmatpush.msra.mxu3 %v2603_v41  ;;  %2319 = vmatpush.msra.mxu1 %v4987_v59  ;;  %v6375_v59 = vand.u32 4294901760, %v5025_v46  ;;  %v3611_v46 = vld [vmem:[%s3857_s10 + $0x30] sm:$0xff] }
 0x153   : > { %v5304_v21 = vadd.f32 %v806_v20, %v728_v4  ;;  %1605 = vmatmul.f32.gmra.mxu2 %v4863_v0  ;;  %v2609_v24 = vand.u32 4294901760, %v2608_v23  ;;  %v5315_v28 = vsub.f32 %v3495_v3, %v5299_v51  ;;  %v3449_v20 = vld [vmem:[%s3857_s10 + $0x82] sm:$0xff]  ;;  %v1775_v4 = vsel %vm382_vm1, %v1767_v10, %v5195_v53  ;;  %v5323_v44 = vpop.permute.xlu1 %1718 }
 0x154   : > { %2507 = vmatpush.msra.mxu2 %v5299_v51  ;;  %v5329_v3 = vsub.f32 %v3494_v17, %v5317_v13  ;;  %v5331_v23 = vand.u32 4294901760, %v1790_v38  ;;  %2238 = vmatpush.msra.mxu0 %v6375_v59 }
 0x155   : > { %1670 = vmatmul.f32.gmra.mxu3 %v4863_v0  ;;  %v6326_v41 = vand.u32 4294901760, %v5315_v28  ;;  %2443 = vrot.lane.b32.xlu2 %v3449_v20, %s3753_s11  ;;  %v5334_v53 = vpop.permute.xlu2 %1750  ;;  %v6376_v20 = vand.u32 4294901760, %v4924_v39  ;;  %s3756_s11 = smov 32  }
 0x156   : > { %v511_v11 = vpop.f32.mrf.mxu0  ;;  %v648_v5 = vpop.f32.mrf.mxu1  ;;  %2610 = vmatpush.msra.mxu3 %v2609_v24  ;;  %2509 = vmatpush.msra.mxu2 %v5317_v13  ;;  %6374 = vst [vmem:[#allocation8_spill] sm:$0xff] %v5331_v23  ;;  %v1783_v24 = vsel %vm391_vm2, %v1775_v4, %v5205_v52  ;;  %v6325_v63 = vand.u32 4294901760, %v5329_v3  ;;  %v3493_v52 = vld [vmem:[%s6287_s1 + $0x1d8] sm:$0xff] }
 0x157   : > { %v645_v0 = vadd.f32 %v644_v9, %v511_v11  ;;  %v732_v55 = vpop.f32.mrf.mxu2  ;;  %v2614_v17 = vsub.f32 %v5315_v28, %v6326_v41  ;;  %2321 = vmatpush.msra.mxu1 %v5010_v31  ;;  %v1768_v11 = vsel %vm373_vm0, %v3611_v46, %v5217_v37  ;;  %v5357_v31 = vand.u32 4294901760, %v3493_v52  ;;  %v3612_v41 = vld [vmem:[%s3857_s10 + $0x38] sm:$0xff] }
 0x158   : > { %v812_v10 = vpop.f32.mrf.mxu3  ;;  %v2620_v59 = vsub.f32 %v5329_v3, %v6325_v63  ;;  %v1791_v37 = vsel %vm400_vm3, %v1783_v24, 0.0  ;;  %v6378_v24 = vand.u32 4294901760, %v5063_v62 }
 0x159   : > { %v733_v9 = vadd.f32 %v732_v55, %v645_v0  ;;  %1426 = vmatmul.f32.gmra.mxu0 %v4871_v50  ;;  %1512 = vmatmul.f32.gmra.mxu1 %v6376_v20  ;;  %v2615_v4 = vand.u32 4294901760, %v2614_v17  ;;  %v6377_v50 = vand.u32 4294901760, %v5036_v58  ;;  %v1848_v0 = vsub.f32 %v1790_v38, %v5331_v23  ;;  %v3492_v17 = vld [vmem:[%s6287_s1 + $0x1d0] sm:$0xff]  ;;  %v5370_v20 = vpop.permute.xlu0 %1688 }
 0x15a   : > { %2323 = vmatpush.msra.mxu1 %v5028_v27  ;;  %v1776_v58 = vsel %vm382_vm1, %v1768_v11, %v5222_v26  ;;  %v2621_v46 = vand.u32 4294901760, %v2620_v59  ;;  %2511 = vmatpush.msra.mxu2 %v5357_v31  ;;  %v5376_v27 = vsub.f32 %v3493_v52, %v5357_v31  ;;  %v5378_v38 = vand.u32 4294901760, %v3492_v17 }
 0x15b   : > { %2242 = vmatpush.msra.mxu0 %v6377_v50  ;;  %v5363_v55 = vadd.f32 %v812_v10, %v733_v9  ;;  %1609 = vmatmul.f32.gmra.mxu2 %v4911_v22  ;;  %v5381_v10 = vpop.permute.xlu1 %1720  ;;  %v1849_v52 = vand.u32 4294901760, %v1848_v0  ;;  %v1784_v62 = vsel %vm391_vm2, %v1776_v58, %v5228_v16  ;;  %v6381_v58 = vand.u32 4294901760, %v5093_v42 }
 0x15c   : > { %2616 = vmatpush.msra.mxu3 %v2615_v4  ;;  %v6329_v26 = vand.u32 4294901760, %v5376_v27  ;;  %2513 = vmatpush.msra.mxu2 %v5378_v38  ;;  %v5388_v11 = vsub.f32 %v3492_v17, %v5378_v38  ;;  %v5390_v4 = vand.u32 4294901760, %v1791_v37  ;;  %v1769_v17 = vsel %vm373_vm0, %v3612_v41, %v5254_v15 }
 0x15d   : > { %1674 = vmatmul.f32.gmra.mxu3 %v4911_v22  ;;  %2246 = vmatpush.msra.mxu0 %v6378_v24  ;;  %v5394_v24 = vpop.permute.xlu2 %1752 }
 0x15e   : > { %v519_v9 = vpop.f32.mrf.mxu0  ;;  %v952_v50 = vpop.f32.mrf.mxu1  ;;  %2622 = vmatpush.msra.mxu3 %v2621_v46  ;;  %6379 = vst [vmem:[#allocation9_spill] sm:$0xff] %v5390_v4  ;;  %2325 = vmatpush.msra.mxu1 %v5051_v19  ;;  %v6380_v46 = vand.u32 4294901760, %v5077_v56  ;;  %v3491_v19 = vld [vmem:[%s6287_s1 + $0x1c8] sm:$0xff]  ;;  %v1792_v56 = vsel %vm400_vm3, %v1784_v62, 0.0  ;;  %v1777_v62 = vsel %vm382_vm1, %v1769_v17, %v5264_v47 }
 0x15f   : > { %v649_v22 = vadd.f32 %v648_v5, %v519_v9  ;;  %v737_v59 = vpop.f32.mrf.mxu2  ;;  %v2626_v5 = vsub.f32 %v5376_v27, %v6329_v26  ;;  %v6328_v9 = vand.u32 4294901760, %v5388_v11  ;;  %v5415_v41 = vand.u32 4294901760, %v3491_v19 }
 0x160   : > { %2250 = vmatpush.msra.mxu0 %v6380_v46  ;;  %v818_v63 = vpop.f32.mrf.mxu3  ;;  %2327 = vmatpush.msra.mxu1 %v5066_v36  ;;  %v3490_v46 = vld [vmem:[%s6287_s1 + $0x1c0] sm:$0xff]  ;;  %v1785_v17 = vsel %vm391_vm2, %v1777_v62, %v5276_v29  ;;  %v6384_v26 = vand.u32 4294901760, %v5112_v25 }
 0x161   : > { %v738_v18 = vadd.f32 %v737_v59, %v649_v22  ;;  %1431 = vmatmul.f32.gmra.mxu0 %v4924_v39  ;;  %2009 = vmatmul.f32.vlgmr.msrb.gmra.mxu1 %v5331_v23  ;;  %v2627_v16 = vand.u32 4294901760, %v2626_v5  ;;  %v2632_v15 = vsub.f32 %v5388_v11, %v6328_v9  ;;  %v1850_v39 = vsub.f32 %v1848_v0, %v1849_v52  ;;  %v5428_v5 = vpop.permute.xlu0 %1690 }
 0x162   : > { %2254 = vmatpush.msra.mxu0 %v6381_v58  ;;  %v1856_v22 = vsub.f32 %v1791_v37, %v5390_v4  ;;  %2515 = vmatpush.msra.mxu2 %v5415_v41  ;;  %v5432_v42 = vsub.f32 %v3491_v19, %v5415_v41  ;;  %v5434_v37 = vand.u32 4294901760, %v3490_v46  ;;  %v1793_v25 = vsel %vm400_vm3, %v1785_v17, 0.0 }
 0x163   : > { %v5421_v59 = vadd.f32 %v818_v63, %v738_v18  ;;  %2091 = vmatmul.f32.vlgmr.msrb.gmra.mxu2 %v1848_v0  ;;  %2628 = vmatpush.msra.mxu3 %v2627_v16  ;;  %v2633_v36 = vand.u32 4294901760, %v2632_v15  ;;  %v5436_v18 = vand.u32 4294901760, %v1792_v56  ;;  %v5438_v63 = vpop.permute.xlu1 %1722 }
 0x164   : > { %2329 = vmatpush.msra.mxu1 %v5079_v32  ;;  %v6330_v16 = vand.u32 4294901760, %v5432_v42  ;;  %2517 = vmatpush.msra.mxu2 %v5434_v37  ;;  %v5446_v19 = vsub.f32 %v3490_v46, %v5434_v37  ;;  %v1857_v32 = vand.u32 4294901760, %v1856_v22 }
 0x165   : > { %2165 = vmatmul.f32.vlgmr.msrb.gmra.mxu3 %v1849_v52  ;;  %6382 = vst [vmem:[#allocation10_spill] sm:$0xff] %v5436_v18  ;;  %v1851_v52 = vand.u32 4294901760, %v1850_v39  ;;  %v5451_v9 = vpop.permute.xlu2 %1754  ;;  %2258 = vmatpush.msra.mxu0 %v6384_v26  ;;  %v3613_v26 = vld [vmem:[%s3857_s10 + $0x48] sm:$0xff] }
 0x166   : > { %v887_v47 = vpop.f32.mrf.mxu0  ;;  %v956_v0 = vpop.f32.mrf.mxu1  ;;  %2634 = vmatpush.msra.mxu3 %v2633_v36  ;;  %2331 = vmatpush.msra.mxu1 %v5097_v34  ;;  %v2638_v62 = vsub.f32 %v5432_v42, %v6330_v16  ;;  %v6331_v39 = vand.u32 4294901760, %v5446_v19  ;;  %v3489_v34 = vld [vmem:[%s6287_s1 + $0x1b8] sm:$0xff]  ;;  %v1770_v36 = vsel %vm373_vm0, %v3613_v26, %v5310_v61  ;;  %v1858_v17 = vsub.f32 %v1856_v22, %v1857_v32 }
 0x167   : > { %v888_v15 = vadd.f32 %v887_v47, %v5056_v12  ;;  %v5449_v58 = vpop.f32.mrf.mxu2  ;;  %v5463_v12 = vsub.f32 %v1792_v56, %v5436_v18  ;;  %v5488_v61 = vand.u32 4294901760, %v1793_v25 }
 0x168   : > { %6383 = vst [vmem:[#allocation11_spill] sm:$0xff] %v5449_v58  ;;  %v5456_v29 = vpop.f32.mrf.mxu3  ;;  %v2639_v47 = vand.u32 4294901760, %v2638_v62  ;;  %v2644_v56 = vsub.f32 %v5446_v19, %v6331_v39  ;;  %2333 = vmatpush.msra.mxu1 %v5114_v7  ;;  %v1778_v7 = vsel %vm382_vm1, %v1770_v36, %v5323_v44  ;;  %v1859_v36 = vand.u32 4294901760, %v1858_v17 }
 0x169   : > { %6385 = vst [vmem:[#allocation12_spill] sm:$0xff] %v5456_v29  ;;  %v5465_v46 = vadd.f32 %v952_v50, %v888_v15  ;;  %1852 = vmatmul.f32.vlgmr.msrb.gmra.mxu0 %v1851_v52  ;;  %2013 = vmatmul.f32.gmra.mxu1 %v5390_v4  ;;  %v5478_v50 = vand.u32 4294901760, %v3489_v34  ;;  %v6387_v52 = vand.u32 4294901760, %v5134_v35  ;;  %v3488_v15 = vld [vmem:[%s6287_s1 + $0x1b0] sm:$0xff]  ;;  %v5486_v16 = vpop.permute.xlu0 %1692 }
 0x16a   : > { %6388 = vst [vmem:[#allocation14_spill] sm:$0xff] %v5488_v61  ;;  %2640 = vmatpush.msra.mxu3 %v2639_v47  ;;  %v2645_v62 = vand.u32 4294901760, %v2644_v56  ;;  %v5494_v35 = vand.u32 4294901760, %v3488_v15  ;;  %2335 = vmatpush.msra.mxu1 %v5128_v8  ;;  %v1865_v47 = vand.u32 4294901760, %v5463_v12  ;;  %v6390_v8 = vand.u32 4294901760, %v5143_v45  ;;  %v3487_v45 = vld [vmem:[%s6287_s1 + $0x1a8] sm:$0xff] }
 0x16b   : > { %6386 = vst [vmem:[#allocation13_spill] sm:$0xff] %v5465_v46  ;;  %2262 = vmatpush.msra.mxu0 %v6387_v52  ;;  %2096 = vmatmul.f32.gmra.mxu2 %v1856_v22  ;;  %v5492_v26 = vsub.f32 %v3489_v34, %v5478_v50  ;;  %v5498_v22 = vpop.permute.xlu1 %1724 }
 0x16c   : > { %2519 = vmatpush.msra.mxu2 %v5478_v50  ;;  %2646 = vmatpush.msra.mxu3 %v2645_v62  ;;  %v5507_v34 = vsub.f32 %v3488_v15, %v5494_v35  ;;  %v5518_v62 = vsub.f32 %v1793_v25, %v5488_v61  ;;  %v1786_v15 = vsel %vm391_vm2, %v1778_v7, %v5334_v53  ;;  %v5534_v25 = vand.u32 4294901760, %v3487_v45 }
 0x16d   : > { %2171 = vmatmul.f32.gmra.mxu3 %v1857_v32  ;;  %v5512_v43 = vpop.permute.xlu2 %1756  ;;  %2266 = vmatpush.msra.mxu0 %v6390_v8  ;;  %v1866_v53 = vsub.f32 %v5463_v12, %v1865_v47 }
 0x16e   : > { %v891_v52 = vpop.f32.mrf.mxu0  ;;  %v5501_v39 = vpop.f32.mrf.mxu1  ;;  %2521 = vmatpush.msra.mxu2 %v5494_v35  ;;  %2337 = vmatpush.msra.mxu1 %v5145_v57 }
 0x16f   : > { %v892_v32 = vadd.f32 %v891_v52, %v5119_v14  ;;  %v5510_v44 = vpop.f32.mrf.mxu2  ;;  %v6392_v14 = vand.u32 4294901760, %v5492_v26  ;;  %v6333_v52 = vand.u32 4294901760, %v5507_v34 }
 0x170   : > { %6389 = vst [vmem:[#allocation15_spill] sm:$0xff] %v5510_v44  ;;  %v5520_v56 = vpop.f32.mrf.mxu3  ;;  %2339 = vmatpush.msra.mxu1 %v5164_v60  ;;  %v1873_v60 = vand.u32 4294901760, %v5518_v62  ;;  %2523 = vmatpush.msra.mxu2 %v5534_v25 }
 0x171   : > { %6391 = vst [vmem:[#allocation16_spill] sm:$0xff] %v5520_v56  ;;  %v2650_v17 = vsub.f32 %v5492_v26, %v6392_v14  ;;  %v5531_v57 = vadd.f32 %v956_v0, %v892_v32  ;;  %1860 = vmatmul.f32.gmra.mxu0 %v1859_v36  ;;  %2017 = vmatmul.f32.gmra.mxu1 %v5436_v18  ;;  %v3486_v14 = vld [vmem:[%s6287_s1 + $0x1a0] sm:$0xff]  ;;  %v6394_v0 = vand.u32 4294901760, %v5162_v40  ;;  %v1794_v32 = vsel %vm400_vm3, %v1786_v15, 0.0  ;;  %v3614_v36 = vld [vmem:[%s3857_s10 + $0x50] sm:$0xff]  ;;  %v5556_v46 = vpop.permute.xlu0 %2373 }
 0x172   : > { %v2656_v8 = vsub.f32 %v5507_v34, %v6333_v52  ;;  %v5554_v52 = vand.u32 4294901760, %v3486_v14  ;;  %2818 = vmatpush.msrb.mxu1 %v5239_v6  ;;  %v1867_v56 = vand.u32 4294901760, %v1866_v53 }
 0x173   : > { %6393 = vst [vmem:[#allocation17_spill] sm:$0xff] %v5531_v57  ;;  %v2651_v7 = vand.u32 4294901760, %v2650_v17  ;;  %2270 = vmatpush.msra.mxu0 %v6394_v0  ;;  %2101 = vmatmul.f32.gmra.mxu2 %v5463_v12  ;;  %v1771_v17 = vsel %vm373_vm0, %v3614_v36, %v5370_v20  ;;  %v5552_v57 = vsub.f32 %v3487_v45, %v5534_v25  ;;  %v3485_v12 = vld [vmem:[%s6287_s1 + $0x198] sm:$0xff]  ;;  %v5565_v15 = vpop.permute.xlu1 %2397  ;;  %v6395_v36 = vand.u32 4294901760, %v5180_v33 }
 0x174   : > { %v2657_v40 = vand.u32 4294901760, %v2656_v8  ;;  %v5568_v45 = vsub.f32 %v3486_v14, %v5554_v52  ;;  %v5570_v0 = vand.u32 4294901760, %v3485_v12  ;;  %2525 = vmatpush.msra.mxu2 %v5554_v52  ;;  %v3484_v14 = vld [vmem:[%s6287_s1 + $0x190] sm:$0xff]  ;;  %2820 = vmatpush.msrb.mxu1 %v5260_v30 }
 0x175   : > { %2652 = vmatpush.msra.mxu3 %v2651_v7  ;;  %2274 = vmatpush.msra.mxu0 %v6395_v36  ;;  %v5574_v7 = vand.u32 4294901760, %v1794_v32  ;;  %v6397_v36 = vand.u32 4294901760, %v5552_v57  ;;  %v5591_v4 = vpop.permute.xlu2 %2429 }
 0x176   : > { %2177 = vmatmul.f32.gmra.mxu3 %v1865_v47  ;;  %v895_v8 = vpop.f32.mrf.mxu0  ;;  %v5576_v18 = vpop.f32.mrf.mxu1  ;;  %v1779_v47 = vsel %vm382_vm1, %v1771_v17, %v5381_v10  ;;  %v5594_v10 = vsub.f32 %v3485_v12, %v5570_v0  ;;  %2527 = vmatpush.msra.mxu2 %v5570_v0 }
 0x177   : > { %2658 = vmatpush.msra.mxu3 %v2657_v40  ;;  %v896_v20 = vadd.f32 %v895_v8, %v5182_v48  ;;  %v5585_v33 = vpop.f32.mrf.mxu2  ;;  %v2662_v44 = vsub.f32 %v5552_v57, %v6397_v36  ;;  %2730 = vmatpush.msrb.mxu0 %v5258_v2  ;;  %v1874_v48 = vsub.f32 %v5518_v62, %v1873_v60  ;;  %v5602_v40 = vand.u32 4294901760, %v3484_v14  ;;  %v3483_v8 = vld [vmem:[%s6287_s1 + $0x188] sm:$0xff] }
 0x178   : > { %6396 = vst [vmem:[#allocation18_spill] sm:$0xff] %v5585_v33  ;;  %v5598_v17 = vpop.f32.mrf.mxu3  ;;  %v1787_v36 = vsel %vm391_vm2, %v1779_v47, %v5394_v24  ;;  %v1880_v24 = vsub.f32 %v1794_v32, %v5574_v7  ;;  %2822 = vmatpush.msrb.mxu1 %v5299_v51 }
 0x179   : > { %6398 = vst [vmem:[#allocation19_spill] sm:$0xff] %v5598_v17  ;;  %v5608_v12 = vadd.f32 %v5501_v39, %v896_v20  ;;  %1868 = vmatmul.f32.gmra.mxu0 %v1867_v56  ;;  %2021 = vmatmul.f32.gmra.mxu1 %v5488_v61  ;;  %v2663_v53 = vand.u32 4294901760, %v2662_v44  ;;  %v6401_v17 = vand.u32 4294901760, %v5568_v45  ;;  %v5619_v58 = vsub.f32 %v3484_v14, %v5602_v40  ;;  %v3482_v56 = vld [vmem:[%s6287_s1 + $0x180] sm:$0xff]  ;;  %v5632_v14 = vpop.permute.xlu0 %2375 }
 0x17a   : > { %6399 = vst [vmem:[#allocation20_spill] sm:$0xff] %v5602_v40  ;;  %2529 = vmatpush.msra.mxu2 %v5602_v40  ;;  %v5621_v39 = vand.u32 4294901760, %v3483_v8  ;;  %2733 = vmatpush.msrb.mxu0 %v5274_v54  ;;  %v3615_v44 = vld [vmem:[%s3857_s10 + $0x60] sm:$0xff]  ;;  %v1795_v29 = vsel %vm400_vm3, %v1787_v36, 0.0  ;;  %v1881_v40 = vand.u32 4294901760, %v1880_v24 }
 0x17b   : > { %6400 = vst [vmem:[#allocation21_spill] sm:$0xff] %v5608_v12  ;;  %v2668_v33 = vsub.f32 %v5568_v45, %v6401_v17  ;;  %2106 = vmatmul.f32.gmra.mxu2 %v5518_v62  ;;  %v1772_v20 = vsel %vm373_vm0, %v3615_v44, %v5428_v5  ;;  %2664 = vmatpush.msra.mxu3 %v2663_v53  ;;  %v5634_v17 = vand.u32 4294901760, %v3482_v56  ;;  %v6403_v12 = vand.u32 4294901760, %v5594_v10  ;;  %v5662_v23 = vpop.permute.xlu1 %2399 }
 0x17c   : > { %6402 = vst [vmem:[#allocation22_spill] sm:$0xff] %v5621_v39  ;;  %v6347_v32 = vand.u32 4294901760, %v5619_v58  ;;  %2531 = vmatpush.msra.mxu2 %v5621_v39  ;;  %v5643_v62 = vsub.f32 %v3483_v8, %v5621_v39  ;;  %2736 = vmatpush.msrb.mxu0 %v5315_v28  ;;  %v1875_v5 = vand.u32 4294901760, %v1874_v48 }
 0x17d   : > { %v2669_v47 = vand.u32 4294901760, %v2668_v33  ;;  %v2674_v61 = vsub.f32 %v5594_v10, %v6403_v12  ;;  %v5647_v33 = vsub.f32 %v3482_v56, %v5634_v17  ;;  %v1780_v12 = vsel %vm382_vm1, %v1772_v20, %v5438_v63  ;;  %2824 = vmatpush.msrb.mxu1 %v5317_v13 }
 0x17e   : > { %2183 = vmatmul.f32.gmra.mxu3 %v1873_v60  ;;  %v899_v53 = vpop.f32.mrf.mxu0  ;;  %v968_v36 = vpop.f32.mrf.mxu1  ;;  %v2680_v8 = vsub.f32 %v5619_v58, %v6347_v32  ;;  %v6346_v39 = vand.u32 4294901760, %v5643_v62  ;;  %2533 = vmatpush.msra.mxu2 %v5634_v17  ;;  %v5657_v60 = vand.u32 4294901760, %v1795_v29 }
 0x17f   : > { %2670 = vmatpush.msra.mxu3 %v2669_v47  ;;  %v2675_v44 = vand.u32 4294901760, %v2674_v61  ;;  %v900_v48 = vadd.f32 %v899_v53, %v5213_v1  ;;  %v5660_v56 = vpop.f32.mrf.mxu2  ;;  %v2691_v63 = vand.u32 4294901760, %v5647_v33  ;;  %v6404_v61 = vand.u32 4294901760, %v5258_v2  ;;  %2739 = vmatpush.msrb.mxu0 %v5329_v3 }
 0x180   : > { %v5668_v20 = vpop.f32.mrf.mxu3  ;;  %v2681_v47 = vand.u32 4294901760, %v2680_v8  ;;  %v2686_v1 = vsub.f32 %v5643_v62, %v6346_v39  ;;  %v1788_v2 = vsel %vm391_vm2, %v1780_v12, %v5451_v9  ;;  %v3617_v9 = vld [vmem:[%s3857_s10 + $0x19] sm:$0xff]  ;;  %2826 = vmatpush.msrb.mxu1 %v5357_v31 }
 0x181   : > { %2901 = vmatpush.msrb.mxu2 %v6404_v61  ;;  %2676 = vmatpush.msra.mxu3 %v2675_v44  ;;  %v5675_v53 = vadd.f32 %v5576_v18, %v900_v48  ;;  %v5680_v61 = vpop.permute.xlu2 %2431  ;;  %v3616_v44 = vld [vmem:[%s3857_s10 + $0x68] sm:$0xff]  ;;  %v2692_v32 = vsub.f32 %v5647_v33, %v2691_v63  ;;  %v6405_v18 = vand.u32 4294901760, %v5274_v54  ;;  %v1882_v48 = vsub.f32 %v1880_v24, %v1881_v40 }
 0x182   : > { %1876 = vmatmul.f32.gmra.mxu0 %v1875_v5  ;;  %2025 = vmatmul.f32.gmra.mxu1 %v5574_v7  ;;  %v1773_v8 = vsel %vm373_vm0, %v3616_v44, %v5486_v16  ;;  %v2687_v39 = vand.u32 4294901760, %v2686_v1  ;;  %v1888_v5 = vsub.f32 %v1795_v29, %v5657_v60  ;;  %v2453_v12 = vsel %vm373_vm0, %v3617_v9, %v5556_v46  ;;  %v5700_v29 = vpop.permute.xlu0 %2377 }
 0x183   : > { %2682 = vmatpush.msra.mxu3 %v2681_v47  ;;  %2905 = vmatpush.msrb.mxu2 %v6405_v18  ;;  %v1796_v16 = vsel %vm400_vm3, %v1788_v2, 0.0  ;;  %v2693_v47 = vand.u32 4294901760, %v2692_v32  ;;  %v6406_v1 = vand.u32 4294901760, %v5315_v28  ;;  %v1781_v54 = vsel %vm382_vm1, %v1773_v8, %v5498_v22  ;;  %v2402_v18 = vpop.permute.xlu1 %2401 }
 0x184   : > { %2111 = vmatmul.f32.gmra.mxu2 %v1880_v24  ;;  %2742 = vmatpush.msrb.mxu0 %v5376_v27  ;;  %v2461_v46 = vsel %vm382_vm1, %v2453_v12, %v5565_v15  ;;  %v5707_v32 = vand.u32 4294901760, %v1796_v16  ;;  %v1883_v22 = vand.u32 4294901760, %v1882_v48  ;;  %v1889_v2 = vand.u32 4294901760, %v1888_v5 }
 0x185   : > { %2688 = vmatpush.msra.mxu3 %v2687_v39  ;;  %2909 = vmatpush.msrb.mxu2 %v6406_v1  ;;  %v6407_v39 = vand.u32 4294901760, %v5329_v3  ;;  %v1789_v15 = vsel %vm391_vm2, %v1781_v54, %v5512_v43  ;;  %v6408_v3 = vand.u32 4294901760, %v5376_v27  ;;  %v6409_v48 = vand.u32 4294901760, %v5388_v11 }
 0x186   : > { %2189 = vmatmul.f32.gmra.mxu3 %v1881_v40  ;;  %v903_v24 = vpop.f32.mrf.mxu0  ;;  %v972_v44 = vpop.f32.mrf.mxu1  ;;  %2745 = vmatpush.msrb.mxu0 %v5388_v11  ;;  %v1896_v43 = vsub.f32 %v1796_v16, %v5707_v32  ;;  %v1797_v27 = vsel %vm400_vm3, %v1789_v15, 0.0  ;;  %v1890_v9 = vsub.f32 %v1888_v5, %v1889_v2  ;;  %v6411_v1 = vand.u32 4294901760, %v5446_v19 }
 0x187   : > { %2694 = vmatpush.msra.mxu3 %v2693_v47  ;;  %2913 = vmatpush.msrb.mxu2 %v6407_v39  ;;  %v904_v28 = vadd.f32 %v903_v24, %v5244_v49  ;;  %v5710_v40 = vpop.f32.mrf.mxu2  ;;  %v5742_v11 = vand.u32 4294901760, %v1797_v27 }
 0x188   : > { %v5714_v8 = vpop.f32.mrf.mxu3  ;;  %2828 = vmatpush.msrb.mxu1 %v5378_v38  ;;  %2748 = vmatpush.msrb.mxu0 %v5432_v42  ;;  %v1897_v24 = vand.u32 4294901760, %v1896_v43 }
 0x189   : > { %2996 = vmatpush.msrb.mxu3 %v5239_v6  ;;  %2917 = vmatpush.msrb.mxu2 %v6408_v3  ;;  %v5721_v49 = vadd.f32 %v968_v36, %v904_v28  ;;  %v2469_v6 = vsel %vm391_vm2, %v2461_v46, %v5591_v4  ;;  %v3618_v36 = vld [vmem:[%s3857_s10 + $0x21] sm:$0xff]  ;;  %v5734_v47 = vpop.permute.xlu2 %2433 }
 0x18a   : > { %1884 = vmatmul.f32.gmra.mxu0 %v1883_v22  ;;  %2029 = vmatmul.f32.gmra.mxu1 %v5657_v60  ;;  %v2454_v12 = vsel %vm373_vm0, %v3618_v36, %v5632_v14  ;;  %v2477_v4 = vsel %vm400_vm3, %v2469_v6, 0.0  ;;  %v2380_v39 = vpop.permute.xlu0 %2379  ;;  %v1904_v22 = vsub.f32 %v1797_v27, %v5742_v11 }
 0x18b   : > { %2998 = vmatpush.msrb.mxu3 %v5260_v30  ;;  %2921 = vmatpush.msrb.mxu2 %v6409_v48  ;;  %v6410_v30 = vand.u32 4294901760, %v5432_v42  ;;  %v2462_v14 = vsel %vm382_vm1, %v2454_v12, %v5662_v23  ;;  %v1891_v42 = vand.u32 4294901760, %v1890_v9  ;;  %v5752_v46 = vand.u32 4294901760, %v2477_v4  ;;  %v2404_v15 = vpop.permute.xlu1 %2403 }
 0x18c   : > { %2116 = vmatmul.f32.gmra.mxu2 %v1888_v5  ;;  %2830 = vmatpush.msrb.mxu1 %v5415_v41  ;;  %v2470_v28 = vsel %vm391_vm2, %v2462_v14, %v5680_v61  ;;  %v1905_v48 = vand.u32 4294901760, %v1904_v22  ;;  %v6416_v14 = vand.u32 4294901760, %v5594_v10 }
 0x18d   : > { %3000 = vmatpush.msrb.mxu3 %v5299_v51  ;;  %2925 = vmatpush.msrb.mxu2 %v6410_v30  ;;  %v2478_v61 = vsel %vm400_vm3, %v2470_v28, 0.0 }
 0x18e   : > { %2195 = vmatmul.f32.gmra.mxu3 %v1889_v2  ;;  %v907_v5 = vpop.f32.mrf.mxu0  ;;  %v976_v16 = vpop.f32.mrf.mxu1  ;;  %2751 = vmatpush.msrb.mxu0 %v5446_v19  ;;  %v1898_v19 = vsub.f32 %v1896_v43, %v1897_v24  ;;  %v3619_v2 = vld [vmem:[%s3857_s10 + $0x31] sm:$0xff]  ;;  %v5788_v36 = vand.u32 4294901760, %v2478_v61 }
 0x18f   : > { %3002 = vmatpush.msrb.mxu3 %v5317_v13  ;;  %2929 = vmatpush.msrb.mxu2 %v6411_v1  ;;  %v908_v51 = vadd.f32 %v907_v5, %v5304_v21  ;;  %v5750_v54 = vpop.f32.mrf.mxu2  ;;  %v6412_v13 = vand.u32 4294901760, %v5492_v26  ;;  %v3620_v5 = vld [vmem:[%s3857_s10 + $0x39] sm:$0xff] }
 0x190   : > { %2832 = vmatpush.msrb.mxu1 %v5434_v37  ;;  %v5756_v23 = vpop.f32.mrf.mxu3  ;;  %2754 = vmatpush.msrb.mxu0 %v5492_v26  ;;  %v1899_v9 = vand.u32 4294901760, %v1898_v19  ;;  %v5809_v30 = vsub.f32 %v2478_v61, %v5788_v36  ;;  %v6417_v19 = vand.u32 4294901760, %v5619_v58 }
 0x191   : > { %3004 = vmatpush.msrb.mxu3 %v5357_v31  ;;  %2933 = vmatpush.msrb.mxu2 %v6412_v13  ;;  %v5761_v21 = vadd.f32 %v972_v44, %v908_v51  ;;  %v5770_v31 = vsub.f32 %v2477_v4, %v5752_v46  ;;  %v2455_v44 = vsel %vm373_vm0, %v3619_v2, %v5700_v29  ;;  %v2436_v26 = vpop.permute.xlu2 %2435 }
 0x192   : > { %1892 = vmatmul.f32.gmra.mxu0 %v1891_v42  ;;  %2033 = vmatmul.f32.gmra.mxu1 %v5707_v32  ;;  %v2382_v12 = vpop.permute.xlu0 %2381  ;;  %v1906_v4 = vsub.f32 %v1904_v22, %v1905_v48  ;;  %v2544_v28 = vand.u32 4294901760, %v5809_v30 }
 0x193   : > { %3006 = vmatpush.msrb.mxu3 %v5378_v38  ;;  %2834 = vmatpush.msrb.mxu1 %v5478_v50  ;;  %v6413_v38 = vand.u32 4294901760, %v5507_v34  ;;  %v2536_v29 = vand.u32 4294901760, %v5770_v31 }
 0x194   : > { %2121 = vmatmul.f32.gmra.mxu2 %v1896_v43  ;;  %2757 = vmatpush.msrb.mxu0 %v5507_v34  ;;  %v2463_v43 = vsel %vm382_vm1, %v2455_v44, %v2402_v18  ;;  %v6414_v34 = vand.u32 4294901760, %v5552_v57  ;;  %v1907_v42 = vand.u32 4294901760, %v1906_v4 }
 0x195   : > { %3008 = vmatpush.msrb.mxu3 %v5415_v41  ;;  %2937 = vmatpush.msrb.mxu2 %v6413_v38 }
 0x196   : > { %2201 = vmatmul.f32.gmra.mxu3 %v1897_v24  ;;  %v911_v3 = vpop.f32.mrf.mxu0  ;;  %v980_v6 = vpop.f32.mrf.mxu1  ;;  %2836 = vmatpush.msrb.mxu1 %v5494_v35 }
 0x197   : > { %3010 = vmatpush.msrb.mxu3 %v5434_v37  ;;  %v912_v41 = vadd.f32 %v911_v3, %v5363_v55  ;;  %v5786_v27 = vpop.f32.mrf.mxu2  ;;  %2941 = vmatpush.msrb.mxu2 %v6414_v34  ;;  %v2471_v55 = vsel %vm391_vm2, %v2463_v43, %v5734_v47  ;;  %v6422_v43 = vld [vmem:[#allocation11_spill] sm:$0xff] }
 0x198   : > { %2760 = vmatpush.msrb.mxu0 %v5552_v57  ;;  %v5793_v18 = vpop.f32.mrf.mxu3  ;;  %2838 = vmatpush.msrb.mxu1 %v5534_v25  ;;  %v6415_v57 = vand.u32 4294901760, %v5568_v45  ;;  %v2479_v47 = vsel %vm400_vm3, %v2471_v55, 0.0 }
 0x199   : > { %3012 = vmatpush.msrb.mxu3 %v5478_v50  ;;  %v5797_v37 = vadd.f32 %v976_v16, %v912_v41  ;;  %v2537_v50 = vsub.f32 %v5770_v31, %v2536_v29  ;;  %v2456_v16 = vsel %vm373_vm0, %v3620_v5, %v2380_v39  ;;  %v5823_v13 = vand.u32 4294901760, %v2479_v47  ;;  %v6423_v41 = vld [vmem:[#allocation12_spill] sm:$0xff] }
 0x19a   : > { %1900 = vmatmul.f32.gmra.mxu0 %v1899_v9  ;;  %2037 = vmatmul.f32.gmra.mxu1 %v5742_v11  ;;  %v2464_v24 = vsel %vm382_vm1, %v2456_v16, %v2404_v15  ;;  %v6419_v15 = vld [vmem:[#allocation20_spill] sm:$0xff]  ;;  %v2384_v3 = vpop.permute.xlu0 %2383  ;;  %v1316_v9 = vadd.f32 %v6423_v41, %v6422_v43  ;;  %v6427_v43 = vld [vmem:[#allocation10_spill] sm:$0xff] }
 0x19b   : > { %3014 = vmatpush.msrb.mxu3 %v5494_v35  ;;  %2945 = vmatpush.msrb.mxu2 %v6415_v57  ;;  %v2406_v35 = vpop.permute.xlu1 %2405  ;;  %v2472_v44 = vsel %vm391_vm2, %v2464_v24, %v2436_v26  ;;  %v5840_v61 = vsub.f32 %v2479_v47, %v5823_v13 }
 0x19c   : > { %2126 = vmatmul.f32.gmra.mxu2 %v1904_v22  ;;  %2763 = vmatpush.msrb.mxu0 %v5568_v45  ;;  %v2538_v45 = vand.u32 4294901760, %v2537_v50  ;;  %v2438_v22 = vpop.permute.xlu2 %2437  ;;  %v2480_v26 = vsel %vm400_vm3, %v2472_v44, 0.0 }
 0x19d   : > { %3016 = vmatpush.msrb.mxu3 %v5534_v25  ;;  %2840 = vmatpush.msrb.mxu1 %v5554_v52  ;;  %v2552_v5 = vand.u32 4294901760, %v5840_v61 }
 0x19e   : > { %2207 = vmatmul.f32.gmra.mxu3 %v1905_v48  ;;  %2949 = vmatpush.msrb.mxu2 %v6416_v14  ;;  %v915_v1 = vpop.f32.mrf.mxu0  ;;  %v1471_v51 = vpop.f32.mrf.mxu1  ;;  %v6421_v48 = vand.u32 4294901760, %v5643_v62  ;;  %v6424_v14 = vld [vmem:[#allocation9_spill] sm:$0xff] }
 0x19f   : > { %3018 = vmatpush.msrb.mxu3 %v5554_v52  ;;  %2766 = vmatpush.msrb.mxu0 %v5594_v10  ;;  %v916_v39 = vadd.f32 %v915_v1, %v5421_v59  ;;  %v1214_v25 = vpop.f32.mrf.mxu2  ;;  %v6418_v10 = vld [vmem:[#allocation8_spill] sm:$0xff] }
 0x1a0   : > { %2842 = vmatpush.msrb.mxu1 %v5570_v0  ;;  %2953 = vmatpush.msrb.mxu2 %v6417_v19  ;;  %v1343_v2 = vpop.f32.mrf.mxu3 }
 0x1a1   : > { %3020 = vmatpush.msrb.mxu3 %v5570_v0  ;;  %2769 = vmatpush.msrb.mxu0 %v5619_v58  ;;  %v5831_v52 = vadd.f32 %v980_v6, %v916_v39  ;;  %v5833_v59 = vadd.f32 %v1343_v2, %v1214_v25  ;;  %v2545_v58 = vsub.f32 %v5809_v30, %v2544_v28  ;;  %v3621_v0 = vld [vmem:[%s3857_s10 + $0x49] sm:$0xff]  ;;  %v6420_v6 = vld [vmem:[#allocation22_spill] sm:$0xff]  ;;  %v6425_v39 = vld [vmem:[#allocation15_spill] sm:$0xff] }
 0x1a2   : > { %1908 = vmatmul.f32.gmra.mxu0 %v1907_v42  ;;  %2341 = vmatmul.f32.vlgmr.msra.gmra.mxu1 %v6418_v10  ;;  %v2457_v38 = vsel %vm373_vm0, %v3621_v0, %v2382_v12  ;;  %v6426_v25 = vld [vmem:[#allocation16_spill] sm:$0xff] }
 0x1a3   : > { %2844 = vmatpush.msrb.mxu1 %v6419_v15  ;;  %3022 = vmatpush.msrb.mxu3 %v6419_v15  ;;  %v2465_v12 = vsel %vm382_vm1, %v2457_v38, %v2406_v35  ;;  %v2546_v50 = vand.u32 4294901760, %v2545_v58  ;;  %v2408_v16 = vpop.permute.xlu1 %2407  ;;  %v1320_v19 = vadd.f32 %v6426_v25, %v6425_v39 }
 0x1a4   : > { %2539 = vmatmul.f32.vlgmr.msra.gmra.mxu2 %v2538_v45  ;;  %2772 = vmatpush.msrb.mxu0 %v5643_v62  ;;  %v5859_v62 = vand.u32 4294901760, %v2480_v26  ;;  %v2473_v1 = vsel %vm391_vm2, %v2465_v12, %v2438_v22  ;;  %v2440_v42 = vpop.permute.xlu2 %2439  ;;  %v2386_v22 = vpop.permute.xlu0 %2385 }
 0x1a5   : > { %2846 = vmatpush.msrb.mxu1 %v6420_v6  ;;  %2957 = vmatpush.msrb.mxu2 %v6421_v48 }
 0x1a6   : > { %2696 = vmatmul.f32.vlgmr.msra.gmra.mxu3 %v5752_v46  ;;  %2775 = vmatpush.msrb.mxu0 %v5647_v33  ;;  %v1397_v34 = vpop.f32.mrf.mxu0  ;;  %v1477_v55 = vpop.f32.mrf.mxu1  ;;  %v5869_v45 = vsub.f32 %v2480_v26, %v5859_v62  ;;  %v2553_v33 = vsub.f32 %v5840_v61, %v2552_v5 }
 0x1a7   : > { %2848 = vmatpush.msrb.mxu1 %v5634_v17  ;;  %3024 = vmatpush.msrb.mxu3 %v6420_v6  ;;  %v1398_v4 = vadd.f32 %v1397_v34, %v1316_v9  ;;  %v1582_v57 = vpop.f32.mrf.mxu2 }
 0x1a8   : > { %2961 = vmatpush.msrb.mxu2 %v2691_v63  ;;  %v1647_v47 = vpop.f32.mrf.mxu3  ;;  %v3622_v63 = vld [vmem:[%s3857_s10 + $0x51] sm:$0xff]  ;;  %v2554_v38 = vand.u32 4294901760, %v2553_v33  ;;  %v2560_v26 = vand.u32 4294901760, %v5869_v45 }
 0x1a9   : > { %3026 = vmatpush.msrb.mxu3 %v5634_v17  ;;  %v1472_v35 = vadd.f32 %v1471_v51, %v1398_v4  ;;  %v2458_v17 = vsel %vm373_vm0, %v3622_v63, %v2384_v3  ;;  %v2481_v51 = vsel %vm400_vm3, %v2473_v1, 0.0 }
 0x1aa   : > { %2276 = vmatmul.f32.vlgmr.msra.gmra.mxu0 %v6418_v10  ;;  %2345 = vmatmul.f32.gmra.mxu1 %v6424_v14  ;;  %v2466_v15 = vsel %vm382_vm1, %v2458_v17, %v2408_v16  ;;  %v5882_v3 = vand.u32 4294901760, %v2481_v51  ;;  %v2561_v4 = vsub.f32 %v5869_v45, %v2560_v26 }
 0x1ab   : > { %v1583_v24 = vadd.f32 %v1582_v57, %v1472_v35  ;;  %v2474_v41 = vsel %vm391_vm2, %v2466_v15, %v2440_v42  ;;  %v2410_v9 = vpop.permute.xlu1 %2409  ;;  %v3623_v57 = vld [vmem:[%s3857_s10 + $0x61] sm:$0xff] }
 0x1ac   : > { %2547 = vmatmul.f32.gmra.mxu2 %v2546_v50  ;;  %v5889_v12 = vsub.f32 %v2481_v51, %v5882_v3  ;;  %v2459_v50 = vsel %vm373_vm0, %v3623_v57, %v2386_v22  ;;  %v2482_v16 = vsel %vm400_vm3, %v2474_v41, 0.0  ;;  %v6429_v35 = vld [vmem:[#allocation19_spill] sm:$0xff]  ;;  %v2562_v51 = vand.u32 4294901760, %v2561_v4 }
 0x1ad   : > { %v1648_v2 = vadd.f32 %v1647_v47, %v1583_v24  ;;  %v6428_v47 = vld [vmem:[#allocation18_spill] sm:$0xff]  ;;  %v2467_v33 = vsel %vm382_vm1, %v2459_v50, %v2410_v9  ;;  %v5902_v39 = vand.u32 4294901760, %v2482_v16 }
 0x1ae   : > { %2700 = vmatmul.f32.gmra.mxu3 %v5788_v36  ;;  %v1402_v10 = vpop.f32.mrf.mxu0  ;;  %v1483_v44 = vpop.f32.mrf.mxu1  ;;  %v2568_v25 = vand.u32 4294901760, %v5889_v12 }
 0x1af   : > { %v1403_v58 = vadd.f32 %v1402_v10, %v1320_v19  ;;  %v1586_v0 = vpop.f32.mrf.mxu2  ;;  %3068 = vrot.lane.b32.xlu0 %v1648_v2, %s3756_s11  ;;  %v2388_v2 = vpop.permute.xlu0 %2387  ;;  %v6430_v10 = vld [vmem:[#allocation14_spill] sm:$0xff] }
 0x1b0   : > { %v1651_v6 = vpop.f32.mrf.mxu3 }
 0x1b1   : > { %v1478_v48 = vadd.f32 %v1477_v55, %v1403_v58  ;;  %v2442_v55 = vpop.permute.xlu2 %2441 }
 0x1b2   : > { %2280 = vmatmul.f32.gmra.mxu0 %v6424_v14  ;;  %2349 = vmatmul.f32.gmra.mxu1 %v6427_v43  ;;  %v1324_v14 = vadd.f32 %v6429_v35, %v6428_v47  ;;  %v2475_v15 = vsel %vm391_vm2, %v2467_v33, %v2442_v55 }
 0x1b3   : > { %v1587_v34 = vadd.f32 %v1586_v0, %v1478_v48  ;;  %v5909_v0 = vsub.f32 %v2482_v16, %v5902_v39  ;;  %v2412_v41 = vpop.permute.xlu1 %2411 }
 0x1b4   : > { %2555 = vmatmul.f32.gmra.mxu2 %v2554_v38  ;;  %v2569_v38 = vsub.f32 %v5889_v12, %v2568_v25 }
 0x1b5   : > { %v1652_v1 = vadd.f32 %v1651_v6, %v1587_v34  ;;  %v3624_v6 = vld [vmem:[%s3857_s10 + $0x69] sm:$0xff]  ;;  %s3757_s10 = smov 64  }
 0x1b6   : > { %2704 = vmatmul.f32.gmra.mxu3 %v5823_v13  ;;  %v1407_v42 = vpop.f32.mrf.mxu0  ;;  %v1489_v24 = vpop.f32.mrf.mxu1  ;;  %v2460_v48 = vsel %vm373_vm0, %v3624_v6, %v2388_v2  ;;  %v2570_v47 = vand.u32 4294901760, %v2569_v38 }
 0x1b7   : > { %v1408_v63 = vadd.f32 %v1407_v42, %v1324_v14  ;;  %v1590_v17 = vpop.f32.mrf.mxu2  ;;  %3070 = vrot.lane.b32.xlu1 %v1652_v1, %s3756_s11  ;;  %v2468_v50 = vsel %vm382_vm1, %v2460_v48, %v2412_v41  ;;  %v2576_v14 = vand.u32 4294901760, %v5909_v0 }
 0x1b8   : > { %v1655_v19 = vpop.f32.mrf.mxu3 }
 0x1b9   : > { %v1484_v22 = vadd.f32 %v1483_v44, %v1408_v63  ;;  %v2483_v44 = vsel %vm400_vm3, %v2475_v15, 0.0  ;;  %v2444_v34 = vpop.permute.xlu2 %2443  ;;  %v2577_v63 = vsub.f32 %v5909_v0, %v2576_v14 }
 0x1ba   : > { %2284 = vmatmul.f32.gmra.mxu0 %v6427_v43  ;;  %2353 = vmatmul.f32.gmra.mxu1 %v6430_v10  ;;  %v1328_v43 = vadd.f32 %v5668_v20, %v5660_v56  ;;  %v5922_v35 = vand.u32 4294901760, %v2483_v44  ;;  %v2476_v56 = vsel %vm391_vm2, %v2468_v50, %v2444_v34 }
 0x1bb   : > { %v1591_v58 = vadd.f32 %v1590_v17, %v1484_v22  ;;  %v2484_v17 = vsel %vm400_vm3, %v2476_v56, 0.0  ;;  %v2578_v15 = vand.u32 4294901760, %v2577_v63 }
 0x1bc   : > { %2563 = vmatmul.f32.gmra.mxu2 %v2562_v51  ;;  %v5929_v33 = vsub.f32 %v2483_v44, %v5922_v35  ;;  %v1336_v44 = vadd.f32 %v5756_v23, %v5750_v54  ;;  %v1340_v23 = vadd.f32 %v5793_v18, %v5786_v27 }
 0x1bd   : > { %v1656_v9 = vadd.f32 %v1655_v19, %v1591_v58  ;;  %v5939_v58 = vand.u32 4294901760, %v2484_v17 }
 0x1be   : > { %2708 = vmatmul.f32.gmra.mxu3 %v5859_v62  ;;  %v1412_v4 = vpop.f32.mrf.mxu0  ;;  %v1495_v57 = vpop.f32.mrf.mxu1  ;;  %v2584_v38 = vand.u32 4294901760, %v5929_v33 }
 0x1bf   : > { %v1413_v55 = vadd.f32 %v1412_v4, %v1328_v43  ;;  %v1594_v16 = vpop.f32.mrf.mxu2  ;;  %3072 = vrot.lane.b32.xlu1 %v1656_v9, %s3756_s11 }
 0x1c0   : > { %v1659_v1 = vpop.f32.mrf.mxu3  ;;  %v2585_v41 = vsub.f32 %v5929_v33, %v2584_v38 }
 0x1c1   : > { %v1490_v42 = vadd.f32 %v1489_v24, %v1413_v55  ;;  %v1332_v24 = vadd.f32 %v5714_v8, %v5710_v40  ;;  %v5945_v8 = vsub.f32 %v2484_v17, %v5939_v58 }
 0x1c2   : > { %2288 = vmatmul.f32.gmra.mxu0 %v6430_v10  ;;  %2357 = vmatmul.f32.gmra.mxu1 %v5574_v7 }
 0x1c3   : > { %v1595_v20 = vadd.f32 %v1594_v16, %v1490_v42  ;;  %v2592_v50 = vand.u32 4294901760, %v5945_v8 }
 0x1c4   : > { %2571 = vmatmul.f32.gmra.mxu2 %v2570_v47 }
 0x1c5   : > { %v1660_v51 = vadd.f32 %v1659_v1, %v1595_v20  ;;  %v2593_v54 = vsub.f32 %v5945_v8, %v2592_v50 }
 0x1c6   : > { %2712 = vmatmul.f32.gmra.mxu3 %v5882_v3  ;;  %v1417_v19 = vpop.f32.mrf.mxu0  ;;  %v1501_v2 = vpop.f32.mrf.mxu1 }
 0x1c7   : > { %v1418_v22 = vadd.f32 %v1417_v19, %v1332_v24  ;;  %v1598_v10 = vpop.f32.mrf.mxu2  ;;  %3074 = vrot.lane.b32.xlu2 %v1660_v51, %s3756_s11 }
 0x1c8   : > { %v1663_v6 = vpop.f32.mrf.mxu3 }
 0x1c9   : > { %v1496_v48 = vadd.f32 %v1495_v57, %v1418_v22  ;;  %v2586_v57 = vand.u32 4294901760, %v2585_v41 }
 0x1ca   : > { %2292 = vmatmul.f32.gmra.mxu0 %v5574_v7  ;;  %2361 = vmatmul.f32.gmra.mxu1 %v5657_v60 }
 0x1cb   : > { %v1599_v40 = vadd.f32 %v1598_v10, %v1496_v48 }
 0x1cc   : > { %2579 = vmatmul.f32.gmra.mxu2 %v2578_v15 }
 0x1cd   : > { %v1664_v43 = vadd.f32 %v1663_v6, %v1599_v40 }
 0x1ce   : > { %2716 = vmatmul.f32.gmra.mxu3 %v5902_v39  ;;  %v1422_v9 = vpop.f32.mrf.mxu0  ;;  %v1507_v34 = vpop.f32.mrf.mxu1 }
 0x1cf   : > { %v1423_v7 = vadd.f32 %v1422_v9, %v1336_v44  ;;  %v1602_v4 = vpop.f32.mrf.mxu2  ;;  %3076 = vrot.lane.b32.xlu2 %v1664_v43, %s3756_s11 }
 0x1d0   : > { %v1667_v55 = vpop.f32.mrf.mxu3 }
 0x1d1   : > { %v1502_v16 = vadd.f32 %v1501_v2, %v1423_v7 }
 0x1d2   : > { %2296 = vmatmul.f32.gmra.mxu0 %v5657_v60  ;;  %2365 = vmatmul.f32.gmra.mxu1 %v5707_v32  ;;  %v2594_v60 = vand.u32 4294901760, %v2593_v54 }
 0x1d3   : > { %v1603_v47 = vadd.f32 %v1602_v4, %v1502_v16 }
 0x1d4   : > { %2587 = vmatmul.f32.gmra.mxu2 %v2586_v57 }
 0x1d5   : > { %v1668_v1 = vadd.f32 %v1667_v55, %v1603_v47 }
 0x1d6   : > { %2720 = vmatmul.f32.gmra.mxu3 %v5922_v35  ;;  %v1427_v42 = vpop.f32.mrf.mxu0  ;;  %v1513_v56 = vpop.f32.mrf.mxu1 }
 0x1d7   : > { %v1428_v20 = vadd.f32 %v1427_v42, %v1340_v23  ;;  %v1606_v63 = vpop.f32.mrf.mxu2  ;;  %3078 = vrot.lane.b32.xlu2 %v1668_v1, %s3756_s11 }
 0x1d8   : > { %v1671_v17 = vpop.f32.mrf.mxu3 }
 0x1d9   : > { %v1508_v24 = vadd.f32 %v1507_v34, %v1428_v20 }
 0x1da   : > { %2300 = vmatmul.f32.gmra.mxu0 %v5707_v32  ;;  %2369 = vmatmul.f32.gmra.mxu1 %v5742_v11 }
 0x1db   : > { %v1607_v51 = vadd.f32 %v1606_v63, %v1508_v24 }
 0x1dc   : > { %2595 = vmatmul.f32.gmra.mxu2 %v2594_v60 }
 0x1dd   : > { %v1672_v19 = vadd.f32 %v1671_v17, %v1607_v51 }
 0x1de   : > { %2724 = vmatmul.f32.gmra.mxu3 %v5939_v58  ;;  %v1432_v27 = vpop.f32.mrf.mxu0  ;;  %v5967_v18 = vpop.f32.mrf.mxu1 }
 0x1df   : > { %v1433_v2 = vadd.f32 %v1432_v27, %v5833_v59  ;;  %v1610_v22 = vpop.f32.mrf.mxu2  ;;  %3080 = vrot.lane.b32.xlu2 %v1672_v19, %s3756_s11 }
 0x1e0   : > { %v1675_v10 = vpop.f32.mrf.mxu3 }
 0x1e1   : > { %v1514_v15 = vadd.f32 %v1513_v56, %v1433_v2 }
 0x1e2   : > { %2304 = vmatmul.f32.gmra.mxu0 %v5742_v11  ;;  %2852 = vmatmul.f32.vlgmr.msrb.gmra.mxu1 %v2536_v29 }
 0x1e3   : > { %v1611_v32 = vadd.f32 %v1610_v22, %v1514_v15 }
 0x1e4   : > { %2963 = vmatmul.f32.vlgmr.msrb.gmra.mxu2 %v5752_v46 }
 0x1e5   : > { %v5975_v6 = vadd.f32 %v1675_v10, %v1611_v32 }
 0x1e6   : > { %3028 = vmatmul.f32.vlgmr.msrb.gmra.mxu3 %v5752_v46  ;;  %v1853_v48 = vpop.f32.mrf.mxu0  ;;  %v5978_v40 = vpop.f32.mrf.mxu1 }
 0x1e7   : > { %v2092_v59 = vpop.f32.mrf.mxu2 }
 0x1e8   : > { %v5980_v41 = vpop.f32.mrf.mxu3 }
 0x1ea   : > { %2778 = vmatmul.f32.vlgmr.msrb.gmra.mxu0 %v5770_v31  ;;  %2858 = vmatmul.f32.gmra.mxu1 %v2544_v28 }
 0x1ec   : > { %2967 = vmatmul.f32.gmra.mxu2 %v5788_v36 }
 0x1ee   : > { %3032 = vmatmul.f32.gmra.mxu3 %v5788_v36  ;;  %v1861_v11 = vpop.f32.mrf.mxu0  ;;  %v5987_v29 = vpop.f32.mrf.mxu1 }
 0x1ef   : > { %v5989_v44 = vpop.f32.mrf.mxu2 }
 0x1f0   : > { %v5991_v46 = vpop.f32.mrf.mxu3 }
 0x1f2   : > { %2783 = vmatmul.f32.gmra.mxu0 %v5809_v30  ;;  %2864 = vmatmul.f32.gmra.mxu1 %v2552_v5 }
 0x1f4   : > { %2971 = vmatmul.f32.gmra.mxu2 %v5823_v13 }
 0x1f6   : > { %3036 = vmatmul.f32.gmra.mxu3 %v5823_v13  ;;  %v5998_v31 = vpop.f32.mrf.mxu0  ;;  %v6000_v28 = vpop.f32.mrf.mxu1 }
 0x1f7   : > { %v6002_v36 = vpop.f32.mrf.mxu2  ;;  %v2019_v17 = vadd.f32 %v5987_v29, %v5998_v31 }
 0x1f9   : > { %v6004_v43 = vpop.f32.mrf.mxu3  ;;  %v2103_v2 = vadd.f32 %v6002_v36, %v2019_v17 }
 0x1fa   : > { %2788 = vmatmul.f32.gmra.mxu0 %v5840_v61  ;;  %2870 = vmatmul.f32.gmra.mxu1 %v2560_v26 }
 0x1fb   : > { %v2179_v15 = vadd.f32 %v6004_v43, %v2103_v2 }
 0x1fc   : > { %2975 = vmatmul.f32.gmra.mxu2 %v5859_v62 }
 0x1fe   : > { %3040 = vmatmul.f32.gmra.mxu3 %v5859_v62 }
 0x1ff   : > { %v6011_v30 = vpop.f32.mrf.mxu0  ;;  %v6013_v13 = vpop.f32.mrf.mxu1 }
 0x200   : > { %v6015_v5 = vpop.f32.mrf.mxu2  ;;  %v2023_v32 = vadd.f32 %v6000_v28, %v6011_v30 }
 0x201   : > { %v6017_v9 = vpop.f32.mrf.mxu3 }
 0x202   : > { %2793 = vmatmul.f32.gmra.mxu0 %v5869_v45  ;;  %2876 = vmatmul.f32.gmra.mxu1 %v2568_v25  ;;  %v2108_v29 = vadd.f32 %v6015_v5, %v2023_v32 }
 0x204   : > { %2979 = vmatmul.f32.gmra.mxu2 %v5882_v3 }
 0x206   : > { %3044 = vmatmul.f32.gmra.mxu3 %v5882_v3 }
 0x207   : > { %v6024_v61 = vpop.f32.mrf.mxu0  ;;  %v6026_v62 = vpop.f32.mrf.mxu1 }
 0x208   : > { %v6028_v26 = vpop.f32.mrf.mxu2 }
 0x209   : > { %v6030_v34 = vpop.f32.mrf.mxu3 }
 0x20a   : > { %2798 = vmatmul.f32.gmra.mxu0 %v5889_v12  ;;  %2882 = vmatmul.f32.gmra.mxu1 %v2576_v14 }
 0x20c   : > { %2983 = vmatmul.f32.gmra.mxu2 %v5902_v39 }
 0x20e   : > { %3048 = vmatmul.f32.gmra.mxu3 %v5902_v39 }
 0x20f   : > { %v6037_v45 = vpop.f32.mrf.mxu0  ;;  %v6039_v3 = vpop.f32.mrf.mxu1 }
 0x210   : > { %v6041_v25 = vpop.f32.mrf.mxu2 }
 0x211   : > { %v6043_v7 = vpop.f32.mrf.mxu3 }
 0x212   : > { %2803 = vmatmul.f32.gmra.mxu0 %v5909_v0  ;;  %2888 = vmatmul.f32.gmra.mxu1 %v2584_v38  ;;  %v2011_v0 = vadd.f32 %v5967_v18, %v1853_v48 }
 0x214   : > { %2987 = vmatmul.f32.gmra.mxu2 %v5922_v35  ;;  %v2093_v16 = vadd.f32 %v2092_v59, %v2011_v0 }
 0x216   : > { %3052 = vmatmul.f32.gmra.mxu3 %v5922_v35  ;;  %v2167_v47 = vadd.f32 %v5980_v41, %v2093_v16 }
 0x217   : > { %v6050_v12 = vpop.f32.mrf.mxu0  ;;  %v6052_v39 = vpop.f32.mrf.mxu1 }
 0x218   : > { %v6054_v14 = vpop.f32.mrf.mxu2 }
 0x219   : > { %v6056_v4 = vpop.f32.mrf.mxu3 }
 0x21a   : > { %2808 = vmatmul.f32.gmra.mxu0 %v5929_v33  ;;  %2894 = vmatmul.f32.gmra.mxu1 %v2592_v50 }
 0x21c   : > { %2991 = vmatmul.f32.gmra.mxu2 %v5939_v58 }
 0x21e   : > { %3056 = vmatmul.f32.gmra.mxu3 %v5939_v58  ;;  %v2015_v58 = vadd.f32 %v5978_v40, %v1861_v11 }
 0x21f   : > { %v6064_v35 = vpop.f32.mrf.mxu0  ;;  %v2342_v38 = vpop.f32.mrf.mxu1 }
 0x220   : > { %v6066_v57 = vpop.f32.mrf.mxu2  ;;  %v2098_v20 = vadd.f32 %v5989_v44, %v2015_v58 }
 0x221   : > { %v6068_v55 = vpop.f32.mrf.mxu3  ;;  %v3075_v33 = vpop.permute.xlu2 %3074 }
 0x222   : > { %2813 = vmatmul.f32.gmra.mxu0 %v5945_v8  ;;  %v6073_v50 = vsel %vm3156_vm4, %v5675_v53, %v3075_v33  ;;  %v2173_v53 = vadd.f32 %v5991_v46, %v2098_v20  ;;  %v2027_v46 = vadd.f32 %v6013_v13, %v6024_v61 }
 0x224   : > { %v2113_v0 = vadd.f32 %v6028_v26, %v2027_v46 }
 0x226   : > { %v2191_v5 = vadd.f32 %v6030_v34, %v2113_v0  ;;  %v2035_v34 = vadd.f32 %v6039_v3, %v6050_v12 }
 0x227   : > { %v2277_v54 = vpop.f32.mrf.mxu0  ;;  %v2346_v23 = vpop.f32.mrf.mxu1 }
 0x228   : > { %v2278_v1 = vadd.f32 %v2277_v54, %v2167_v47  ;;  %v6077_v42 = vpop.f32.mrf.mxu2 }
 0x229   : > { %v6079_v56 = vpop.f32.mrf.mxu3  ;;  %v3077_v8 = vpop.permute.xlu2 %3076 }
 0x22a   : > { %v2343_v63 = vadd.f32 %v2342_v38, %v2278_v1  ;;  %v6084_v60 = vsel %vm3156_vm4, %v5721_v49, %v3077_v8 }
 0x22c   : > { %3100 = vrot.lane.b32.xlu2 %v2343_v63, %s3757_s10  ;;  %v2123_v63 = vadd.f32 %v6054_v14, %v2035_v34 }
 0x22f   : > { %v2281_v24 = vpop.f32.mrf.mxu0  ;;  %v2350_v51 = vpop.f32.mrf.mxu1 }
 0x230   : > { %v2282_v19 = vadd.f32 %v2281_v24, %v2173_v53  ;;  %v6090_v27 = vpop.f32.mrf.mxu2 }
 0x231   : > { %v6092_v18 = vpop.f32.mrf.mxu3  ;;  %v3079_v49 = vpop.permute.xlu2 %3078 }
 0x232   : > { %v2347_v22 = vadd.f32 %v2346_v23, %v2282_v19  ;;  %v6097_v10 = vsel %vm3156_vm4, %v5761_v21, %v3079_v49  ;;  %v2185_v21 = vadd.f32 %v6017_v9, %v2108_v29  ;;  %v2031_v9 = vadd.f32 %v6026_v62, %v6037_v45 }
 0x234   : > { %3102 = vrot.lane.b32.xlu0 %v2347_v22, %s3757_s10  ;;  %v2118_v58 = vadd.f32 %v6041_v25, %v2031_v9  ;;  %v2203_v25 = vadd.f32 %v6056_v4, %v2123_v63 }
 0x236   : > { %v2197_v26 = vadd.f32 %v6043_v7, %v2118_v58  ;;  %v2039_v7 = vadd.f32 %v6052_v39, %v6064_v35 }
 0x237   : > { %v2285_v48 = vpop.f32.mrf.mxu0  ;;  %v2354_v40 = vpop.f32.mrf.mxu1 }
 0x238   : > { %v2286_v59 = vadd.f32 %v2285_v48, %v2179_v15  ;;  %v6103_v41 = vpop.f32.mrf.mxu2  ;;  %v2698_v15 = vadd.f32 %v6079_v56, %v6077_v42 }
 0x239   : > { %v6105_v11 = vpop.f32.mrf.mxu3 }
 0x23a   : > { %v2351_v44 = vadd.f32 %v2350_v51, %v2286_v59  ;;  %v2128_v51 = vadd.f32 %v6066_v57, %v2039_v7 }
 0x23c   : > { %3104 = vrot.lane.b32.xlu1 %v2351_v44, %s3757_s10  ;;  %v2209_v14 = vadd.f32 %v6068_v55, %v2128_v51  ;;  %v2702_v44 = vadd.f32 %v6092_v18, %v6090_v27 }
 0x23f   : > { %v2289_v31 = vpop.f32.mrf.mxu0  ;;  %v2358_v36 = vpop.f32.mrf.mxu1 }
 0x240   : > { %v2290_v28 = vadd.f32 %v2289_v31, %v2185_v21  ;;  %v6112_v43 = vpop.f32.mrf.mxu2 }
 0x241   : > { %v6114_v30 = vpop.f32.mrf.mxu3 }
 0x242   : > { %v2355_v38 = vadd.f32 %v2354_v40, %v2290_v28 }
 0x244   : > { %3106 = vrot.lane.b32.xlu1 %v2355_v38, %s3757_s10  ;;  %v2706_v38 = vadd.f32 %v6105_v11, %v6103_v41 }
 0x247   : > { %v2293_v16 = vpop.f32.mrf.mxu0  ;;  %v2362_v33 = vpop.f32.mrf.mxu1 }
 0x248   : > { %v2294_v13 = vadd.f32 %v2293_v16, %v2191_v5  ;;  %v6121_v61 = vpop.f32.mrf.mxu2 }
 0x249   : > { %v6123_v47 = vpop.f32.mrf.mxu3 }
 0x24a   : > { %v2359_v54 = vadd.f32 %v2358_v36, %v2294_v13 }
 0x24c   : > { %3108 = vrot.lane.b32.xlu1 %v2359_v54, %s3757_s10  ;;  %v2710_v54 = vadd.f32 %v6114_v30, %v6112_v43 }
 0x24f   : > { %v2297_v23 = vpop.f32.mrf.mxu0  ;;  %v2366_v1 = vpop.f32.mrf.mxu1 }
 0x250   : > { %v2298_v62 = vadd.f32 %v2297_v23, %v2197_v26  ;;  %v6130_v45 = vpop.f32.mrf.mxu2 }
 0x251   : > { %v6132_v20 = vpop.f32.mrf.mxu3 }
 0x252   : > { %v2363_v8 = vadd.f32 %v2362_v33, %v2298_v62  ;;  %v2718_v51 = vadd.f32 %v6132_v20, %v6130_v45 }
 0x254   : > { %3110 = vrot.lane.b32.xlu1 %v2363_v8, %s3757_s10 }
 0x257   : > { %v2301_v53 = vpop.f32.mrf.mxu0  ;;  %v2370_v17 = vpop.f32.mrf.mxu1 }
 0x258   : > { %v2302_v3 = vadd.f32 %v2301_v53, %v2203_v25  ;;  %v6139_v12 = vpop.f32.mrf.mxu2 }
 0x259   : > { %v6141_v24 = vpop.f32.mrf.mxu3 }
 0x25a   : > { %v2367_v19 = vadd.f32 %v2366_v1, %v2302_v3 }
 0x25c   : > { %3112 = vrot.lane.b32.xlu1 %v2367_v19, %s3757_s10 }
 0x25f   : > { %v2305_v2 = vpop.f32.mrf.mxu0  ;;  %v2853_v22 = vpop.f32.mrf.mxu1 }
 0x260   : > { %v2306_v4 = vadd.f32 %v2305_v2, %v2209_v14  ;;  %v6146_v49 = vpop.f32.mrf.mxu2 }
 0x261   : > { %v6148_v39 = vpop.f32.mrf.mxu3 }
 0x262   : > { %v2371_v35 = vadd.f32 %v2370_v17, %v2306_v4 }
 0x264   : > { %3114 = vrot.lane.b32.xlu1 %v2371_v35, %s3757_s10  ;;  %v2722_v35 = vadd.f32 %v6141_v24, %v6139_v12  ;;  %s3250_s10 = sshll.u32 %s3247_s24, 4  ;;  %s3251_s10 = int_to_ptr.hbm [resolvable:$true] %s3250_s10 }
 0x265   : > { %s3639_s29 = sshra.s32 %s3251_s10, 4  ;;  %s3640_s29 = int_to_ptr.hbm [resolvable:$true] %s3639_s29 }
 0x266   : > { %s3641_s5 = scalar_lea.hbm %s3640_s29, 64  ;;  %p3646_p2 = scmp.lt.s32.totalorder %s3640_s29, %s6288_s2 }
 0x267   : > { %v2779_v32 = vpop.f32.mrf.mxu0  ;;  %v2859_v57 = vpop.f32.mrf.mxu1  ;;  %p3642_p13 = scmp.ne.s32.totalorder %s3640_s29, %s3641_s5  ;;  %p3647_p4 = scmp.lt.s32.totalorder %s3645_s8, %s3641_s5 }
 0x268   : > { %v2780_v48 = vadd.f32 %v2779_v32, %v2698_v15  ;;  %v2964_v40 = vpop.f32.mrf.mxu2 }
 0x269   : > { %v3029_v59 = vpop.f32.mrf.mxu3  ;;  %p3643_p0 = pnand %p3642_p13, %p3831_p3  ;;  %p3648_p5 = por %p3647_p4, %p3646_p2 }
 0x26a   : > { %v2854_v29 = vadd.f32 %v2853_v22, %v2780_v48 }
 0x26b   : > { %p3644_p1 = pneg %p3643_p0 }
 0x26c   : > { %v2965_v55 = vadd.f32 %v2964_v40, %v2854_v29  ;;  %v2726_v29 = vadd.f32 %v6148_v39, %v6146_v49  ;;  %v3069_v39 = vpop.permute.xlu0 %3068 }
 0x26d   : > { %p3649_p6 = pnand %p3648_p5, %p3644_p1 }
 0x26e   : > { %v3030_v21 = vadd.f32 %v3029_v59, %v2965_v55 }
 0x26f   : > { %v2784_v46 = vpop.f32.mrf.mxu0  ;;  %v2865_v31 = vpop.f32.mrf.mxu1 }
 0x270   : > { %v2785_v36 = vadd.f32 %v2784_v46, %v2702_v44  ;;  %v2968_v28 = vpop.f32.mrf.mxu2  ;;  %3132 = vrot.lane.b32.xlu2 %v3030_v21, %s3758_s27 }
 0x271   : > { %v3033_v0 = vpop.f32.mrf.mxu3 }
 0x272   : > { %v2860_v42 = vadd.f32 %v2859_v57, %v2785_v36 }
 0x274   : > { %v2969_v56 = vadd.f32 %v2968_v28, %v2860_v42  ;;  %v3071_v42 = vpop.permute.xlu1 %3070 }
 0x276   : > { %v3034_v5 = vadd.f32 %v3033_v0, %v2969_v56  ;;  %v6177_v0 = vpop.permute.xlu2 %3080 }
 0x277   : > { %v2789_v9 = vpop.f32.mrf.mxu0  ;;  %v2871_v27 = vpop.f32.mrf.mxu1 }
 0x278   : > { %v2790_v16 = vadd.f32 %v2789_v9, %v2706_v38  ;;  %v2972_v33 = vpop.f32.mrf.mxu2  ;;  %3082 = vrot.lane.b32.xlu2 %v5975_v6, %s3756_s11  ;;  %3134 = vrot.lane.b32.xlu0 %v3034_v5, %s3758_s27  ;;  %v2714_v6 = vadd.f32 %v6123_v47, %v6121_v61  ;;  %v6431_v38 = vld [vmem:[#allocation13_spill] sm:$0xff]  ;;  %s3248_s11 = sshll.u32 %s6187_s4, 4  ;;  %s3249_s11 = int_to_ptr.vmem [resolvable:$true] %s3248_s11 }
 0x279   : > { %v3037_v18 = vpop.f32.mrf.mxu3  ;;  %v3157_v5 = vsel %vm3156_vm4, %v6431_v38, %v3069_v39 }
 0x27a   : > { %v2866_v13 = vadd.f32 %v2865_v31, %v2790_v16 }
 0x27c   : > { %v2973_v58 = vadd.f32 %v2972_v33, %v2866_v13  ;;  %v3073_v49 = vpop.permute.xlu1 %3072 }
 0x27e   : > { %v3038_v26 = vadd.f32 %v3037_v18, %v2973_v58 }
 0x27f   : > { %v2794_v34 = vpop.f32.mrf.mxu0  ;;  %v2877_v62 = vpop.f32.mrf.mxu1 }
 0x280   : > { %v2795_v23 = vadd.f32 %v2794_v34, %v2710_v54  ;;  %v2976_v41 = vpop.f32.mrf.mxu2  ;;  %3136 = vrot.lane.b32.xlu0 %v3038_v26, %s3758_s27  ;;  %v6432_v54 = vld [vmem:[#allocation17_spill] sm:$0xff] }
 0x281   : > { %v3041_v11 = vpop.f32.mrf.mxu3  ;;  %v3158_v26 = vsel %vm3156_vm4, %v6432_v54, %v3071_v42 }
 0x282   : > { %v2872_v1 = vadd.f32 %v2871_v27, %v2795_v23 }
 0x284   : > { %v2977_v63 = vadd.f32 %v2976_v41, %v2872_v1 }
 0x286   : > { %v3042_v8 = vadd.f32 %v3041_v11, %v2977_v63  ;;  %v3101_v56 = vpop.permute.xlu2 %3100 }
 0x287   : > { %v2799_v25 = vpop.f32.mrf.mxu0  ;;  %v2883_v3 = vpop.f32.mrf.mxu1  ;;  %v3166_v9 = vsel %vm3165_vm5, %v3157_v5, %v3101_v56 }
 0x288   : > { %v2800_v7 = vadd.f32 %v2799_v25, %v2714_v6  ;;  %v2980_v53 = vpop.f32.mrf.mxu2  ;;  %3138 = vrot.lane.b32.xlu0 %v3042_v8, %s3758_s27  ;;  %v6433_v8 = vld [vmem:[#allocation21_spill] sm:$0xff] }
 0x289   : > { %v3045_v43 = vpop.f32.mrf.mxu3  ;;  %v3159_v25 = vsel %vm3156_vm4, %v6433_v8, %v3073_v49 }
 0x28a   : > { %v2878_v30 = vadd.f32 %v2877_v62, %v2800_v7 }
 0x28c   : > { %v2981_v17 = vadd.f32 %v2980_v53, %v2878_v30 }
 0x28e   : > { %v3046_v19 = vadd.f32 %v3045_v43, %v2981_v17 }
 0x28f   : > { %v2804_v14 = vpop.f32.mrf.mxu0  ;;  %v2889_v32 = vpop.f32.mrf.mxu1 }
 0x290   : > { %v2805_v2 = vadd.f32 %v2804_v14, %v2718_v51  ;;  %v2984_v22 = vpop.f32.mrf.mxu2  ;;  %3140 = vrot.lane.b32.xlu0 %v3046_v19, %s3758_s27 }
 0x291   : > { %v3049_v61 = vpop.f32.mrf.mxu3 }
 0x292   : > { %v2884_v47 = vadd.f32 %v2883_v3, %v2805_v2 }
 0x294   : > { %v2985_v4 = vadd.f32 %v2984_v22, %v2884_v47 }
 0x296   : > { %v3050_v15 = vadd.f32 %v3049_v61, %v2985_v4 }
 0x297   : > { %v2809_v57 = vpop.f32.mrf.mxu0  ;;  %v2895_v12 = vpop.f32.mrf.mxu1 }
 0x298   : > { %v2810_v48 = vadd.f32 %v2809_v57, %v2722_v35  ;;  %3142 = vrot.lane.b32.xlu0 %v3050_v15, %s3758_s27  ;;  %v2988_v40 = vpop.f32.mrf.mxu2 }
 0x299   : > { %v3053_v20 = vpop.f32.mrf.mxu3 }
 0x29a   : > { %v2890_v45 = vadd.f32 %v2889_v32, %v2810_v48 }
 0x29c   : > { %v2989_v59 = vadd.f32 %v2988_v40, %v2890_v45 }
 0x29e   : > { %v3054_v55 = vadd.f32 %v3053_v20, %v2989_v59 }
 0x29f   : > { %v2814_v44 = vpop.f32.mrf.mxu0 }
 0x2a0   : > { %v2815_v21 = vadd.f32 %v2814_v44, %v2726_v29  ;;  %3144 = vrot.lane.b32.xlu0 %v3054_v55, %s3758_s27  ;;  %v2992_v46 = vpop.f32.mrf.mxu2 }
 0x2a1   : > { %v3057_v36 = vpop.f32.mrf.mxu3 }
 0x2a2   : > { %v2896_v24 = vadd.f32 %v2895_v12, %v2815_v21 }
 0x2a4   : > { %v2993_v31 = vadd.f32 %v2992_v46, %v2896_v24 }
 0x2a6   : > { %v3058_v28 = vadd.f32 %v3057_v36, %v2993_v31  ;;  %v3103_v58 = vpop.permute.xlu0 %3102 }
 0x2a7   : > { %v3167_v34 = vsel %vm3165_vm5, %v3158_v26, %v3103_v58 }
 0x2a8   : > { %3146 = vrot.lane.b32.xlu2 %v3058_v28, %s3758_s27  ;;  %s3229_s27 = scalar_lea.sflag [#allocation3], %s6180_s28 }
 0x2ae   : > { %v3105_v27 = vpop.permute.xlu1 %3104 }
 0x2af   : > { %v3168_v7 = vsel %vm3165_vm5, %v3159_v25, %v3105_v27 }
 0x2b6   : > { %v3107_v18 = vpop.permute.xlu1 %3106 }
 0x2b7   : > { %v3169_v19 = vsel %vm3165_vm5, %v6073_v50, %v3107_v18 }
 0x2be   : > { %v3109_v13 = vpop.permute.xlu1 %3108 }
 0x2bf   : > { %v3170_v32 = vsel %vm3165_vm5, %v6084_v60, %v3109_v13 }
 0x2c6   : > { %v3111_v41 = vpop.permute.xlu1 %3110 }
 0x2c7   : > { %v3171_v60 = vsel %vm3165_vm5, %v6097_v10, %v3111_v41  ;;  %v3163_v10 = vsel %vm3156_vm4, %v5797_v37, %v6177_v0 }
 0x2ca   : > { %v3133_v16 = vpop.permute.xlu2 %3132 }
 0x2cb   : > { %v3175_v33 = vsel %vm3174_vm6, %v3166_v9, %v3133_v16 }
 0x2cc   : > { %3183 = vst [vmem:[%s6187_s4] sm:$0xff] %v3175_v33  ;;  %v3204_v1 = vmul.f32 %v3175_v33, %v3175_v33 }
 0x2ce   : > { %v3113_v3 = vpop.permute.xlu1 %3112 }
 0x2cf   : > { %v3172_v24 = vsel %vm3165_vm5, %v3163_v10, %v3113_v3 }
 0x2d2   : > { %v3083_v14 = vpop.permute.xlu2 %3082 }
 0x2d3   : > { %v3164_v15 = vsel %vm3156_vm4, %v5831_v52, %v3083_v14 }
 0x2d6   : > { %v3115_v35 = vpop.permute.xlu1 %3114 }
 0x2d7   : > { %v3173_v50 = vsel %vm3165_vm5, %v3164_v15, %v3115_v35 }
 0x2ea   : > { %v3135_v23 = vpop.permute.xlu0 %3134 }
 0x2eb   : > { %v3176_v11 = vsel %vm3174_vm6, %v3167_v34, %v3135_v23 }
 0x2ec   : > { %3184 = vst [vmem:[%s6187_s4 + $0x8] sm:$0xff] %v3176_v11  ;;  %v3191_v62 = vadd.f32 %v3176_v11, %v3175_v33  ;;  %v3205_v63 = vmul.f32 %v3176_v11, %v3176_v11 }
 0x2ee   : > { %v3212_v6 = vadd.f32 %v3205_v63, %v3204_v1 }
 0x2f2   : > { %v3137_v53 = vpop.permute.xlu0 %3136 }
 0x2f3   : > { %v3177_v43 = vsel %vm3174_vm6, %v3168_v7, %v3137_v53 }
 0x2f4   : > { %3185 = vst [vmem:[%s6187_s4 + $0x10] sm:$0xff] %v3177_v43  ;;  %v3192_v30 = vadd.f32 %v3191_v62, %v3177_v43  ;;  %v3206_v17 = vmul.f32 %v3177_v43, %v3177_v43 }
 0x2f6   : > { %v3213_v51 = vadd.f32 %v3212_v6, %v3206_v17 }
 0x2fa   : > { %v3139_v2 = vpop.permute.xlu0 %3138 }
 0x2fb   : > { %v3178_v22 = vsel %vm3174_vm6, %v3169_v19, %v3139_v2 }
 0x2fc   : > { %3186 = vst [vmem:[%s6187_s4 + $0x18] sm:$0xff] %v3178_v22  ;;  %v3193_v61 = vadd.f32 %v3192_v30, %v3178_v22  ;;  %v3207_v47 = vmul.f32 %v3178_v22, %v3178_v22 }
 0x2fe   : > { %v3214_v4 = vadd.f32 %v3213_v51, %v3207_v47 }
 0x302   : > { %v3147_v57 = vpop.permute.xlu2 %3146  ;;  %v3141_v48 = vpop.permute.xlu0 %3140 }
 0x303   : > { %v3182_v40 = vsel %vm3174_vm6, %v3173_v50, %v3147_v57  ;;  %v3179_v45 = vsel %vm3174_vm6, %v3170_v32, %v3141_v48 }
 0x304   : > { %3190 = vst [vmem:[%s6187_s4 + $0x38] sm:$0xff] %v3182_v40  ;;  %v3194_v20 = vadd.f32 %v3193_v61, %v3179_v45  ;;  %v3208_v59 = vmul.f32 %v3179_v45, %v3179_v45 }
 0x305   : > { %3187 = vst [vmem:[%s6187_s4 + $0x20] sm:$0xff] %v3179_v45 }
 0x306   : > { %v3215_v52 = vadd.f32 %v3214_v4, %v3208_v59 }
 0x30a   : > { %v3143_v29 = vpop.permute.xlu0 %3142 }
 0x30b   : > { %v3180_v55 = vsel %vm3174_vm6, %v3171_v60, %v3143_v29 }
 0x30c   : > { %3188 = vst [vmem:[%s6187_s4 + $0x28] sm:$0xff] %v3180_v55  ;;  %v3195_v44 = vadd.f32 %v3194_v20, %v3180_v55  ;;  %v3209_v21 = vmul.f32 %v3180_v55, %v3180_v55 }
 0x30e   : > { %v3216_v12 = vadd.f32 %v3215_v52, %v3209_v21 }
 0x312   : > { %v3145_v46 = vpop.permute.xlu0 %3144 }
 0x313   : > { %v3181_v31 = vsel %vm3174_vm6, %v3172_v24, %v3145_v46 }
 0x314   : > { %3189 = vst [vmem:[%s6187_s4 + $0x30] sm:$0xff] %v3181_v31  ;;  %v3196_v36 = vadd.f32 %v3195_v44, %v3181_v31  ;;  %v3210_v28 = vmul.f32 %v3181_v31, %v3181_v31 }
 0x315   : > { %3652 = shalt.err (!%p3649_p6)
}
 0x316   : > { %s3759_s4 = smov 128   ;;  %v3211_v37 = vmul.f32 %v3182_v40, %v3182_v40  ;;  %v3197_v0 = vadd.f32 %v3196_v36, %v3182_v40  ;;  %v3217_v42 = vadd.f32 %v3216_v12, %v3210_v28  ;;  %s3503_s24 = sshll.u32 %s3739_s16, 2  ;;  %vm3225_vm7 = vcmask 1040384  }
 0x317   : > { %3508 = dma.vmem_to_hbm [thread:$0]  (%p3831_p3), %s3249_s11, 1024, %s3251_s10, %s3229_s27, %s3759_s4, %s3759_s4, %s3755_s21  }
 0x318   : > { %v3198_v56 = vrot.slane %v3197_v0, 4  ;;  %v3218_v49 = vadd.f32 %v3217_v42, %v3211_v37  ;;  %s3263_s6 = sadd.s32 %s3735_s15, %s3503_s24  ;;  %s3394_s29 = sshll.u32 %s6180_s28, 1 }
 0x319   : > { %s3504_s5 = sshll.u32 %s3263_s6, 1  ;;  %s190_s16 = scalar_lea.vmem [#allocation4], %s3394_s29 }
 0x31a   : > { %v3199_v39 = vadd.f32 %v3198_v56, %v3197_v0  ;;  %v3219_v38 = vrot.slane %v3218_v49, 4  ;;  %s3265_s21 = scalar_lea.hbm %s6289_s3, %s3504_s5  ;;  %s3267_s11 = sshll.u32 %s190_s16, 4  ;;  %s3268_s11 = int_to_ptr.vmem [resolvable:$true] %s3267_s11 }
 0x31b   : > { %s3269_s15 = sshll.u32 %s3265_s21, 4  ;;  %s3234_s10 = scalar_lea.sflag [#allocation5], %s6180_s28  ;;  %s3270_s15 = int_to_ptr.hbm [resolvable:$true] %s3269_s15 }
 0x31c   : > { %v3200_v5 = vrot.slane %v3199_v39, 2  ;;  %v3220_v9 = vadd.f32 %v3219_v38, %v3218_v49  ;;  %s3667_s27 = sshra.s32 %s3270_s15, 4  ;;  %s3673_s24 = scalar_lea.hbm %s6289_s3, 16  ;;  %s3668_s27 = int_to_ptr.hbm [resolvable:$true] %s3667_s27 }
 0x31d   : > { %s3669_s9 = scalar_lea.hbm %s3668_s27, 2  ;;  %p3674_p11 = scmp.lt.s32.totalorder %s3668_s27, %s6289_s3 }
 0x31e   : > { %v3201_v16 = vadd.f32 %v3200_v5, %v3199_v39  ;;  %v3221_v33 = vrot.slane %v3220_v9, 2  ;;  %p3670_p7 = scmp.ne.s32.totalorder %s3668_s27, %s3669_s9  ;;  %p3675_p12 = scmp.lt.s32.totalorder %s3673_s24, %s3669_s9 }
 0x320   : > { %v3202_v27 = vrot.slane %v3201_v16, 1  ;;  %v3222_v18 = vadd.f32 %v3221_v33, %v3220_v9  ;;  %p3671_p9 = pnand %p3670_p7, %p3831_p3  ;;  %p3676_p13 = por %p3675_p12, %p3674_p11 }
 0x322   : > { %v3223_v13 = vrot.slane %v3222_v18, 1  ;;  %v3203_v58 = vadd.f32 %v3202_v27, %v3201_v16  ;;  %p3672_p10 = pneg %p3671_p9 }
 0x324   : > { %v3224_v54 = vadd.f32 %v3223_v13, %v3222_v18  ;;  %p3677_p0 = pnand %p3676_p13, %p3672_p10 }
 0x326   : > { %v3226_v26 = vsel %vm3225_vm7, %v3203_v58, %v3224_v54 }
 0x327   : > { %3227 = vst [vmem:[%s190_s16] sm:$0x3] %v3226_v26 }
 0x328   : > { %3680 = shalt.err (!%p3677_p0)
}
 0x329   : > { %3509 = dma.vmem_to_hbm [thread:$0]  (%p3831_p3), %s3268_s11, 32, %s3270_s15, %s3234_s10  }
 0x32a PF: > { %p3519_p1 = scmp.ge.s32.totalorder %s3751_s19, 2  ;;  %s3281_s28 = sand.u32 1, %s3723_s12  }
 0x32b   : > { %s3282_s5 = scalar_lea.sflag [#allocation3], %s3281_s28 }
 0x32c   : > { %p3513_p2 = pnand %p3519_p1, %p3840_p8 }
 0x32e   : > { %p3514_p4 = pneg %p3513_p2 }
 0x330   : > { %3714 = dma.done.wait (%p3514_p4), %s3282_s5, 1024  }
 0x331   : > { %3716 = vsyncadd (%p3514_p4), %s3282_s5, 4294966272  ;;  %s3292_s7 = scalar_lea.sflag [#allocation5], %s3281_s28 }
 0x332   : > { %3718 = dma.done.wait (%p3514_p4), %s3292_s7, 32  }
 0x333   : > { %3720 = vsyncadd (%p3514_p4), %s3292_s7, 4294967264  ;;  %s20_s19 = sadd.s32 1, %s3751_s19   ;;  %s6434_s12 = smov %s3727_s13 }
 0x334   : > { %p17_p5 = scmp.ge.s32.totalorder %s20_s19, 10   ;;  %s6435_s13 = smov %s3731_s14 }
 0x335   : > { %s6436_s14 = smov %s3849_s30  ;;  %s6437_s15 = smov %s3743_s17 }
 0x336   : > { %s6438_s16 = smov %s3747_s18  ;;  %s6439_s17 = smov %s6442_s22 }
 0x337   : > { %s6440_s18 = smov %s6446_s23  ;;  %19 = sbr.rel (!%p17_p5) target bundleno = 7 (0x7), region = 86 }
 0x33c   :  { %3298 = vsyncpa [#allocation3], 1 }
 0x33d   :  { %3300 = vsyncpa [#allocation3 + $0x1], 1 }
 0x33e   :  { %3301 = vsyncpa [#allocation5], 1 }
 0x33f   :  { %3303 = vsyncpa [#allocation5 + $0x1], 1 }

</bundles_post_ra>
